<compile_context>
chip_gen: v5e
topology: v5e:2x2
jax: 0.10.0
libtpu: 0.0.40
codegen_flags: <defaults>
</compile_context>

<pallas_src>
import math

import jax
import jax.numpy as jnp
from jax.experimental import pallas as pl
from jax.experimental.pallas import tpu as pltpu


_CONV_MATMUL_DTYPE = jnp.bfloat16  # bf16-native MXU on v6e/v7x; use jnp.float32 for exact f32


# ----------------------------- fused Pallas kernel --------------------------

def fused_cnn_kernel(x_ref,
                     w1_ref, b1_ref, s1_ref, t1_ref,
                     w2_ref, b2_ref, s2_ref, t2_ref,
                     w3_ref, b3_ref, s3_ref, t3_ref,
                     w4_ref, b4_ref,
                     w5_ref, b5_ref,
                     wfc_ref, bfc_ref,
                     o_ref):
    """Whole CNN forward for one sample (the grid iterates / parallelizes over batch).

    Activation layout is channels-last [L, C] (C on lanes, L on sublanes).
    """
    f32 = jnp.float32

    def conv_block(a, w_ref, b_ref, s_ref=None, t_ref=None):
        """Conv1d(k=7, 'same') as one im2col matmul + bias + ReLU + [BN] + MaxPool(2,2).

        a:     [L, Cin] f32
        w_ref: [7*Cin, Cout]  (row index = k*Cin + cin)
        returns [L//2, Cout] f32
        """
        L, cin = a.shape
        z = jnp.zeros((3, cin), f32)
        ap = jnp.concatenate([z, a, z], axis=0)                               # 'same' pad in VMEM
        cols = jnp.concatenate([ap[k:k + L, :] for k in range(7)], axis=-1)   # im2col [L, 7*Cin]
        y = jnp.dot(cols.astype(w_ref.dtype), w_ref[...],
                    preferred_element_type=f32)                               # one MXU matmul
        y = jnp.maximum(y + b_ref[...], 0.0)                                  # bias + ReLU
        if s_ref is not None:
            y = y * s_ref[...] + t_ref[...]                                   # folded eval-mode BN
        cout = y.shape[-1]
        return jnp.max(y.reshape(L // 2, 2, cout), axis=1)                    # MaxPool1d(2, 2)

    # ----- layer 1: Cin == 1 -> VPU broadcast-FMA conv (avoids depth-1 MXU matmuls)
    x = x_ref[0].astype(f32)                                                  # [128, 1]
    L0 = x.shape[0]
    zp = jnp.zeros((3, 1), f32)
    xp = jnp.concatenate([zp, x, zp], axis=0)                                 # [134, 1]
    w1 = w1_ref[...]                                                          # [7, 64]
    y = xp[0:L0, :] * w1[0:1, :]                                              # init from tap 0
    for k in range(1, 7):
        y = y + xp[k:k + L0, :] * w1[k:k + 1, :]
    y = jnp.maximum(y + b1_ref[...], 0.0)
    y = y * s1_ref[...] + t1_ref[...]
    a1 = jnp.max(y.reshape(L0 // 2, 2, 64), axis=1)                           # [64, 64]

    # ----- layers 2..5 (fully resident in VMEM / vregs)
    a2 = conv_block(a1, w2_ref, b2_ref, s2_ref, t2_ref)                       # [32, 128]
    a3 = conv_block(a2, w3_ref, b3_ref, s3_ref, t3_ref)                       # [16, 64]
    a4 = conv_block(a3, w4_ref, b4_ref)                                       # [8, 32]
    a5 = conv_block(a4, w5_ref, b5_ref)                                       # [4, 16]

    # ----- FC in the PyTorch flatten order via a row-permuted weight [4, 16, 5]
    #       out[o] = sum_{l,c} a5[l, c] * Wp[l, c, o] + b[o]
    out = jnp.dot(a5[0:1, :], wfc_ref[0], preferred_element_type=f32)         # [1, 5]
    for l in range(1, 4):
        out = out + jnp.dot(a5[l:l + 1, :], wfc_ref[l], preferred_element_type=f32)
    o_ref[...] = (out + bfc_ref[...]).reshape(1, 1, 5)


# ----------------------------- wrapper ---------------------------------------

def _const_spec(shape):
    """Full-array block that stays resident across all grid steps."""
    zeros = (0,) * len(shape)
    return pl.BlockSpec(shape, lambda b, _z=zeros: _z)


@jax.jit
def cnn_forward(x_ncl, params):
    """x_ncl: [B, 1, 128] (PyTorch NCL). Returns [B, 5]."""
    B, _, L = x_ncl.shape
    # NCL -> NLC: since Cin == 1 this is a pure (free) reshape, no transpose op.
    x = jnp.reshape(x_ncl.astype(jnp.float32), (B, L, 1))

    w1, b1 = params["conv1"]; s1, t1 = params["bn1"]
    w2, b2 = params["conv2"]; s2, t2 = params["bn2"]
    w3, b3 = params["conv3"]; s3, t3 = params["bn3"]
    w4, b4 = params["conv4"]
    w5, b5 = params["conv5"]
    wfc, bfc = params["fc"]

    operands = (x,
                w1, b1, s1, t1,
                w2, b2, s2, t2,
                w3, b3, s3, t3,
                w4, b4,
                w5, b5,
                wfc, bfc)

    in_specs = [pl.BlockSpec((1, L, 1), lambda b: (b, 0, 0))]
    in_specs += [_const_spec(op.shape) for op in operands[1:]]

    out = pl.pallas_call(
        fused_cnn_kernel,
        grid=(B,),
        out_shape=jax.ShapeDtypeStruct((B, 1, 5), jnp.float32),
        in_specs=in_specs,
        out_specs=pl.BlockSpec((1, 1, 5), lambda b: (b, 0, 0)),
        compiler_params=pltpu.CompilerParams(
            # One sample per grid step; two v7x TensorCores each take half the batch.
            dimension_semantics=("parallel",),
        ),
    )(*operands)
    return out.reshape(B, 5)


# ----------------------------- parameters ------------------------------------

def _conv_params(key, c_in, c_out, k=7, dtype=jnp.float32):
    """PyTorch Conv1d weight [Cout, Cin, K] -> im2col layout [K*Cin, Cout]."""
    kw, kb = jax.random.split(key)
    bound = 1.0 / math.sqrt(c_in * k)
    w = jax.random.uniform(kw, (c_out, c_in, k), jnp.float32, -bound, bound)
    b = jax.random.uniform(kb, (c_out,), jnp.float32, -bound, bound)
    w_im2col = jnp.transpose(w, (2, 1, 0)).reshape(k * c_in, c_out)  # row = k*Cin + cin
    return w_im2col.astype(dtype), b.reshape(1, c_out)


def _bn_params(key, c, eps=1e-5):
    """Eval-mode BatchNorm folded to scale/shift."""
    kg, kb, km, kv = jax.random.split(key, 4)
    gamma = 1.0 + 0.1 * jax.random.normal(kg, (c,), jnp.float32)
    beta = 0.1 * jax.random.normal(kb, (c,), jnp.float32)
    mean = 0.1 * jax.random.normal(km, (c,), jnp.float32)
    var = 1.0 + 0.1 * jax.random.uniform(kv, (c,), jnp.float32)
    scale = gamma / jnp.sqrt(var + eps)
    shift = beta - mean * scale
    return scale.reshape(1, c), shift.reshape(1, c)


def _fc_params(key, c=16, l=4, f_out=5):
    """PyTorch Linear weight [5, 64] (flatten order f = c*4 + l) -> [l, c, f_out]
    so the channels-last [4, 16] activation is contracted without any in-kernel
    transpose/flatten."""
    kw, kb = jax.random.split(key)
    f_in = c * l
    bound = 1.0 / math.sqrt(f_in)
    w = jax.random.uniform(kw, (f_out, f_in), jnp.float32, -bound, bound)
    b = jax.random.uniform(kb, (f_out,), jnp.float32, -bound, bound)
    wp = jnp.transpose(w).reshape(c, l, f_out)      # [c, l, o]
    wp = jnp.transpose(wp, (1, 0, 2))               # [l, c, o]
    return wp, b.reshape(1, f_out)


def init_params(key):
    keys = jax.random.split(key, 9)
    p = {}
    p["conv1"] = _conv_params(keys[0], 1, 64)                                  # VPU path, f32
    p["bn1"] = _bn_params(keys[1], 64)
    p["conv2"] = _conv_params(keys[2], 64, 128, dtype=_CONV_MATMUL_DTYPE)
    p["bn2"] = _bn_params(keys[3], 128)
    p["conv3"] = _conv_params(keys[4], 128, 64, dtype=_CONV_MATMUL_DTYPE)
    p["bn3"] = _bn_params(keys[5], 64)
    p["conv4"] = _conv_params(keys[6], 64, 32, dtype=_CONV_MATMUL_DTYPE)
    p["conv5"] = _conv_params(keys[7], 32, 16, dtype=_CONV_MATMUL_DTYPE)
    p["fc"] = _fc_params(keys[8])
    return p


# ----------------------------- main -------------------------------------------

if __name__ == "__main__":
    key = jax.random.PRNGKey(0)
    k_x, k_p = jax.random.split(key)

    # Input length must be 128 so that after five /2 maxpools the FC sees 16*4.
    x = jax.random.normal(k_x, (2, 1, 128), jnp.float32)
    params = init_params(k_p)

    out = jax.block_until_ready(cnn_forward(x, params))
    assert out.shape == (2, 5), out.shape
    print("KERNEL_OK")
</pallas_src>

<mosaic_0001>
module attributes {stable_mosaic.version = 11 : i64} {
  func.func @fused_cnn_kernel(%arg0: i32, %arg1: memref<1x128x1xf32, #tpu.memory_space<vmem>>, %arg2: memref<7x64xf32, #tpu.memory_space<vmem>>, %arg3: memref<1x64xf32, #tpu.memory_space<vmem>>, %arg4: memref<1x64xf32, #tpu.memory_space<vmem>>, %arg5: memref<1x64xf32, #tpu.memory_space<vmem>>, %arg6: memref<448x128xbf16, #tpu.memory_space<vmem>>, %arg7: memref<1x128xf32, #tpu.memory_space<vmem>>, %arg8: memref<1x128xf32, #tpu.memory_space<vmem>>, %arg9: memref<1x128xf32, #tpu.memory_space<vmem>>, %arg10: memref<896x64xbf16, #tpu.memory_space<vmem>>, %arg11: memref<1x64xf32, #tpu.memory_space<vmem>>, %arg12: memref<1x64xf32, #tpu.memory_space<vmem>>, %arg13: memref<1x64xf32, #tpu.memory_space<vmem>>, %arg14: memref<448x32xbf16, #tpu.memory_space<vmem>>, %arg15: memref<1x32xf32, #tpu.memory_space<vmem>>, %arg16: memref<224x16xbf16, #tpu.memory_space<vmem>>, %arg17: memref<1x16xf32, #tpu.memory_space<vmem>>, %arg18: memref<4x16x5xf32, #tpu.memory_space<vmem>>, %arg19: memref<1x5xf32, #tpu.memory_space<vmem>>, %arg20: memref<1x1x5xf32, #tpu.memory_space<vmem>>) attributes {dimension_semantics = [#tpu.dimension_semantics<parallel>], iteration_bounds = array<i64: 2>, scalar_prefetch = 0 : i64, scratch_operands = 0 : i64, tpu.core_type = #tpu.core_type<tc>, window_params = [{transform_indices = @transform_0, window_bounds = array<i64: 1, 128, 1>}, {pipeline_mode = #tpu.pipeline_mode<synchronous>, transform_indices = @transform_1, window_bounds = array<i64: 7, 64>}, {pipeline_mode = #tpu.pipeline_mode<synchronous>, transform_indices = @transform_2, window_bounds = array<i64: 1, 64>}, {pipeline_mode = #tpu.pipeline_mode<synchronous>, transform_indices = @transform_3, window_bounds = array<i64: 1, 64>}, {pipeline_mode = #tpu.pipeline_mode<synchronous>, transform_indices = @transform_4, window_bounds = array<i64: 1, 64>}, {pipeline_mode = #tpu.pipeline_mode<synchronous>, transform_indices = @transform_5, window_bounds = array<i64: 448, 128>}, {pipeline_mode = #tpu.pipeline_mode<synchronous>, transform_indices = @transform_6, window_bounds = array<i64: 1, 128>}, {pipeline_mode = #tpu.pipeline_mode<synchronous>, transform_indices = @transform_7, window_bounds = array<i64: 1, 128>}, {pipeline_mode = #tpu.pipeline_mode<synchronous>, transform_indices = @transform_8, window_bounds = array<i64: 1, 128>}, {pipeline_mode = #tpu.pipeline_mode<synchronous>, transform_indices = @transform_9, window_bounds = array<i64: 896, 64>}, {pipeline_mode = #tpu.pipeline_mode<synchronous>, transform_indices = @transform_10, window_bounds = array<i64: 1, 64>}, {pipeline_mode = #tpu.pipeline_mode<synchronous>, transform_indices = @transform_11, window_bounds = array<i64: 1, 64>}, {pipeline_mode = #tpu.pipeline_mode<synchronous>, transform_indices = @transform_12, window_bounds = array<i64: 1, 64>}, {pipeline_mode = #tpu.pipeline_mode<synchronous>, transform_indices = @transform_13, window_bounds = array<i64: 448, 32>}, {pipeline_mode = #tpu.pipeline_mode<synchronous>, transform_indices = @transform_14, window_bounds = array<i64: 1, 32>}, {pipeline_mode = #tpu.pipeline_mode<synchronous>, transform_indices = @transform_15, window_bounds = array<i64: 224, 16>}, {pipeline_mode = #tpu.pipeline_mode<synchronous>, transform_indices = @transform_16, window_bounds = array<i64: 1, 16>}, {pipeline_mode = #tpu.pipeline_mode<synchronous>, transform_indices = @transform_17, window_bounds = array<i64: 4, 16, 5>}, {pipeline_mode = #tpu.pipeline_mode<synchronous>, transform_indices = @transform_18, window_bounds = array<i64: 1, 5>}, {transform_indices = @transform_19, window_bounds = array<i64: 1, 1, 5>}]} {
    %c0 = arith.constant 0 : index
    %c0_0 = arith.constant 0 : index
    %c0_1 = arith.constant 0 : index
    %0 = vector.load %arg1[%c0, %c0_0, %c0_1] : memref<1x128x1xf32, #tpu.memory_space<vmem>>, vector<1x128x1xf32>
    %1 = vector.shape_cast %0 : vector<1x128x1xf32> to vector<128x1xf32>
    %cst = arith.constant 0.000000e+00 : f32
    %2 = vector.broadcast %cst : f32 to vector<3x1xf32>
    %3 = tpu.concatenate %2, %1, %2 in 0 : vector<3x1xf32>, vector<128x1xf32>, vector<3x1xf32> -> vector<134x1xf32>
    %c0_2 = arith.constant 0 : index
    %c0_3 = arith.constant 0 : index
    %4 = vector.load %arg2[%c0_2, %c0_3] : memref<7x64xf32, #tpu.memory_space<vmem>>, vector<7x64xf32>
    %5 = vector.extract_strided_slice %3 {offsets = [0, 0], sizes = [128, 1], strides = [1, 1]} : vector<134x1xf32> to vector<128x1xf32>
    %6 = vector.extract_strided_slice %4 {offsets = [0, 0], sizes = [1, 64], strides = [1, 1]} : vector<7x64xf32> to vector<1x64xf32>
    %7 = vector.broadcast %5 : vector<128x1xf32> to vector<128x64xf32>
    %8 = vector.broadcast %6 : vector<1x64xf32> to vector<128x64xf32>
    %9 = arith.mulf %7, %8 : vector<128x64xf32>
    %10 = vector.extract_strided_slice %3 {offsets = [1, 0], sizes = [128, 1], strides = [1, 1]} : vector<134x1xf32> to vector<128x1xf32>
    %11 = vector.extract_strided_slice %4 {offsets = [1, 0], sizes = [1, 64], strides = [1, 1]} : vector<7x64xf32> to vector<1x64xf32>
    %12 = vector.broadcast %10 : vector<128x1xf32> to vector<128x64xf32>
    %13 = vector.broadcast %11 : vector<1x64xf32> to vector<128x64xf32>
    %14 = arith.mulf %12, %13 : vector<128x64xf32>
    %15 = arith.addf %9, %14 : vector<128x64xf32>
    %16 = vector.extract_strided_slice %3 {offsets = [2, 0], sizes = [128, 1], strides = [1, 1]} : vector<134x1xf32> to vector<128x1xf32>
    %17 = vector.extract_strided_slice %4 {offsets = [2, 0], sizes = [1, 64], strides = [1, 1]} : vector<7x64xf32> to vector<1x64xf32>
    %18 = vector.broadcast %16 : vector<128x1xf32> to vector<128x64xf32>
    %19 = vector.broadcast %17 : vector<1x64xf32> to vector<128x64xf32>
    %20 = arith.mulf %18, %19 : vector<128x64xf32>
    %21 = arith.addf %15, %20 : vector<128x64xf32>
    %22 = vector.extract_strided_slice %3 {offsets = [3, 0], sizes = [128, 1], strides = [1, 1]} : vector<134x1xf32> to vector<128x1xf32>
    %23 = vector.extract_strided_slice %4 {offsets = [3, 0], sizes = [1, 64], strides = [1, 1]} : vector<7x64xf32> to vector<1x64xf32>
    %24 = vector.broadcast %22 : vector<128x1xf32> to vector<128x64xf32>
    %25 = vector.broadcast %23 : vector<1x64xf32> to vector<128x64xf32>
    %26 = arith.mulf %24, %25 : vector<128x64xf32>
    %27 = arith.addf %21, %26 : vector<128x64xf32>
    %28 = vector.extract_strided_slice %3 {offsets = [4, 0], sizes = [128, 1], strides = [1, 1]} : vector<134x1xf32> to vector<128x1xf32>
    %29 = vector.extract_strided_slice %4 {offsets = [4, 0], sizes = [1, 64], strides = [1, 1]} : vector<7x64xf32> to vector<1x64xf32>
    %30 = vector.broadcast %28 : vector<128x1xf32> to vector<128x64xf32>
    %31 = vector.broadcast %29 : vector<1x64xf32> to vector<128x64xf32>
    %32 = arith.mulf %30, %31 : vector<128x64xf32>
    %33 = arith.addf %27, %32 : vector<128x64xf32>
    %34 = vector.extract_strided_slice %3 {offsets = [5, 0], sizes = [128, 1], strides = [1, 1]} : vector<134x1xf32> to vector<128x1xf32>
    %35 = vector.extract_strided_slice %4 {offsets = [5, 0], sizes = [1, 64], strides = [1, 1]} : vector<7x64xf32> to vector<1x64xf32>
    %36 = vector.broadcast %34 : vector<128x1xf32> to vector<128x64xf32>
    %37 = vector.broadcast %35 : vector<1x64xf32> to vector<128x64xf32>
    %38 = arith.mulf %36, %37 : vector<128x64xf32>
    %39 = arith.addf %33, %38 : vector<128x64xf32>
    %40 = vector.extract_strided_slice %3 {offsets = [6, 0], sizes = [128, 1], strides = [1, 1]} : vector<134x1xf32> to vector<128x1xf32>
    %41 = vector.extract_strided_slice %4 {offsets = [6, 0], sizes = [1, 64], strides = [1, 1]} : vector<7x64xf32> to vector<1x64xf32>
    %42 = vector.broadcast %40 : vector<128x1xf32> to vector<128x64xf32>
    %43 = vector.broadcast %41 : vector<1x64xf32> to vector<128x64xf32>
    %44 = arith.mulf %42, %43 : vector<128x64xf32>
    %45 = arith.addf %39, %44 : vector<128x64xf32>
    %c0_4 = arith.constant 0 : index
    %c0_5 = arith.constant 0 : index
    %46 = vector.load %arg3[%c0_4, %c0_5] : memref<1x64xf32, #tpu.memory_space<vmem>>, vector<1x64xf32>
    %47 = vector.broadcast %46 : vector<1x64xf32> to vector<128x64xf32>
    %48 = arith.addf %45, %47 : vector<128x64xf32>
    %cst_6 = arith.constant 0.000000e+00 : f32
    %49 = vector.broadcast %cst_6 : f32 to vector<128x64xf32>
    %50 = arith.maximumf %48, %49 : vector<128x64xf32>
    %c0_7 = arith.constant 0 : index
    %c0_8 = arith.constant 0 : index
    %51 = vector.load %arg4[%c0_7, %c0_8] : memref<1x64xf32, #tpu.memory_space<vmem>>, vector<1x64xf32>
    %52 = vector.broadcast %51 : vector<1x64xf32> to vector<128x64xf32>
    %53 = arith.mulf %50, %52 : vector<128x64xf32>
    %c0_9 = arith.constant 0 : index
    %c0_10 = arith.constant 0 : index
    %54 = vector.load %arg5[%c0_9, %c0_10] : memref<1x64xf32, #tpu.memory_space<vmem>>, vector<1x64xf32>
    %55 = vector.broadcast %54 : vector<1x64xf32> to vector<128x64xf32>
    %56 = arith.addf %53, %55 : vector<128x64xf32>
    %57 = vector.shape_cast %56 : vector<128x64xf32> to vector<64x2x64xf32>
    %cst_11 = arith.constant dense<0xFF800000> : vector<64x64xf32>
    %58 = vector.multi_reduction <maximumf>, %57, %cst_11 [1] : vector<64x2x64xf32> to vector<64x64xf32>
    %cst_12 = arith.constant 0.000000e+00 : f32
    %59 = vector.broadcast %cst_12 : f32 to vector<3x64xf32>
    %60 = tpu.concatenate %59, %58, %59 in 0 : vector<3x64xf32>, vector<64x64xf32>, vector<3x64xf32> -> vector<70x64xf32>
    %61 = vector.extract_strided_slice %60 {offsets = [0, 0], sizes = [64, 64], strides = [1, 1]} : vector<70x64xf32> to vector<64x64xf32>
    %62 = vector.extract_strided_slice %60 {offsets = [1, 0], sizes = [64, 64], strides = [1, 1]} : vector<70x64xf32> to vector<64x64xf32>
    %63 = vector.extract_strided_slice %60 {offsets = [2, 0], sizes = [64, 64], strides = [1, 1]} : vector<70x64xf32> to vector<64x64xf32>
    %64 = vector.extract_strided_slice %60 {offsets = [3, 0], sizes = [64, 64], strides = [1, 1]} : vector<70x64xf32> to vector<64x64xf32>
    %65 = vector.extract_strided_slice %60 {offsets = [4, 0], sizes = [64, 64], strides = [1, 1]} : vector<70x64xf32> to vector<64x64xf32>
    %66 = vector.extract_strided_slice %60 {offsets = [5, 0], sizes = [64, 64], strides = [1, 1]} : vector<70x64xf32> to vector<64x64xf32>
    %67 = vector.extract_strided_slice %60 {offsets = [6, 0], sizes = [64, 64], strides = [1, 1]} : vector<70x64xf32> to vector<64x64xf32>
    %68 = tpu.concatenate %61, %62, %63, %64, %65, %66, %67 in 1 : vector<64x64xf32>, vector<64x64xf32>, vector<64x64xf32>, vector<64x64xf32>, vector<64x64xf32>, vector<64x64xf32>, vector<64x64xf32> -> vector<64x448xf32>
    %69 = arith.truncf %68 : vector<64x448xf32> to vector<64x448xbf16>
    %c0_13 = arith.constant 0 : index
    %c0_14 = arith.constant 0 : index
    %70 = vector.load %arg6[%c0_13, %c0_14] : memref<448x128xbf16, #tpu.memory_space<vmem>>, vector<448x128xbf16>
    %cst_15 = arith.constant dense<0.000000e+00> : vector<64x128xf32>
    %71 = tpu.matmul %69, %70, %cst_15 {dimension_numbers = #tpu.dot_dimension_numbers<[1], [0], [0], [1], [0, 0, 1, 1], [], []>} : vector<64x448xbf16>, vector<448x128xbf16>, vector<64x128xf32> -> vector<64x128xf32>
    %c0_16 = arith.constant 0 : index
    %c0_17 = arith.constant 0 : index
    %72 = vector.load %arg7[%c0_16, %c0_17] : memref<1x128xf32, #tpu.memory_space<vmem>>, vector<1x128xf32>
    %73 = vector.broadcast %72 : vector<1x128xf32> to vector<64x128xf32>
    %74 = arith.addf %71, %73 : vector<64x128xf32>
    %cst_18 = arith.constant 0.000000e+00 : f32
    %75 = vector.broadcast %cst_18 : f32 to vector<64x128xf32>
    %76 = arith.maximumf %74, %75 : vector<64x128xf32>
    %c0_19 = arith.constant 0 : index
    %c0_20 = arith.constant 0 : index
    %77 = vector.load %arg8[%c0_19, %c0_20] : memref<1x128xf32, #tpu.memory_space<vmem>>, vector<1x128xf32>
    %78 = vector.broadcast %77 : vector<1x128xf32> to vector<64x128xf32>
    %79 = arith.mulf %76, %78 : vector<64x128xf32>
    %c0_21 = arith.constant 0 : index
    %c0_22 = arith.constant 0 : index
    %80 = vector.load %arg9[%c0_21, %c0_22] : memref<1x128xf32, #tpu.memory_space<vmem>>, vector<1x128xf32>
    %81 = vector.broadcast %80 : vector<1x128xf32> to vector<64x128xf32>
    %82 = arith.addf %79, %81 : vector<64x128xf32>
    %83 = vector.shape_cast %82 : vector<64x128xf32> to vector<32x2x128xf32>
    %cst_23 = arith.constant dense<0xFF800000> : vector<32x128xf32>
    %84 = vector.multi_reduction <maximumf>, %83, %cst_23 [1] : vector<32x2x128xf32> to vector<32x128xf32>
    %cst_24 = arith.constant 0.000000e+00 : f32
    %85 = vector.broadcast %cst_24 : f32 to vector<3x128xf32>
    %86 = tpu.concatenate %85, %84, %85 in 0 : vector<3x128xf32>, vector<32x128xf32>, vector<3x128xf32> -> vector<38x128xf32>
    %87 = vector.extract_strided_slice %86 {offsets = [0, 0], sizes = [32, 128], strides = [1, 1]} : vector<38x128xf32> to vector<32x128xf32>
    %88 = vector.extract_strided_slice %86 {offsets = [1, 0], sizes = [32, 128], strides = [1, 1]} : vector<38x128xf32> to vector<32x128xf32>
    %89 = vector.extract_strided_slice %86 {offsets = [2, 0], sizes = [32, 128], strides = [1, 1]} : vector<38x128xf32> to vector<32x128xf32>
    %90 = vector.extract_strided_slice %86 {offsets = [3, 0], sizes = [32, 128], strides = [1, 1]} : vector<38x128xf32> to vector<32x128xf32>
    %91 = vector.extract_strided_slice %86 {offsets = [4, 0], sizes = [32, 128], strides = [1, 1]} : vector<38x128xf32> to vector<32x128xf32>
    %92 = vector.extract_strided_slice %86 {offsets = [5, 0], sizes = [32, 128], strides = [1, 1]} : vector<38x128xf32> to vector<32x128xf32>
    %93 = vector.extract_strided_slice %86 {offsets = [6, 0], sizes = [32, 128], strides = [1, 1]} : vector<38x128xf32> to vector<32x128xf32>
    %94 = tpu.concatenate %87, %88, %89, %90, %91, %92, %93 in 1 : vector<32x128xf32>, vector<32x128xf32>, vector<32x128xf32>, vector<32x128xf32>, vector<32x128xf32>, vector<32x128xf32>, vector<32x128xf32> -> vector<32x896xf32>
    %95 = arith.truncf %94 : vector<32x896xf32> to vector<32x896xbf16>
    %c0_25 = arith.constant 0 : index
    %c0_26 = arith.constant 0 : index
    %96 = vector.load %arg10[%c0_25, %c0_26] : memref<896x64xbf16, #tpu.memory_space<vmem>>, vector<896x64xbf16>
    %cst_27 = arith.constant dense<0.000000e+00> : vector<32x64xf32>
    %97 = tpu.matmul %95, %96, %cst_27 {dimension_numbers = #tpu.dot_dimension_numbers<[1], [0], [0], [1], [0, 0, 1, 1], [], []>} : vector<32x896xbf16>, vector<896x64xbf16>, vector<32x64xf32> -> vector<32x64xf32>
    %c0_28 = arith.constant 0 : index
    %c0_29 = arith.constant 0 : index
    %98 = vector.load %arg11[%c0_28, %c0_29] : memref<1x64xf32, #tpu.memory_space<vmem>>, vector<1x64xf32>
    %99 = vector.broadcast %98 : vector<1x64xf32> to vector<32x64xf32>
    %100 = arith.addf %97, %99 : vector<32x64xf32>
    %cst_30 = arith.constant 0.000000e+00 : f32
    %101 = vector.broadcast %cst_30 : f32 to vector<32x64xf32>
    %102 = arith.maximumf %100, %101 : vector<32x64xf32>
    %c0_31 = arith.constant 0 : index
    %c0_32 = arith.constant 0 : index
    %103 = vector.load %arg12[%c0_31, %c0_32] : memref<1x64xf32, #tpu.memory_space<vmem>>, vector<1x64xf32>
    %104 = vector.broadcast %103 : vector<1x64xf32> to vector<32x64xf32>
    %105 = arith.mulf %102, %104 : vector<32x64xf32>
    %c0_33 = arith.constant 0 : index
    %c0_34 = arith.constant 0 : index
    %106 = vector.load %arg13[%c0_33, %c0_34] : memref<1x64xf32, #tpu.memory_space<vmem>>, vector<1x64xf32>
    %107 = vector.broadcast %106 : vector<1x64xf32> to vector<32x64xf32>
    %108 = arith.addf %105, %107 : vector<32x64xf32>
    %109 = vector.shape_cast %108 : vector<32x64xf32> to vector<16x2x64xf32>
    %cst_35 = arith.constant dense<0xFF800000> : vector<16x64xf32>
    %110 = vector.multi_reduction <maximumf>, %109, %cst_35 [1] : vector<16x2x64xf32> to vector<16x64xf32>
    %cst_36 = arith.constant 0.000000e+00 : f32
    %111 = vector.broadcast %cst_36 : f32 to vector<3x64xf32>
    %112 = tpu.concatenate %111, %110, %111 in 0 : vector<3x64xf32>, vector<16x64xf32>, vector<3x64xf32> -> vector<22x64xf32>
    %113 = vector.extract_strided_slice %112 {offsets = [0, 0], sizes = [16, 64], strides = [1, 1]} : vector<22x64xf32> to vector<16x64xf32>
    %114 = vector.extract_strided_slice %112 {offsets = [1, 0], sizes = [16, 64], strides = [1, 1]} : vector<22x64xf32> to vector<16x64xf32>
    %115 = vector.extract_strided_slice %112 {offsets = [2, 0], sizes = [16, 64], strides = [1, 1]} : vector<22x64xf32> to vector<16x64xf32>
    %116 = vector.extract_strided_slice %112 {offsets = [3, 0], sizes = [16, 64], strides = [1, 1]} : vector<22x64xf32> to vector<16x64xf32>
    %117 = vector.extract_strided_slice %112 {offsets = [4, 0], sizes = [16, 64], strides = [1, 1]} : vector<22x64xf32> to vector<16x64xf32>
    %118 = vector.extract_strided_slice %112 {offsets = [5, 0], sizes = [16, 64], strides = [1, 1]} : vector<22x64xf32> to vector<16x64xf32>
    %119 = vector.extract_strided_slice %112 {offsets = [6, 0], sizes = [16, 64], strides = [1, 1]} : vector<22x64xf32> to vector<16x64xf32>
    %120 = tpu.concatenate %113, %114, %115, %116, %117, %118, %119 in 1 : vector<16x64xf32>, vector<16x64xf32>, vector<16x64xf32>, vector<16x64xf32>, vector<16x64xf32>, vector<16x64xf32>, vector<16x64xf32> -> vector<16x448xf32>
    %121 = arith.truncf %120 : vector<16x448xf32> to vector<16x448xbf16>
    %c0_37 = arith.constant 0 : index
    %c0_38 = arith.constant 0 : index
    %122 = vector.load %arg14[%c0_37, %c0_38] : memref<448x32xbf16, #tpu.memory_space<vmem>>, vector<448x32xbf16>
    %cst_39 = arith.constant dense<0.000000e+00> : vector<16x32xf32>
    %123 = tpu.matmul %121, %122, %cst_39 {dimension_numbers = #tpu.dot_dimension_numbers<[1], [0], [0], [1], [0, 0, 1, 1], [], []>} : vector<16x448xbf16>, vector<448x32xbf16>, vector<16x32xf32> -> vector<16x32xf32>
    %c0_40 = arith.constant 0 : index
    %c0_41 = arith.constant 0 : index
    %124 = vector.load %arg15[%c0_40, %c0_41] : memref<1x32xf32, #tpu.memory_space<vmem>>, vector<1x32xf32>
    %125 = vector.broadcast %124 : vector<1x32xf32> to vector<16x32xf32>
    %126 = arith.addf %123, %125 : vector<16x32xf32>
    %cst_42 = arith.constant 0.000000e+00 : f32
    %127 = vector.broadcast %cst_42 : f32 to vector<16x32xf32>
    %128 = arith.maximumf %126, %127 : vector<16x32xf32>
    %129 = vector.shape_cast %128 : vector<16x32xf32> to vector<8x2x32xf32>
    %cst_43 = arith.constant dense<0xFF800000> : vector<8x32xf32>
    %130 = vector.multi_reduction <maximumf>, %129, %cst_43 [1] : vector<8x2x32xf32> to vector<8x32xf32>
    %cst_44 = arith.constant 0.000000e+00 : f32
    %131 = vector.broadcast %cst_44 : f32 to vector<3x32xf32>
    %132 = tpu.concatenate %131, %130, %131 in 0 : vector<3x32xf32>, vector<8x32xf32>, vector<3x32xf32> -> vector<14x32xf32>
    %133 = vector.extract_strided_slice %132 {offsets = [0, 0], sizes = [8, 32], strides = [1, 1]} : vector<14x32xf32> to vector<8x32xf32>
    %134 = vector.extract_strided_slice %132 {offsets = [1, 0], sizes = [8, 32], strides = [1, 1]} : vector<14x32xf32> to vector<8x32xf32>
    %135 = vector.extract_strided_slice %132 {offsets = [2, 0], sizes = [8, 32], strides = [1, 1]} : vector<14x32xf32> to vector<8x32xf32>
    %136 = vector.extract_strided_slice %132 {offsets = [3, 0], sizes = [8, 32], strides = [1, 1]} : vector<14x32xf32> to vector<8x32xf32>
    %137 = vector.extract_strided_slice %132 {offsets = [4, 0], sizes = [8, 32], strides = [1, 1]} : vector<14x32xf32> to vector<8x32xf32>
    %138 = vector.extract_strided_slice %132 {offsets = [5, 0], sizes = [8, 32], strides = [1, 1]} : vector<14x32xf32> to vector<8x32xf32>
    %139 = vector.extract_strided_slice %132 {offsets = [6, 0], sizes = [8, 32], strides = [1, 1]} : vector<14x32xf32> to vector<8x32xf32>
    %140 = tpu.concatenate %133, %134, %135, %136, %137, %138, %139 in 1 : vector<8x32xf32>, vector<8x32xf32>, vector<8x32xf32>, vector<8x32xf32>, vector<8x32xf32>, vector<8x32xf32>, vector<8x32xf32> -> vector<8x224xf32>
    %141 = arith.truncf %140 : vector<8x224xf32> to vector<8x224xbf16>
    %c0_45 = arith.constant 0 : index
    %c0_46 = arith.constant 0 : index
    %142 = vector.load %arg16[%c0_45, %c0_46] : memref<224x16xbf16, #tpu.memory_space<vmem>>, vector<224x16xbf16>
    %cst_47 = arith.constant dense<0.000000e+00> : vector<8x16xf32>
    %143 = tpu.matmul %141, %142, %cst_47 {dimension_numbers = #tpu.dot_dimension_numbers<[1], [0], [0], [1], [0, 0, 1, 1], [], []>} : vector<8x224xbf16>, vector<224x16xbf16>, vector<8x16xf32> -> vector<8x16xf32>
    %c0_48 = arith.constant 0 : index
    %c0_49 = arith.constant 0 : index
    %144 = vector.load %arg17[%c0_48, %c0_49] : memref<1x16xf32, #tpu.memory_space<vmem>>, vector<1x16xf32>
    %145 = vector.broadcast %144 : vector<1x16xf32> to vector<8x16xf32>
    %146 = arith.addf %143, %145 : vector<8x16xf32>
    %cst_50 = arith.constant 0.000000e+00 : f32
    %147 = vector.broadcast %cst_50 : f32 to vector<8x16xf32>
    %148 = arith.maximumf %146, %147 : vector<8x16xf32>
    %149 = vector.shape_cast %148 : vector<8x16xf32> to vector<4x2x16xf32>
    %cst_51 = arith.constant dense<0xFF800000> : vector<4x16xf32>
    %150 = vector.multi_reduction <maximumf>, %149, %cst_51 [1] : vector<4x2x16xf32> to vector<4x16xf32>
    %151 = vector.extract_strided_slice %150 {offsets = [0, 0], sizes = [1, 16], strides = [1, 1]} : vector<4x16xf32> to vector<1x16xf32>
    %c0_52 = arith.constant 0 : index
    %c0_53 = arith.constant 0 : index
    %c0_54 = arith.constant 0 : index
    %152 = vector.load %arg18[%c0_52, %c0_53, %c0_54] : memref<4x16x5xf32, #tpu.memory_space<vmem>>, vector<1x16x5xf32>
    %153 = vector.shape_cast %152 : vector<1x16x5xf32> to vector<16x5xf32>
    %cst_55 = arith.constant dense<0.000000e+00> : vector<1x5xf32>
    %154 = tpu.matmul %151, %153, %cst_55 {dimension_numbers = #tpu.dot_dimension_numbers<[1], [0], [0], [1], [0, 0, 1, 1], [], []>} : vector<1x16xf32>, vector<16x5xf32>, vector<1x5xf32> -> vector<1x5xf32>
    %155 = vector.extract_strided_slice %150 {offsets = [1, 0], sizes = [1, 16], strides = [1, 1]} : vector<4x16xf32> to vector<1x16xf32>
    %c1 = arith.constant 1 : index
    %c0_56 = arith.constant 0 : index
    %c0_57 = arith.constant 0 : index
    %156 = vector.load %arg18[%c1, %c0_56, %c0_57] : memref<4x16x5xf32, #tpu.memory_space<vmem>>, vector<1x16x5xf32>
    %157 = vector.shape_cast %156 : vector<1x16x5xf32> to vector<16x5xf32>
    %cst_58 = arith.constant dense<0.000000e+00> : vector<1x5xf32>
    %158 = tpu.matmul %155, %157, %cst_58 {dimension_numbers = #tpu.dot_dimension_numbers<[1], [0], [0], [1], [0, 0, 1, 1], [], []>} : vector<1x16xf32>, vector<16x5xf32>, vector<1x5xf32> -> vector<1x5xf32>
    %159 = arith.addf %154, %158 : vector<1x5xf32>
    %160 = vector.extract_strided_slice %150 {offsets = [2, 0], sizes = [1, 16], strides = [1, 1]} : vector<4x16xf32> to vector<1x16xf32>
    %c2 = arith.constant 2 : index
    %c0_59 = arith.constant 0 : index
    %c0_60 = arith.constant 0 : index
    %161 = vector.load %arg18[%c2, %c0_59, %c0_60] : memref<4x16x5xf32, #tpu.memory_space<vmem>>, vector<1x16x5xf32>
    %162 = vector.shape_cast %161 : vector<1x16x5xf32> to vector<16x5xf32>
    %cst_61 = arith.constant dense<0.000000e+00> : vector<1x5xf32>
    %163 = tpu.matmul %160, %162, %cst_61 {dimension_numbers = #tpu.dot_dimension_numbers<[1], [0], [0], [1], [0, 0, 1, 1], [], []>} : vector<1x16xf32>, vector<16x5xf32>, vector<1x5xf32> -> vector<1x5xf32>
    %164 = arith.addf %159, %163 : vector<1x5xf32>
    %165 = vector.extract_strided_slice %150 {offsets = [3, 0], sizes = [1, 16], strides = [1, 1]} : vector<4x16xf32> to vector<1x16xf32>
    %c3 = arith.constant 3 : index
    %c0_62 = arith.constant 0 : index
    %c0_63 = arith.constant 0 : index
    %166 = vector.load %arg18[%c3, %c0_62, %c0_63] : memref<4x16x5xf32, #tpu.memory_space<vmem>>, vector<1x16x5xf32>
    %167 = vector.shape_cast %166 : vector<1x16x5xf32> to vector<16x5xf32>
    %cst_64 = arith.constant dense<0.000000e+00> : vector<1x5xf32>
    %168 = tpu.matmul %165, %167, %cst_64 {dimension_numbers = #tpu.dot_dimension_numbers<[1], [0], [0], [1], [0, 0, 1, 1], [], []>} : vector<1x16xf32>, vector<16x5xf32>, vector<1x5xf32> -> vector<1x5xf32>
    %169 = arith.addf %164, %168 : vector<1x5xf32>
    %c0_65 = arith.constant 0 : index
    %c0_66 = arith.constant 0 : index
    %170 = vector.load %arg19[%c0_65, %c0_66] : memref<1x5xf32, #tpu.memory_space<vmem>>, vector<1x5xf32>
    %171 = arith.addf %169, %170 : vector<1x5xf32>
    %172 = vector.shape_cast %171 : vector<1x5xf32> to vector<1x1x5xf32>
    %c0_67 = arith.constant 0 : index
    %c0_68 = arith.constant 0 : index
    %c0_69 = arith.constant 0 : index
    %173 = vector.load %arg20[%c0_67, %c0_68, %c0_69] : memref<1x1x5xf32, #tpu.memory_space<vmem>>, vector<1x1x5xf32>
    tpu.vector_store %arg20[%c0_67, %c0_68, %c0_69], %172 {strides = array<i32>} : memref<1x1x5xf32, #tpu.memory_space<vmem>>, vector<1x1x5xf32>,
    return
  }
  func.func @transform_0(%arg0: i32) -> (i32, i32, i32) {
    %c0_i32 = arith.constant 0 : i32
    %c0_i32_0 = arith.constant 0 : i32
    %c0_i32_1 = arith.constant 0 : i32
    return %arg0, %c0_i32, %c0_i32_0 : i32, i32, i32
  }
  func.func @transform_1(%arg0: i32) -> (i32, i32) {
    %c0_i32 = arith.constant 0 : i32
    %c0_i32_0 = arith.constant 0 : i32
    %c0_i32_1 = arith.constant 0 : i32
    return %c0_i32, %c0_i32_0 : i32, i32
  }
  func.func @transform_2(%arg0: i32) -> (i32, i32) {
    %c0_i32 = arith.constant 0 : i32
    %c0_i32_0 = arith.constant 0 : i32
    %c0_i32_1 = arith.constant 0 : i32
    return %c0_i32, %c0_i32_0 : i32, i32
  }
  func.func @transform_3(%arg0: i32) -> (i32, i32) {
    %c0_i32 = arith.constant 0 : i32
    %c0_i32_0 = arith.constant 0 : i32
    %c0_i32_1 = arith.constant 0 : i32
    return %c0_i32, %c0_i32_0 : i32, i32
  }
  func.func @transform_4(%arg0: i32) -> (i32, i32) {
    %c0_i32 = arith.constant 0 : i32
    %c0_i32_0 = arith.constant 0 : i32
    %c0_i32_1 = arith.constant 0 : i32
    return %c0_i32, %c0_i32_0 : i32, i32
  }
  func.func @transform_5(%arg0: i32) -> (i32, i32) {
    %c0_i32 = arith.constant 0 : i32
    %c0_i32_0 = arith.constant 0 : i32
    %c0_i32_1 = arith.constant 0 : i32
    return %c0_i32, %c0_i32_0 : i32, i32
  }
  func.func @transform_6(%arg0: i32) -> (i32, i32) {
    %c0_i32 = arith.constant 0 : i32
    %c0_i32_0 = arith.constant 0 : i32
    %c0_i32_1 = arith.constant 0 : i32
    return %c0_i32, %c0_i32_0 : i32, i32
  }
  func.func @transform_7(%arg0: i32) -> (i32, i32) {
    %c0_i32 = arith.constant 0 : i32
    %c0_i32_0 = arith.constant 0 : i32
    %c0_i32_1 = arith.constant 0 : i32
    return %c0_i32, %c0_i32_0 : i32, i32
  }
  func.func @transform_8(%arg0: i32) -> (i32, i32) {
    %c0_i32 = arith.constant 0 : i32
    %c0_i32_0 = arith.constant 0 : i32
    %c0_i32_1 = arith.constant 0 : i32
    return %c0_i32, %c0_i32_0 : i32, i32
  }
  func.func @transform_9(%arg0: i32) -> (i32, i32) {
    %c0_i32 = arith.constant 0 : i32
    %c0_i32_0 = arith.constant 0 : i32
    %c0_i32_1 = arith.constant 0 : i32
    return %c0_i32, %c0_i32_0 : i32, i32
  }
  func.func @transform_10(%arg0: i32) -> (i32, i32) {
    %c0_i32 = arith.constant 0 : i32
    %c0_i32_0 = arith.constant 0 : i32
    %c0_i32_1 = arith.constant 0 : i32
    return %c0_i32, %c0_i32_0 : i32, i32
  }
  func.func @transform_11(%arg0: i32) -> (i32, i32) {
    %c0_i32 = arith.constant 0 : i32
    %c0_i32_0 = arith.constant 0 : i32
    %c0_i32_1 = arith.constant 0 : i32
    return %c0_i32, %c0_i32_0 : i32, i32
  }
  func.func @transform_12(%arg0: i32) -> (i32, i32) {
    %c0_i32 = arith.constant 0 : i32
    %c0_i32_0 = arith.constant 0 : i32
    %c0_i32_1 = arith.constant 0 : i32
    return %c0_i32, %c0_i32_0 : i32, i32
  }
  func.func @transform_13(%arg0: i32) -> (i32, i32) {
    %c0_i32 = arith.constant 0 : i32
    %c0_i32_0 = arith.constant 0 : i32
    %c0_i32_1 = arith.constant 0 : i32
    return %c0_i32, %c0_i32_0 : i32, i32
  }
  func.func @transform_14(%arg0: i32) -> (i32, i32) {
    %c0_i32 = arith.constant 0 : i32
    %c0_i32_0 = arith.constant 0 : i32
    %c0_i32_1 = arith.constant 0 : i32
    return %c0_i32, %c0_i32_0 : i32, i32
  }
  func.func @transform_15(%arg0: i32) -> (i32, i32) {
    %c0_i32 = arith.constant 0 : i32
    %c0_i32_0 = arith.constant 0 : i32
    %c0_i32_1 = arith.constant 0 : i32
    return %c0_i32, %c0_i32_0 : i32, i32
  }
  func.func @transform_16(%arg0: i32) -> (i32, i32) {
    %c0_i32 = arith.constant 0 : i32
    %c0_i32_0 = arith.constant 0 : i32
    %c0_i32_1 = arith.constant 0 : i32
    return %c0_i32, %c0_i32_0 : i32, i32
  }
  func.func @transform_17(%arg0: i32) -> (i32, i32, i32) {
    %c0_i32 = arith.constant 0 : i32
    %c0_i32_0 = arith.constant 0 : i32
    %c0_i32_1 = arith.constant 0 : i32
    %c0_i32_2 = arith.constant 0 : i32
    return %c0_i32, %c0_i32_0, %c0_i32_1 : i32, i32, i32
  }
  func.func @transform_18(%arg0: i32) -> (i32, i32) {
    %c0_i32 = arith.constant 0 : i32
    %c0_i32_0 = arith.constant 0 : i32
    %c0_i32_1 = arith.constant 0 : i32
    return %c0_i32, %c0_i32_0 : i32, i32
  }
  func.func @transform_19(%arg0: i32) -> (i32, i32, i32) {
    %c0_i32 = arith.constant 0 : i32
    %c0_i32_0 = arith.constant 0 : i32
    %c0_i32_1 = arith.constant 0 : i32
    return %arg0, %c0_i32, %c0_i32_0 : i32, i32, i32
  }
}

</mosaic_0001>

<bundles_post_ra>
// kernel: cnn_forward.1
= control target key start
LH: loop header
LB: loop body
LE: loop exit
PB: predicated region body
PF: predicated region fallthrough
CT: control target
= control target key end

     0   :  { %s8178_s0 = inlined_call_operand.vmem [shape: f32[2,128,1], index: 0, kind: input, shape index: {}]   ;;  %s8179_s1 = inlined_call_operand.vmem [shape: f32[7,64], index: 1, kind: input, shape index: {}]   ;;  %s8180_s2 = inlined_call_operand.vmem [shape: f32[1,64], index: 2, kind: input, shape index: {}]   ;;  %s8181_s3 = inlined_call_operand.vmem [shape: f32[1,64], index: 3, kind: input, shape index: {}]   ;;  %s8182_s4 = inlined_call_operand.vmem [shape: f32[1,64], index: 4, kind: input, shape index: {}]   ;;  %s8183_s5 = inlined_call_operand.vmem [shape: bf16[448,128], index: 5, kind: input, shape index: {}]   ;;  %s8184_s6 = inlined_call_operand.vmem [shape: f32[1,128], index: 6, kind: input, shape index: {}]   ;;  %s8185_s7 = inlined_call_operand.vmem [shape: f32[1,128], index: 7, kind: input, shape index: {}]   ;;  %s8186_s8 = inlined_call_operand.vmem [shape: f32[1,128], index: 8, kind: input, shape index: {}]   ;;  %s8187_s9 = inlined_call_operand.vmem [shape: bf16[896,64], index: 9, kind: input, shape index: {}]   ;;  %s8188_s10 = inlined_call_operand.vmem [shape: f32[1,64], index: 10, kind: input, shape index: {}]   ;;  %s8189_s11 = inlined_call_operand.vmem [shape: f32[1,64], index: 11, kind: input, shape index: {}]   ;;  %s8190_s12 = inlined_call_operand.vmem [shape: f32[1,64], index: 12, kind: input, shape index: {}]   ;;  %s8191_s13 = inlined_call_operand.vmem [shape: bf16[448,32], index: 13, kind: input, shape index: {}]   ;;  %s8192_s14 = inlined_call_operand.vmem [shape: f32[1,32], index: 14, kind: input, shape index: {}]   ;;  %s8193_s15 = inlined_call_operand.vmem [shape: bf16[224,16], index: 15, kind: input, shape index: {}]   ;;  %s8194_s16 = inlined_call_operand.vmem [shape: f32[1,16], index: 16, kind: input, shape index: {}]   ;;  %s8195_s17 = inlined_call_operand.vmem [shape: f32[4,16,5], index: 17, kind: input, shape index: {}]   ;;  %s8196_s18 = inlined_call_operand.vmem [shape: f32[1,5], index: 18, kind: input, shape index: {}]   ;;  %s8197_s19 = inlined_call_operand.hbm [shape: f32[2,1,5], index: 19, kind: output, shape index: {}]  }
   0x1   :  { %8267 = sst [smem:[#allocation29_spill]] %s8178_s0 }
   0x2   :  { %8268 = sst [smem:[#allocation30_spill]] %s8179_s1 }
   0x3   :  { %8269 = sst [smem:[#allocation31_spill]] %s8180_s2 }
   0x4   :  { %8270 = sst [smem:[#allocation32_spill]] %s8181_s3 }
   0x5   :  { %8271 = sst [smem:[#allocation33_spill]] %s8182_s4 }
   0x6   :  { %8272 = sst [smem:[#allocation34_spill]] %s8183_s5 }
   0x7   :  { %8273 = sst [smem:[#allocation35_spill]] %s8184_s6 }
   0x8   :  { %24 = vsyncpa [#allocation3], 0 }
   0x9   :  { %26 = vsyncpa [#allocation3 + $0x1], 0  ;;  %s5807_s0 = smov 0   ;;  %s5809_s30 = smov 0  }
   0xa   :  { %s5811_s20 = smov 0   ;;  %s5813_s21 = smov 0  }
   0xb LB: > { %8274 = sst [smem:[#allocation5_spill]] %s5696_s20  ;;  %s5828_s1 = sadd.s32 4294967295, %s5700_s21   ;;  %s5700_s21 = sphi %s5813_s21, %s8485_s21   ;;  %s5696_s20 = sphi %s5811_s20, %s8482_s20   ;;  %s5692_s30 = sphi %s5809_s30, %s8484_s30   ;;  %s5688_s0 = sphi %s5807_s0, %s8483_s0  }
   0xc   : > { %s4833_s22 = sadd.s32 4294967294, %s5700_s21   ;;  %s5832_s2 = sadd.s32 1, %s5700_s21  }
   0xd   : > { %s443_s23 = sadd.s32 1, %s5696_s20  ;;  %s440_s24 = ssub.s32 %s5700_s21, %s5832_s2 }
   0xe   : > { %p453_p0 = scmp.ne.s32.totalorder %s5696_s20, %s5692_s30  ;;  %p441_p1 = scmp.eq.s32.totalorder %s440_s24, 0 }
   0xf   : > { %p454_p2 = scmp.eq.s32.totalorder %s5828_s1, 1  ;;  %p459_p3 = scmp.ne.s32.totalorder %s5692_s30, %s5688_s0 }
  0x10   : > { %p460_p4 = scmp.eq.s32.totalorder %s4833_s22, 1  ;;  %p4836_p7 = scmp.ge.s32.totalorder %s5700_s21, 1 }
  0x11   : > { %s5843_s25 = scalar_select %p441_p1, %s5696_s20, %s443_s23  }
  0x12   : > { %p5845_p5 = por %p454_p2, %p453_p0  ;;  %p5849_p6 = por %p460_p4, %p459_p3 }
  0x13   : > { %8275 = sst [smem:[#allocation6_spill]] %s5843_s25  ;;  %p540_p8 = scmp.lt.s32.totalorder %s5700_s21, 3 }
  0x15   : > { %p541_p9 = pnand %p4836_p7, %p540_p8 }
  0x17   : > { %544 = sbr.rel (%p541_p9) target bundleno = 1662 (0x67e), region = 96 }
  0x1c   : > { %p595_p10 = scmp.lt.s32.totalorder %s5828_s1, 1  ;;  %v5702_v0 = vmov 0   ;;  %s8278_s23 = sld [smem:[#allocation29_spill]]  ;;  %vm633_vm0 = vcmask 1042432   ;;  %vm8266_vm1 = vcmask 1046528   ;;  %vm8265_vm2 = vcmask 1045504  }
  0x1d   : > { %5538 = vset.pattern.permute.xlu2 %v5702_v0  ;;  %5537 = vset.pattern.permute.xlu1 %v5702_v0  ;;  %s8279_s29 = sld [smem:[#allocation30_spill]]  ;;  %vm994_vm3 = vcmask 1044480   ;;  %vm1095_vm4 = vcmask 1043456   ;;  %vm1296_vm5 = vcmask 1041408   ;;  %vm8264_vm6 = vcmask 517120   ;;  %s8258_s22 = smov 64   ;;  %vm7676_vm15 = vmneg %vm633_vm0 }
  0x1e   : > { %5536 = vset.pattern.permute.xlu0 %v5702_v0  ;;  %s596_s27 = scalar_select %p595_p10, %s5828_s1, 1  ;;  %vm2063_vm7 = vcmask 1044484   ;;  %vm2065_vm8 = vcmask 1045509   ;;  %vm2067_vm9 = vcmask 1046534   ;;  %vm2069_vm10 = vcmask 1047559  }
  0x1f   : > { %s8303_s4 = sld [smem:[#allocation33_spill]]  ;;  %vm2071_vm11 = vcmask 1041409   ;;  %vm2073_vm12 = vcmask 1042434   ;;  %vm2075_vm13 = vcmask 1043459   ;;  %vm8263_vm14 = vcmask 523264   ;;  %s4774_s25 = scalar_lea.hbm %s8197_s19, %s5828_s1 }
  0x20   : > { %s5365_s28 = sshll.u32 %s596_s27, 7  ;;  %s8383_s5 = sld [smem:[#allocation34_spill]] }
  0x21   : > { %s8453_s6 = sld [smem:[#allocation35_spill]] }
  0x22   : > { %s5860_s24 = scalar_lea.vmem %s8278_s23, %s5365_s28  ;;  %s5706_s28 = smov 32  }
  0x23   : > { %v603_v1 = vld [vmem:[%s5860_s24 + $0x10] sm:$0xff]  ;;  %v604_v2 = vld [vmem:[%s5860_s24 + $0x18] sm:$0xff]  ;;  %v601_v3 = vld [vmem:[%s5860_s24] sm:$0xff]  ;;  %s593_s23 = sand.u32 1, %s5692_s30  }
  0x24   : > { %v637_v4 = vrot.slane %v603_v1, 5  ;;  %v639_v5 = vrot.slane %v604_v2, 5  ;;  %v634_v6 = vrot.slane %v601_v3, 5  ;;  %v602_v7 = vld [vmem:[%s5860_s24 + $0x8] sm:$0xff]  ;;  %v605_v9 = vld [vmem:[%s5860_s24 + $0x20] sm:$0xff]  ;;  %v607_v19 = vld [vmem:[%s5860_s24 + $0x30] sm:$0xff] }
  0x25   : > { %v635_v8 = vrot.slane %v602_v7, 5  ;;  %v606_v10 = vld [vmem:[%s5860_s24 + $0x28] sm:$0xff]  ;;  %v641_v14 = vrot.slane %v605_v9, 5  ;;  %v608_v20 = vld [vmem:[%s5860_s24 + $0x38] sm:$0xff]  ;;  %v609_v21 = vld [vmem:[%s5860_s24 + $0x40] sm:$0xff]  ;;  %v645_v22 = vrot.slane %v607_v19, 5 }
  0x26   : > { %v640_v11 = vsel %vm633_vm0, %v637_v4, %v639_v5  ;;  %v667_v12 = vsel %vm633_vm0, 0.0, %v634_v6  ;;  %v643_v15 = vrot.slane %v606_v10, 5  ;;  %v647_v23 = vrot.slane %v608_v20, 5  ;;  %v610_v28 = vld [vmem:[%s5860_s24 + $0x48] sm:$0xff]  ;;  %v611_v29 = vld [vmem:[%s5860_s24 + $0x50] sm:$0xff]  ;;  %v612_v30 = vld [vmem:[%s5860_s24 + $0x58] sm:$0xff] }
  0x27   : > { %684 = vperm.xlu1 %5537, %v640_v11   ;;  %672 = vperm.xlu2 %5538, %v667_v12   ;;  %v636_v13 = vsel %vm633_vm0, %v634_v6, %v635_v8  ;;  %v642_v16 = vsel %vm633_vm0, %v639_v5, %v641_v14  ;;  %v638_v18 = vsel %vm633_vm0, %v635_v8, %v637_v4  ;;  %v649_v24 = vrot.slane %v609_v21, 5  ;;  %v613_v37 = vld [vmem:[%s5860_s24 + $0x60] sm:$0xff]  ;;  %v614_v38 = vld [vmem:[%s5860_s24 + $0x68] sm:$0xff]  ;;  %v615_v39 = vld [vmem:[%s5860_s24 + $0x70] sm:$0xff] }
  0x28   : > { %676 = vperm.xlu0 %5536, %v636_v13   ;;  %v644_v17 = vsel %vm633_vm0, %v641_v14, %v643_v15  ;;  %v648_v25 = vsel %vm633_vm0, %v645_v22, %v647_v23  ;;  %v646_v27 = vsel %vm633_vm0, %v643_v15, %v645_v22  ;;  %v651_v31 = vrot.slane %v610_v28, 5  ;;  %v616_v46 = vld [vmem:[%s5860_s24 + $0x78] sm:$0xff]  ;;  %v669_v51 = vld [vmem:[%s8279_s29] sm:$0x7f]  ;;  %s8294_s24 = sld [smem:[#allocation31_spill]] }
  0x29   : > { %v650_v26 = vsel %vm633_vm0, %v647_v23, %v649_v24  ;;  %v653_v32 = vrot.slane %v611_v29, 5  ;;  %v655_v33 = vrot.slane %v612_v30, 5  ;;  %v657_v40 = vrot.slane %v613_v37, 5  ;;  %s8300_s29 = sld [smem:[#allocation32_spill]] }
  0x2a   : > { %v652_v36 = vsel %vm633_vm0, %v649_v24, %v651_v31  ;;  %v659_v41 = vrot.slane %v614_v38, 5  ;;  %v661_v42 = vrot.slane %v615_v39, 5  ;;  %v663_v47 = vrot.slane %v616_v46, 5 }
  0x2b   : > { %v654_v34 = vsel %vm633_vm0, %v651_v31, %v653_v32  ;;  %v656_v35 = vsel %vm633_vm0, %v653_v32, %v655_v33  ;;  %v658_v45 = vsel %vm633_vm0, %v655_v33, %v657_v40  ;;  %v5898_v53 = vperm.slane %v669_v51, 1 }
  0x2c   : > { %v660_v43 = vsel %vm633_vm0, %v657_v40, %v659_v41  ;;  %v662_v44 = vsel %vm633_vm0, %v659_v41, %v661_v42  ;;  %v668_v48 = vsel %vm633_vm0, %v663_v47, 0.0  ;;  %v664_v49 = vsel %vm633_vm0, %v661_v42, %v663_v47 }
  0x2d   : > { %v5900_v54 = vperm.slane %v669_v51, 2  ;;  %v5902_v55 = vperm.slane %v669_v51, 3  ;;  %v5904_v56 = vperm.slane %v669_v51, 4  ;;  %v5906_v57 = vperm.slane %v669_v51, 5 }
  0x2e   : > { %v5908_v58 = vperm.slane %v669_v51, 6  ;;  %v5919_v62 = vperm.slane %v669_v51, 0 }
  0x2f   : > { %688 = vperm.xlu1 %5537, %v642_v16   ;;  %692 = vperm.xlu2 %5538, %v644_v17  }
  0x30   : > { %680 = vperm.xlu0 %5536, %v638_v18  }
  0x37   : > { %700 = vperm.xlu1 %5537, %v648_v25   ;;  %704 = vperm.xlu2 %5538, %v650_v26  }
  0x38   : > { %696 = vperm.xlu0 %5536, %v646_v27  }
  0x3f   : > { %712 = vperm.xlu1 %5537, %v654_v34   ;;  %716 = vperm.xlu2 %5538, %v656_v35  }
  0x40   : > { %708 = vperm.xlu0 %5536, %v652_v36  }
  0x47   : > { %724 = vperm.xlu1 %5537, %v660_v43   ;;  %728 = vperm.xlu2 %5538, %v662_v44  }
  0x48   : > { %720 = vperm.xlu0 %5536, %v658_v45  }
  0x4f   : > { %754 = vperm.xlu1 %5537, %v668_v48  }
  0x50   : > { %732 = vperm.xlu0 %5536, %v664_v49  }
  0x81   : > { %v673_v50 = vpop.permute.xlu2 %672 }
  0x82   : > { %v5911_v59 = vmul.f32 %v5898_v53, %v673_v50  ;;  %v5914_v60 = vmul.f32 %v5900_v54, %v673_v50  ;;  %v5917_v61 = vmul.f32 %v5902_v55, %v673_v50  ;;  %v5922_v63 = vmul.f32 %v5904_v56, %v673_v50 }
  0x83   : > { %v5925_v0 = vmul.f32 %v5919_v62, %v673_v50  ;;  %v5928_v1 = vmul.f32 %v5906_v57, %v673_v50  ;;  %v5934_v6 = vmul.f32 %v5908_v58, %v673_v50 }
  0x84   : > { %v793_v3 = vrot.slane %v5911_v59, 1  ;;  %v894_v4 = vrot.slane %v5914_v60, 2  ;;  %v995_v5 = vrot.slane %v5917_v61, 3  ;;  %v1096_v11 = vrot.slane %v5922_v63, 4 }
  0x89   : > { %v693_v52 = vpop.permute.xlu2 %692 }
  0x8a   : > { %v5937_v7 = vmul.f32 %v5898_v53, %v693_v52  ;;  %v5940_v8 = vmul.f32 %v5900_v54, %v693_v52  ;;  %v5943_v9 = vmul.f32 %v5902_v55, %v693_v52  ;;  %v5946_v10 = vmul.f32 %v5904_v56, %v693_v52 }
  0x8b   : > { %v5950_v12 = vmul.f32 %v5906_v57, %v693_v52  ;;  %v5953_v13 = vmul.f32 %v5908_v58, %v693_v52  ;;  %v5973_v21 = vmul.f32 %v5919_v62, %v693_v52 }
  0x91   : > { %v705_v2 = vpop.permute.xlu2 %704 }
  0x92   : > { %v5956_v14 = vmul.f32 %v5898_v53, %v705_v2  ;;  %v5959_v15 = vmul.f32 %v5900_v54, %v705_v2  ;;  %v5962_v16 = vmul.f32 %v5902_v55, %v705_v2  ;;  %v5965_v17 = vmul.f32 %v5904_v56, %v705_v2 }
  0x93   : > { %v5968_v18 = vmul.f32 %v5906_v57, %v705_v2  ;;  %v5976_v22 = vmul.f32 %v5908_v58, %v705_v2  ;;  %v5985_v29 = vmul.f32 %v5919_v62, %v705_v2 }
  0x95   : > { %8280 = vst [vmem:[#allocation7_spill] sm:$0xff] %v5985_v29 }
  0x99   : > { %v685_v35 = vpop.permute.xlu1 %684  ;;  %v717_v44 = vpop.permute.xlu2 %716 }
  0x9a   : > { %v5994_v37 = vmul.f32 %v5898_v53, %v685_v35  ;;  %v5997_v38 = vmul.f32 %v5900_v54, %v685_v35  ;;  %v6000_v39 = vmul.f32 %v5902_v55, %v685_v35  ;;  %v739_v40 = vmul.f32 %v5919_v62, %v685_v35  ;;  %v677_v49 = vpop.permute.xlu0 %676 }
  0x9b   : > { %v6004_v41 = vmul.f32 %v5904_v56, %v685_v35  ;;  %v6007_v42 = vmul.f32 %v5906_v57, %v685_v35  ;;  %v6010_v43 = vmul.f32 %v5908_v58, %v685_v35  ;;  %v6015_v47 = vmul.f32 %v5919_v62, %v717_v44 }
  0x9c   : > { %v6018_v48 = vmul.f32 %v5898_v53, %v717_v44  ;;  %v6024_v2 = vmul.f32 %v5900_v54, %v717_v44  ;;  %v6028_v36 = vmul.f32 %v5902_v55, %v717_v44  ;;  %v6031_v34 = vmul.f32 %v5904_v56, %v717_v44 }
  0x9d   : > { %8281 = vst [vmem:[#allocation8_spill] sm:$0xff] %v6015_v47  ;;  %v6034_v33 = vmul.f32 %v5906_v57, %v717_v44  ;;  %v6039_v30 = vmul.f32 %v5908_v58, %v717_v44  ;;  %v6042_v28 = vmul.f32 %v5898_v53, %v677_v49  ;;  %v6047_v52 = vmul.f32 %v5919_v62, %v677_v49 }
  0x9e   : > { %v6050_v26 = vmul.f32 %v5900_v54, %v677_v49  ;;  %v6055_v44 = vmul.f32 %v5902_v55, %v677_v49  ;;  %v6058_v51 = vmul.f32 %v5904_v56, %v677_v49  ;;  %v6063_v50 = vmul.f32 %v5906_v57, %v677_v49 }
  0x9f   : > { %8282 = vst [vmem:[#allocation9_spill] sm:$0xff] %v6034_v33  ;;  %v8200_v31 = vrot.slane %v6042_v28, 1  ;;  %v6066_v20 = vmul.f32 %v5908_v58, %v677_v49 }
  0xa0   : > { %8283 = vst [vmem:[#allocation10_spill] sm:$0xff] %v6039_v30  ;;  %v8202_v27 = vrot.slane %v6050_v26, 2  ;;  %v8201_v24 = vrot.slane %v6055_v44, 3  ;;  %v8203_v46 = vrot.slane %v6058_v51, 4  ;;  %v8204_v45 = vrot.slane %v6063_v50, 5 }
  0xa1   : > { %v689_v25 = vpop.permute.xlu1 %688  ;;  %v795_v32 = vsel %vm8266_vm1, %v793_v3, %v8200_v31 }
  0xa2   : > { %v762_v35 = vmul.f32 %v5898_v53, %v689_v25  ;;  %v842_v23 = vadd.f32 %v795_v32, %v5925_v0  ;;  %v896_v49 = vsel %vm8265_vm2, %v894_v4, %v8202_v27  ;;  %v740_v59 = vmul.f32 %v5919_v62, %v689_v25 }
  0xa3   : > { %v997_v3 = vsel %vm994_vm3, %v995_v5, %v8201_v24  ;;  %v863_v0 = vmul.f32 %v5900_v54, %v689_v25  ;;  %v1098_v60 = vsel %vm1095_vm4, %v1096_v11, %v8203_v46  ;;  %v8284_v4 = vrot.slane %v5928_v1, 5 }
  0xa4   : > { %v800_v19 = vrot.slane %v762_v35, 1  ;;  %v943_v32 = vadd.f32 %v896_v49, %v842_v23  ;;  %v964_v5 = vmul.f32 %v5902_v55, %v689_v25  ;;  %v8285_v24 = vrot.slane %v5994_v37, 1 }
  0xa5   : > { %v1198_v61 = vsel %vm633_vm0, %v8284_v4, %v8204_v45  ;;  %v8286_v23 = vrot.slane %v5937_v7, 1  ;;  %v901_v27 = vrot.slane %v863_v0, 2  ;;  %v1065_v63 = vmul.f32 %v5904_v56, %v689_v25 }
  0xa6   : > { %v801_v35 = vsel %vm8266_vm1, %v8285_v24, %v800_v19  ;;  %v1044_v11 = vadd.f32 %v997_v3, %v943_v32  ;;  %v1002_v47 = vrot.slane %v964_v5, 3  ;;  %v8287_v1 = vrot.slane %v5997_v38, 2  ;;  %v729_v32 = vpop.permute.xlu2 %728 }
  0xa7   : > { %v803_v49 = vsel %vm8266_vm1, %v800_v19, %v8286_v23  ;;  %v845_v46 = vadd.f32 %v801_v35, %v739_v40  ;;  %v8288_v45 = vrot.slane %v5940_v8, 2  ;;  %v1103_v24 = vrot.slane %v1065_v63, 4 }
  0xa8   : > { %v846_v31 = vadd.f32 %v803_v49, %v740_v59  ;;  %v902_v4 = vsel %vm8265_vm2, %v8287_v1, %v901_v27  ;;  %v1166_v30 = vmul.f32 %v5906_v57, %v689_v25  ;;  %v1145_v33 = vadd.f32 %v1098_v60, %v1044_v11 }
  0xa9   : > { %v904_v29 = vsel %vm8265_vm2, %v901_v27, %v8288_v45  ;;  %v8289_v19 = vrot.slane %v6066_v20, 6  ;;  %v8290_v0 = vrot.slane %v5934_v6, 6  ;;  %v946_v59 = vadd.f32 %v902_v4, %v845_v46  ;;  %v6133_v6 = vld [vmem:[%s8294_s24] ss:$0 sm:$0xff] }
  0xaa   : > { %v947_v3 = vadd.f32 %v904_v29, %v846_v31  ;;  %v8291_v5 = vrot.slane %v6000_v39, 3  ;;  %v8292_v23 = vrot.slane %v5943_v9, 3  ;;  %v8293_v45 = vrot.slane %v6004_v41, 4 }
  0xab   : > { %v1299_v40 = vsel %vm1296_vm5, %v8290_v0, %v8289_v19  ;;  %v1203_v49 = vrot.slane %v1166_v30, 5  ;;  %v1245_v29 = vadd.f32 %v1198_v61, %v1145_v33  ;;  %v1266_v63 = vmul.f32 %v5908_v58, %v689_v25 }
  0xac   : > { %v1003_v35 = vsel %vm994_vm3, %v8291_v5, %v1002_v47  ;;  %v1005_v27 = vsel %vm994_vm3, %v1002_v47, %v8292_v23  ;;  %v1104_v60 = vsel %vm1095_vm4, %v8293_v45, %v1103_v24  ;;  %v8295_v11 = vrot.slane %v5946_v10, 4  ;;  %v6163_v23 = vld [vmem:[%s8300_s29] ss:$0 sm:$0xff] }
  0xad   : > { %v1047_v31 = vadd.f32 %v1003_v35, %v946_v59  ;;  %v1048_v46 = vadd.f32 %v1005_v27, %v947_v3  ;;  %v8296_v1 = vrot.slane %v6007_v42, 5  ;;  %v8297_v30 = vrot.slane %v5950_v12, 5 }
  0xae   : > { %v1106_v47 = vsel %vm1095_vm4, %v1103_v24, %v8295_v11  ;;  %v6146_v0 = vmul.f32 %v5898_v53, %v729_v32  ;;  %v1346_v33 = vadd.f32 %v1299_v40, %v1245_v29  ;;  %v1304_v25 = vrot.slane %v1266_v63, 6 }
  0xaf   : > { %v1204_v4 = vsel %vm633_vm0, %v8296_v1, %v1203_v49  ;;  %v1206_v19 = vsel %vm633_vm0, %v1203_v49, %v8297_v30  ;;  %v1148_v61 = vadd.f32 %v1104_v60, %v1047_v31  ;;  %v1149_v59 = vadd.f32 %v1106_v47, %v1048_v46  ;;  %v6167_v49 = vpop.permute.xlu0 %680  ;;  %v6180_v1 = vld [vmem:[%s8303_s4] ss:$0 sm:$0xff] }
  0xb0   : > { %v6149_v3 = vmul.f32 %v5919_v62, %v729_v32  ;;  %v6152_v24 = vmul.f32 %v5900_v54, %v729_v32  ;;  %v6155_v5 = vmul.f32 %v5902_v55, %v729_v32  ;;  %v6158_v35 = vmul.f32 %v5904_v56, %v729_v32 }
  0xb1   : > { %v1366_v40 = vadd.f32 %v6133_v6, %v1346_v33  ;;  %v1248_v27 = vadd.f32 %v1204_v4, %v1148_v61  ;;  %v1249_v45 = vadd.f32 %v1206_v19, %v1149_v59  ;;  %v8301_v29 = vrot.slane %v6010_v43, 6 }
  0xb2   : > { %8298 = vst [vmem:[#allocation11_spill] sm:$0xff] %v6149_v3  ;;  %v8302_v46 = vrot.slane %v5953_v13, 6  ;;  %v6183_v33 = vmul.f32 %v5906_v57, %v729_v32  ;;  %v6187_v59 = vmul.f32 %v5908_v58, %v729_v32  ;;  %v8308_v3 = vrot.slane %v5994_v37, 1 }
  0xb3   : > { %8299 = vst [vmem:[#allocation12_spill] sm:$0xff] %v6158_v35  ;;  %v1305_v31 = vsel %vm1296_vm5, %v8301_v29, %v1304_v25  ;;  %v1382_v4 = vmax.f32 %v1366_v40, 0.0  ;;  %v861_v29 = vmul.f32 %v5900_v54, %v6167_v49  ;;  %v8309_v32 = vrot.slane %v6050_v26, 2 }
  0xb4   : > { %v1307_v63 = vsel %vm1296_vm5, %v1304_v25, %v8302_v46  ;;  %v1349_v30 = vadd.f32 %v1305_v31, %v1248_v27  ;;  %8304 = vst [vmem:[#allocation13_spill] sm:$0xff] %v6183_v33  ;;  %v760_v25 = vmul.f32 %v5898_v53, %v6167_v49 }
  0xb5   : > { %v1350_v19 = vadd.f32 %v1307_v63, %v1249_v45  ;;  %8305 = vst [vmem:[#allocation14_spill] sm:$0xff] %v6187_v59  ;;  %v1402_v46 = vmul.f32 %v6163_v23, %v1382_v4  ;;  %v738_v45 = vmul.f32 %v5919_v62, %v6167_v49  ;;  %v897_v61 = vrot.slane %v861_v29, 2 }
  0xb6   : > { %v1369_v40 = vadd.f32 %v6133_v6, %v1349_v30  ;;  %v796_v63 = vrot.slane %v760_v25, 1  ;;  %v962_v4 = vmul.f32 %v5902_v55, %v6167_v49  ;;  %v8307_v30 = vrot.slane %v6042_v28, 1 }
  0xb7   : > { %v1370_v27 = vadd.f32 %v6133_v6, %v1350_v19  ;;  %v6201_v47 = vadd.f32 %v6180_v1, %v1402_v46  ;;  %v898_v25 = vsel %vm8265_vm2, %v8309_v32, %v897_v61  ;;  %v1063_v29 = vmul.f32 %v5904_v56, %v6167_v49 }
  0xb8   : > { %v1385_v11 = vmax.f32 %v1369_v40, 0.0  ;;  %v797_v19 = vsel %vm8266_vm1, %v8307_v30, %v796_v63  ;;  %v799_v31 = vsel %vm8266_vm1, %v796_v63, %v8308_v3  ;;  %v998_v33 = vrot.slane %v962_v4, 3 }
  0xb9   : > { %8306 = vst [vmem:[#allocation15_spill] sm:$0xff] %v6201_v47  ;;  %v1386_v60 = vmax.f32 %v1370_v27, 0.0  ;;  %v1454_v46 = vrot.slane %v6201_v47, 2  ;;  %v1551_v28 = vsel %vm8264_vm6, %v6201_v47, -inf  ;;  %v8310_v27 = vrot.slane %v5997_v38, 2 }
  0xba   : > { %v1552_v30 = vrot.slane %v1551_v28, 4  ;;  %v1405_v3 = vmul.f32 %v6163_v23, %v1385_v11  ;;  %v843_v32 = vadd.f32 %v797_v19, %v6047_v52  ;;  %v844_v40 = vadd.f32 %v799_v31, %v738_v45 }
  0xbb   : > { %v900_v37 = vsel %vm8265_vm2, %v897_v61, %v8310_v27  ;;  %v1406_v26 = vmul.f32 %v6163_v23, %v1386_v60  ;;  %v6228_v59 = vsel %vm8264_vm6, %v1454_v46, -inf  ;;  %v1099_v11 = vrot.slane %v1063_v29, 4 }
  0xbc   : > { %8311 = vst [vmem:[#allocation16_spill] sm:$0xff] %v6228_v59  ;;  %v6230_v35 = vmax.f32 %v1551_v28, %v1552_v30  ;;  %v6233_v38 = vadd.f32 %v6180_v1, %v1405_v3  ;;  %v944_v27 = vadd.f32 %v898_v25, %v843_v32  ;;  %v945_v52 = vadd.f32 %v900_v37, %v844_v40 }
  0xbd   : > { %v6236_v61 = vadd.f32 %v6180_v1, %v1406_v26  ;;  %v8315_v19 = vrot.slane %v6055_v44, 3  ;;  %v8316_v28 = vrot.slane %v6000_v39, 3  ;;  %v8317_v39 = vrot.slane %v6058_v51, 4 }
  0xbe   : > { %8312 = vst [vmem:[#allocation17_spill] sm:$0xff] %v6230_v35  ;;  %v1463_v45 = vrot.slane %v6233_v38, 2  ;;  %v1464_v31 = vrot.slane %v6233_v38, 4  ;;  %v1465_v4 = vrot.slane %v6233_v38, 6  ;;  %v8319_v29 = vrot.slane %v6004_v41, 4 }
  0xbf   : > { %8313 = vst [vmem:[#allocation18_spill] sm:$0xff] %v6233_v38  ;;  %v999_v46 = vsel %vm994_vm3, %v8315_v19, %v998_v33  ;;  %v1001_v30 = vsel %vm994_vm3, %v998_v33, %v8316_v28  ;;  %v1663_v25 = vsel %vm8264_vm6, %v6236_v61, -inf  ;;  %v1100_v33 = vsel %vm1095_vm4, %v8317_v39, %v1099_v11 }
  0xc0   : > { %8314 = vst [vmem:[#allocation19_spill] sm:$0xff] %v6236_v61  ;;  %v1045_v40 = vadd.f32 %v999_v46, %v944_v27  ;;  %v1046_v37 = vadd.f32 %v1001_v30, %v945_v52  ;;  %v1642_v44 = vsel %vm8264_vm6, %v1463_v45, -inf  ;;  %v1649_v3 = vsel %vm8264_vm6, %v1464_v31, -inf  ;;  %v701_v45 = vpop.permute.xlu1 %700 }
  0xc1   : > { %v1656_v26 = vsel %vm8264_vm6, %v1465_v4, -inf  ;;  %v1664_v32 = vrot.slane %v1663_v25, 4  ;;  %v1643_v19 = vrot.slane %v1642_v44, 4  ;;  %v1650_v63 = vrot.slane %v1649_v3, 4 }
  0xc2   : > { %v1657_v60 = vrot.slane %v1656_v26, 4  ;;  %v1102_v27 = vsel %vm1095_vm4, %v1099_v11, %v8319_v29  ;;  %v1146_v52 = vadd.f32 %v1100_v33, %v1045_v40  ;;  %v1164_v46 = vmul.f32 %v5906_v57, %v6167_v49 }
  0xc3   : > { %v6257_v28 = vmax.f32 %v1663_v25, %v1664_v32  ;;  %v1644_v31 = vmax.f32 %v1642_v44, %v1643_v19  ;;  %v1651_v4 = vmax.f32 %v1649_v3, %v1650_v63  ;;  %v1147_v38 = vadd.f32 %v1102_v27, %v1046_v37 }
  0xc4   : > { %v6264_v30 = vmax.f32 %v1656_v26, %v1657_v60  ;;  %v1199_v25 = vrot.slane %v1164_v46, 5  ;;  %v1264_v41 = vmul.f32 %v5908_v58, %v6167_v49  ;;  %v743_v29 = vmul.f32 %v5919_v62, %v701_v45 }
  0xc5   : > { %8318 = vst [vmem:[#allocation20_spill] sm:$0xff] %v6257_v28  ;;  %v1645_v32 = vrot.slane %v1644_v31, 2  ;;  %v1652_v11 = vrot.slane %v1651_v4, 2  ;;  %v765_v40 = vmul.f32 %v5898_v53, %v701_v45  ;;  %v8321_v44 = vrot.slane %v6063_v50, 5 }
  0xc6   : > { %8320 = vst [vmem:[#allocation21_spill] sm:$0xff] %v6264_v30  ;;  %v8322_v60 = vrot.slane %v6007_v42, 5  ;;  %v1300_v3 = vrot.slane %v1264_v41, 6  ;;  %v6279_v26 = vmul.f32 %v5900_v54, %v701_v45  ;;  %v8324_v46 = vrot.slane %v6066_v20, 6 }
  0xc7   : > { %v1200_v63 = vsel %vm633_vm0, %v8321_v44, %v1199_v25  ;;  %v6281_v19 = vmax.f32 %v1644_v31, %v1645_v32  ;;  %v8325_v44 = vrot.slane %v6010_v43, 6  ;;  %v806_v51 = vrot.slane %v765_v40, 1 }
  0xc8   : > { %v1202_v37 = vsel %vm633_vm0, %v1199_v25, %v8322_v60  ;;  %v1246_v33 = vadd.f32 %v1200_v63, %v1146_v52  ;;  %v1301_v50 = vsel %vm1296_vm5, %v8324_v46, %v1300_v3  ;;  %v907_v25 = vrot.slane %v6279_v26, 2  ;;  %v6308_v63 = vpop.permute.xlu0 %696 }
  0xc9   : > { %8323 = vst [vmem:[#allocation22_spill] sm:$0xff] %v6281_v19  ;;  %v1247_v27 = vadd.f32 %v1202_v37, %v1147_v38  ;;  %v1303_v42 = vsel %vm1296_vm5, %v1300_v3, %v8325_v44  ;;  %v6292_v31 = vmul.f32 %v5902_v55, %v701_v45  ;;  %v6295_v32 = vmul.f32 %v5904_v56, %v701_v45 }
  0xca   : > { %v1347_v41 = vadd.f32 %v1301_v50, %v1246_v33  ;;  %v6297_v38 = vmax.f32 %v1651_v4, %v1652_v11  ;;  %v8327_v20 = vrot.slane %v5956_v14, 1  ;;  %v6303_v43 = vmul.f32 %v5906_v57, %v701_v45 }
  0xcb   : > { %v1348_v60 = vadd.f32 %v1303_v42, %v1247_v27  ;;  %v6306_v40 = vmul.f32 %v5908_v58, %v701_v45  ;;  %v8218_v4 = vrot.slane %v6292_v31, 3  ;;  %v8328_v11 = vrot.slane %v5959_v15, 2 }
  0xcc   : > { %8326 = vst [vmem:[#allocation23_spill] sm:$0xff] %v6297_v38  ;;  %v809_v52 = vsel %vm8266_vm1, %v806_v51, %v8327_v20  ;;  %v1367_v37 = vadd.f32 %v6133_v6, %v1347_v41  ;;  %v8216_v27 = vrot.slane %v6295_v32, 4  ;;  %v8217_v46 = vrot.slane %v6303_v43, 5 }
  0xcd   : > { %v1368_v3 = vadd.f32 %v6133_v6, %v1348_v60  ;;  %v849_v26 = vadd.f32 %v809_v52, %v743_v29  ;;  %v910_v33 = vsel %vm8265_vm2, %v907_v25, %v8328_v11  ;;  %v8219_v45 = vrot.slane %v6306_v40, 6 }
  0xce   : > { %v1383_v50 = vmax.f32 %v1367_v37, 0.0  ;;  %v742_v41 = vmul.f32 %v5919_v62, %v6308_v63  ;;  %v8329_v29 = vrot.slane %v5962_v16, 3  ;;  %v8330_v20 = vrot.slane %v5965_v17, 4 }
  0xcf   : > { %v1384_v44 = vmax.f32 %v1368_v3, 0.0  ;;  %v950_v42 = vadd.f32 %v910_v33, %v849_v26  ;;  %v8331_v11 = vrot.slane %v5968_v18, 5  ;;  %v764_v3 = vmul.f32 %v5898_v53, %v6308_v63 }
  0xd0   : > { %v1011_v60 = vsel %vm994_vm3, %v8218_v4, %v8329_v29  ;;  %v1112_v52 = vsel %vm1095_vm4, %v8216_v27, %v8330_v20  ;;  %v1403_v26 = vmul.f32 %v6163_v23, %v1383_v50  ;;  %v865_v39 = vmul.f32 %v5900_v54, %v6308_v63 }
  0xd1   : > { %v1212_v37 = vsel %vm633_vm0, %v8217_v46, %v8331_v11  ;;  %v1404_v33 = vmul.f32 %v6163_v23, %v1384_v44  ;;  %v1051_v29 = vadd.f32 %v1011_v60, %v950_v42  ;;  %v8332_v49 = vrot.slane %v5976_v22, 6 }
  0xd2   : > { %v804_v27 = vrot.slane %v764_v3, 1  ;;  %v966_v11 = vmul.f32 %v5902_v55, %v6308_v63  ;;  %v1067_v46 = vmul.f32 %v5904_v56, %v6308_v63  ;;  %v6352_v50 = vadd.f32 %v6180_v1, %v1403_v26 }
  0xd3   : > { %v1313_v20 = vsel %vm1296_vm5, %v8219_v45, %v8332_v49  ;;  %v6355_v44 = vadd.f32 %v6180_v1, %v1404_v33  ;;  %v1152_v42 = vadd.f32 %v1112_v52, %v1051_v29  ;;  %v1168_v60 = vmul.f32 %v5906_v57, %v6308_v63 }
  0xd4   : > { %8333 = vst [vmem:[#allocation24_spill] sm:$0xff] %v6352_v50  ;;  %v8334_v4 = vrot.slane %v5937_v7, 1  ;;  %v807_v3 = vsel %vm8266_vm1, %v804_v27, %v806_v51  ;;  %v905_v45 = vrot.slane %v865_v39, 2  ;;  %v1006_v28 = vrot.slane %v966_v11, 3 }
  0xd5   : > { %v1457_v30 = vrot.slane %v6352_v50, 2  ;;  %v1458_v26 = vrot.slane %v6352_v50, 4  ;;  %v1459_v38 = vrot.slane %v6352_v50, 6  ;;  %v1107_v33 = vrot.slane %v1067_v46, 4 }
  0xd6   : > { %v805_v49 = vsel %vm8266_vm1, %v8334_v4, %v804_v27  ;;  %v1607_v29 = vsel %vm8264_vm6, %v6355_v44, -inf  ;;  %v1252_v19 = vadd.f32 %v1212_v37, %v1152_v42  ;;  %v848_v52 = vadd.f32 %v807_v3, %v742_v41 }
  0xd7   : > { %v847_v7 = vadd.f32 %v805_v49, %v5973_v21  ;;  %v1586_v4 = vsel %vm8264_vm6, %v1457_v30, -inf  ;;  %v1593_v51 = vsel %vm8264_vm6, %v1458_v26, -inf  ;;  %v1600_v39 = vsel %vm8264_vm6, %v1459_v38, -inf }
  0xd8   : > { %v1608_v27 = vrot.slane %v1607_v29, 4  ;;  %v1587_v11 = vrot.slane %v1586_v4, 4  ;;  %v1594_v61 = vrot.slane %v1593_v51, 4  ;;  %v1601_v47 = vrot.slane %v1600_v39, 4 }
  0xd9   : > { %v1353_v50 = vadd.f32 %v1313_v20, %v1252_v19  ;;  %v8335_v59 = vrot.slane %v5940_v8, 2  ;;  %v908_v21 = vsel %vm8265_vm2, %v905_v45, %v907_v25  ;;  %v8336_v8 = vrot.slane %v5943_v9, 3  ;;  %v713_v25 = vpop.permute.xlu1 %712 }
  0xda   : > { %v6373_v46 = vmax.f32 %v1607_v29, %v1608_v27  ;;  %v1588_v42 = vmax.f32 %v1586_v4, %v1587_v11  ;;  %v1595_v30 = vmax.f32 %v1593_v51, %v1594_v61  ;;  %v6379_v49 = vmax.f32 %v1600_v39, %v1601_v47 }
  0xdb   : > { %v906_v37 = vsel %vm8265_vm2, %v8335_v59, %v905_v45  ;;  %v1373_v38 = vadd.f32 %v6133_v6, %v1353_v50  ;;  %v949_v20 = vadd.f32 %v908_v21, %v848_v52  ;;  %v1007_v59 = vsel %vm994_vm3, %v8336_v8, %v1006_v28 }
  0xdc   : > { %v948_v19 = vadd.f32 %v906_v37, %v847_v7  ;;  %v1589_v29 = vrot.slane %v1588_v42, 2  ;;  %v1596_v41 = vrot.slane %v1595_v30, 2  ;;  %v8337_v47 = vrot.slane %v6292_v31, 3 }
  0xdd   : > { %v1389_v3 = vmax.f32 %v1373_v38, 0.0  ;;  %v8338_v4 = vrot.slane %v5946_v10, 4  ;;  %v8339_v9 = vrot.slane %v6295_v32, 4  ;;  %v1207_v37 = vrot.slane %v1168_v60, 5 }
  0xde   : > { %v1009_v45 = vsel %vm994_vm3, %v1006_v28, %v8337_v47  ;;  %v1049_v50 = vadd.f32 %v1007_v59, %v948_v19  ;;  %v6394_v52 = vmax.f32 %v1588_v42, %v1589_v29  ;;  %v1268_v31 = vmul.f32 %v5908_v58, %v6308_v63 }
  0xdf   : > { %v1108_v7 = vsel %vm1095_vm4, %v8338_v4, %v1107_v33  ;;  %v1409_v51 = vmul.f32 %v6163_v23, %v1389_v3  ;;  %v1050_v39 = vadd.f32 %v1009_v45, %v949_v20  ;;  %v1110_v27 = vsel %vm1095_vm4, %v1107_v33, %v8339_v9 }
  0xe0   : > { %v1150_v11 = vadd.f32 %v1108_v7, %v1049_v50  ;;  %v746_v28 = vmul.f32 %v5919_v62, %v713_v25  ;;  %v6407_v42 = vmul.f32 %v5898_v53, %v713_v25  ;;  %v6410_v38 = vmul.f32 %v5900_v54, %v713_v25 }
  0xe1   : > { %v6404_v10 = vadd.f32 %v6180_v1, %v1409_v51  ;;  %v1151_v21 = vadd.f32 %v1110_v27, %v1050_v39  ;;  %v8341_v32 = vrot.slane %v5950_v12, 5  ;;  %v8342_v60 = vrot.slane %v6303_v43, 5 }
  0xe2   : > { %v1308_v19 = vrot.slane %v1268_v31, 6  ;;  %v6419_v20 = vmul.f32 %v5902_v55, %v713_v25  ;;  %v8343_v12 = vrot.slane %v5953_v13, 6  ;;  %v8344_v43 = vrot.slane %v6306_v40, 6 }
  0xe3   : > { %8340 = vst [vmem:[#allocation25_spill] sm:$0xff] %v6404_v10  ;;  %v1208_v33 = vsel %vm633_vm0, %v8341_v32, %v1207_v37  ;;  %v1210_v63 = vsel %vm633_vm0, %v1207_v37, %v8342_v60  ;;  %v1475_v29 = vrot.slane %v6404_v10, 2  ;;  %v1476_v3 = vrot.slane %v6404_v10, 4 }
  0xe4   : > { %v1477_v8 = vrot.slane %v6404_v10, 6  ;;  %v1250_v59 = vadd.f32 %v1208_v33, %v1150_v11  ;;  %v1251_v47 = vadd.f32 %v1210_v63, %v1151_v21  ;;  %v1309_v45 = vsel %vm1296_vm5, %v8343_v12, %v1308_v19 }
  0xe5   : > { %v1311_v50 = vsel %vm1296_vm5, %v1308_v19, %v8344_v43  ;;  %v8237_v4 = vrot.slane %v6407_v42, 1  ;;  %v1754_v7 = vsel %vm8264_vm6, %v1475_v29, -inf  ;;  %v1761_v51 = vsel %vm8264_vm6, %v1476_v3, -inf }
  0xe6   : > { %v1768_v39 = vsel %vm8264_vm6, %v1477_v8, -inf  ;;  %v1351_v9 = vadd.f32 %v1309_v45, %v1250_v59  ;;  %v1755_v27 = vrot.slane %v1754_v7, 4  ;;  %v1762_v11 = vrot.slane %v1761_v51, 4 }
  0xe7   : > { %v1769_v37 = vrot.slane %v1768_v39, 4  ;;  %v1352_v31 = vadd.f32 %v1311_v50, %v1251_v47  ;;  %v8345_v21 = vrot.slane %v6018_v48, 1  ;;  %v8236_v32 = vrot.slane %v6410_v38, 2 }
  0xe8   : > { %v1371_v13 = vadd.f32 %v6133_v6, %v1351_v9  ;;  %v8234_v33 = vrot.slane %v6419_v20, 3  ;;  %v1756_v60 = vmax.f32 %v1754_v7, %v1755_v27  ;;  %v1763_v63 = vmax.f32 %v1761_v51, %v1762_v11  ;;  %v6464_v9 = vpop.permute.xlu0 %708 }
  0xe9   : > { %v815_v40 = vsel %vm8266_vm1, %v8237_v4, %v8345_v21  ;;  %v6442_v19 = vmax.f32 %v1768_v39, %v1769_v37  ;;  %v1372_v29 = vadd.f32 %v6133_v6, %v1352_v31  ;;  %v6445_v3 = vmax.f32 %v1595_v30, %v1596_v41 }
  0xea   : > { %v1387_v8 = vmax.f32 %v1371_v13, 0.0  ;;  %v852_v59 = vadd.f32 %v815_v40, %v746_v28  ;;  %v8347_v47 = vrot.slane %v6024_v2, 2  ;;  %v1757_v45 = vrot.slane %v1756_v60, 2 }
  0xeb   : > { %8346 = vst [vmem:[#allocation26_spill] sm:$0xff] %v6442_v19  ;;  %v1764_v43 = vrot.slane %v1763_v63, 2  ;;  %v1388_v50 = vmax.f32 %v1372_v29, 0.0  ;;  %v8348_v7 = vrot.slane %v6028_v36, 3  ;;  %v6459_v28 = vmul.f32 %v5904_v56, %v713_v25 }
  0xec   : > { %v916_v12 = vsel %vm8265_vm2, %v8236_v32, %v8347_v47  ;;  %v1407_v30 = vmul.f32 %v6163_v23, %v1387_v8  ;;  %v6462_v39 = vmul.f32 %v5906_v57, %v713_v25  ;;  %v6466_v27 = vmax.f32 %v1756_v60, %v1757_v45  ;;  %v8355_v32 = vld [vmem:[#allocation10_spill] sm:$0xff] }
  0xed   : > { %v1017_v51 = vsel %vm994_vm3, %v8234_v33, %v8348_v7  ;;  %v953_v41 = vadd.f32 %v916_v12, %v852_v59  ;;  %v1408_v37 = vmul.f32 %v6163_v23, %v1388_v50  ;;  %v6471_v31 = vmul.f32 %v5908_v58, %v713_v25 }
  0xee   : > { %8349 = vst [vmem:[#allocation27_spill] sm:$0xff] %v6466_v27  ;;  %v6473_v13 = vmax.f32 %v1763_v63, %v1764_v43  ;;  %v6476_v21 = vadd.f32 %v6180_v1, %v1407_v30  ;;  %v8235_v29 = vrot.slane %v6459_v28, 4  ;;  %v1215_v60 = vrot.slane %v6462_v39, 5 }
  0xef   : > { %v1054_v40 = vadd.f32 %v1017_v51, %v953_v41  ;;  %v6480_v8 = vadd.f32 %v6180_v1, %v1408_v37  ;;  %v1316_v59 = vrot.slane %v6471_v31, 6  ;;  %v767_v47 = vmul.f32 %v5898_v53, %v6464_v9 }
  0xf0   : > { %8350 = vst [vmem:[#allocation28_spill] sm:$0xff] %v6473_v13  ;;  %v1469_v25 = vrot.slane %v6476_v21, 2  ;;  %v1470_v63 = vrot.slane %v6476_v21, 4  ;;  %v1471_v12 = vrot.slane %v6476_v21, 6  ;;  %v8351_v45 = vrot.slane %v6031_v34, 4 }
  0xf1   : > { %v1719_v7 = vsel %vm8264_vm6, %v6480_v8, -inf  ;;  %v745_v30 = vmul.f32 %v5919_v62, %v6464_v9  ;;  %v8356_v4 = vrot.slane %v8355_v32, 6  ;;  %v868_v27 = vmul.f32 %v5900_v54, %v6464_v9 }
  0xf2   : > { %v1118_v43 = vsel %vm1095_vm4, %v8235_v29, %v8351_v45  ;;  %v1698_v41 = vsel %vm8264_vm6, %v1469_v25, -inf  ;;  %v1705_v37 = vsel %vm8264_vm6, %v1470_v63, -inf  ;;  %v1712_v11 = vsel %vm8264_vm6, %v1471_v12, -inf  ;;  %v8352_v45 = vld [vmem:[#allocation9_spill] sm:$0xff] }
  0xf3   : > { %v1155_v51 = vadd.f32 %v1118_v43, %v1054_v40  ;;  %v1720_v26 = vrot.slane %v1719_v7, 4  ;;  %v1699_v35 = vrot.slane %v1698_v41, 4  ;;  %v1706_v61 = vrot.slane %v1705_v37, 4 }
  0xf4   : > { %v1713_v33 = vrot.slane %v1712_v11, 4  ;;  %v8353_v29 = vrot.slane %v8352_v45, 5  ;;  %v1319_v25 = vsel %vm1296_vm5, %v1316_v59, %v8356_v4  ;;  %v810_v63 = vrot.slane %v767_v47, 1 }
  0xf5   : > { %v6507_v40 = vmax.f32 %v1719_v7, %v1720_v26  ;;  %v1700_v12 = vmax.f32 %v1698_v41, %v1699_v35  ;;  %v1707_v19 = vmax.f32 %v1705_v37, %v1706_v61  ;;  %v8357_v26 = vrot.slane %v5956_v14, 1  ;;  %v8359_v61 = vld [vmem:[#allocation7_spill] sm:$0xff] }
  0xf6   : > { %v1218_v50 = vsel %vm633_vm0, %v1215_v60, %v8353_v29  ;;  %v6514_v13 = vmax.f32 %v1712_v11, %v1713_v33  ;;  %v8358_v7 = vrot.slane %v6407_v42, 1  ;;  %v911_v37 = vrot.slane %v868_v27, 2 }
  0xf7   : > { %8354 = vst [vmem:[#allocation9_spill] sm:$0xff] %v6507_v40  ;;  %v1255_v43 = vadd.f32 %v1218_v50, %v1155_v51  ;;  %v811_v50 = vsel %vm8266_vm1, %v8357_v26, %v810_v63  ;;  %v1701_v4 = vrot.slane %v1700_v12, 2  ;;  %v1708_v47 = vrot.slane %v1707_v19, 2 }
  0xf8   : > { %v813_v51 = vsel %vm8266_vm1, %v810_v63, %v8358_v7  ;;  %v850_v33 = vadd.f32 %v811_v50, %v8359_v61  ;;  %v1070_v42 = vmul.f32 %v5904_v56, %v6464_v9  ;;  %v1171_v63 = vmul.f32 %v5906_v57, %v6464_v9 }
  0xf9   : > { %v1356_v29 = vadd.f32 %v1319_v25, %v1255_v43  ;;  %v851_v41 = vadd.f32 %v813_v51, %v745_v30  ;;  %v969_v43 = vmul.f32 %v5902_v55, %v6464_v9  ;;  %v6530_v14 = vmax.f32 %v1700_v12, %v1701_v4 }
  0xfa   : > { %v8360_v50 = vrot.slane %v5959_v15, 2  ;;  %v8361_v27 = vrot.slane %v6410_v38, 2  ;;  %v1113_v4 = vrot.slane %v1070_v42, 4  ;;  %v1213_v61 = vrot.slane %v1171_v63, 5 }
  0xfb   : > { %v1376_v11 = vadd.f32 %v6133_v6, %v1356_v29  ;;  %v1012_v7 = vrot.slane %v969_v43, 3  ;;  %v8362_v35 = vrot.slane %v5962_v16, 3  ;;  %v1271_v38 = vmul.f32 %v5908_v58, %v6464_v9 }
  0xfc   : > { %v912_v29 = vsel %vm8265_vm2, %v8360_v50, %v911_v37  ;;  %v914_v30 = vsel %vm8265_vm2, %v911_v37, %v8361_v27  ;;  %v725_v50 = vpop.permute.xlu1 %724  ;;  %v6552_v37 = vmax.f32 %v1707_v19, %v1708_v47  ;;  %v8364_v43 = vrot.slane %v5965_v17, 4 }
  0xfd   : > { %v1392_v26 = vmax.f32 %v1376_v11, 0.0  ;;  %v951_v12 = vadd.f32 %v912_v29, %v850_v33  ;;  %v952_v51 = vadd.f32 %v914_v30, %v851_v41  ;;  %v1013_v25 = vsel %vm994_vm3, %v8362_v35, %v1012_v7 }
  0xfe   : > { %v8363_v11 = vrot.slane %v6419_v20, 3  ;;  %v1114_v42 = vsel %vm1095_vm4, %v8364_v43, %v1113_v4  ;;  %v8366_v35 = vrot.slane %v6459_v28, 4  ;;  %v8367_v63 = vrot.slane %v5968_v18, 5 }
  0xff   : > { %v1412_v10 = vmul.f32 %v6163_v23, %v1392_v26  ;;  %v1052_v33 = vadd.f32 %v1013_v25, %v951_v12  ;;  %v1314_v26 = vrot.slane %v1271_v38, 6  ;;  %v1216_v17 = vsel %vm633_vm0, %v1213_v61, %v1215_v60 }
 0x100   : > { %v1015_v15 = vsel %vm994_vm3, %v1012_v7, %v8363_v11  ;;  %v1116_v20 = vsel %vm1095_vm4, %v1113_v4, %v8366_v35  ;;  %v1214_v9 = vsel %vm633_vm0, %v8367_v63, %v1213_v61  ;;  %v771_v25 = vmul.f32 %v5898_v53, %v725_v50 }
 0x101   : > { %v1053_v41 = vadd.f32 %v1015_v15, %v952_v51  ;;  %v6558_v16 = vadd.f32 %v6180_v1, %v1412_v10  ;;  %v1153_v19 = vadd.f32 %v1114_v42, %v1052_v33  ;;  %v8368_v29 = vrot.slane %v5976_v22, 6 }
 0x102   : > { %v749_v27 = vmul.f32 %v5919_v62, %v725_v50  ;;  %v1317_v39 = vsel %vm1296_vm5, %v1314_v26, %v1316_v59  ;;  %v818_v60 = vrot.slane %v771_v25, 1  ;;  %v872_v51 = vmul.f32 %v5900_v54, %v725_v50 }
 0x103   : > { %8365 = vst [vmem:[#allocation10_spill] sm:$0xff] %v6558_v16  ;;  %v1154_v47 = vadd.f32 %v1116_v20, %v1053_v41  ;;  %v1831_v28 = vsel %vm8264_vm6, %v6558_v16, -inf  ;;  %v1315_v18 = vsel %vm1296_vm5, %v8368_v29, %v1314_v26  ;;  %v1253_v7 = vadd.f32 %v1214_v9, %v1153_v19  ;;  %v6600_v9 = vpop.permute.xlu0 %720 }
 0x104   : > { %v1832_v30 = vrot.slane %v1831_v28, 4  ;;  %v6582_v4 = vmul.f32 %v5902_v55, %v725_v50  ;;  %v6585_v61 = vmul.f32 %v5904_v56, %v725_v50  ;;  %v6590_v38 = vmul.f32 %v5906_v57, %v725_v50 }
 0x105   : > { %v1254_v12 = vadd.f32 %v1216_v17, %v1154_v47  ;;  %v1354_v11 = vadd.f32 %v1315_v18, %v1253_v7  ;;  %v8370_v31 = vrot.slane %v6146_v0, 1  ;;  %v919_v33 = vrot.slane %v872_v51, 2  ;;  %v8373_v7 = vld [vmem:[#allocation12_spill] sm:$0xff]  ;;  %v8375_v51 = vld [vmem:[#allocation13_spill] sm:$0xff] }
 0x106   : > { %v6587_v22 = vmax.f32 %v1831_v28, %v1832_v30  ;;  %v8246_v41 = vrot.slane %v6582_v4, 3  ;;  %v8244_v43 = vrot.slane %v6585_v61, 4  ;;  %v8371_v19 = vrot.slane %v6152_v24, 2 }
 0x107   : > { %v1355_v15 = vadd.f32 %v1317_v39, %v1254_v12  ;;  %v821_v59 = vsel %vm8266_vm1, %v818_v60, %v8370_v31  ;;  %v1374_v35 = vadd.f32 %v6133_v6, %v1354_v11  ;;  %v8372_v17 = vrot.slane %v6155_v5, 3 }
 0x108   : > { %8369 = vst [vmem:[#allocation7_spill] sm:$0xff] %v6587_v22  ;;  %v855_v63 = vadd.f32 %v821_v59, %v749_v27  ;;  %v922_v47 = vsel %vm8265_vm2, %v919_v33, %v8371_v19  ;;  %v8243_v28 = vrot.slane %v6590_v38, 5  ;;  %v6613_v27 = vmul.f32 %v5908_v58, %v725_v50 }
 0x109   : > { %v1375_v20 = vadd.f32 %v6133_v6, %v1355_v15  ;;  %v1023_v25 = vsel %vm994_vm3, %v8246_v41, %v8372_v17  ;;  %v1390_v29 = vmax.f32 %v1374_v35, 0.0  ;;  %v8374_v12 = vrot.slane %v8373_v7, 4 }
 0x10a   : > { %v956_v30 = vadd.f32 %v922_v47, %v855_v63  ;;  %v8376_v11 = vrot.slane %v8375_v51, 5  ;;  %v770_v31 = vmul.f32 %v5898_v53, %v6600_v9  ;;  %v871_v59 = vmul.f32 %v5900_v54, %v6600_v9 }
 0x10b   : > { %v1391_v18 = vmax.f32 %v1375_v20, 0.0  ;;  %v1124_v39 = vsel %vm1095_vm4, %v8244_v43, %v8374_v12  ;;  %v1410_v50 = vmul.f32 %v6163_v23, %v1390_v29  ;;  %v8245_v63 = vrot.slane %v6613_v27, 6 }
 0x10c   : > { %v1224_v15 = vsel %vm633_vm0, %v8243_v28, %v8376_v11  ;;  %v1057_v20 = vadd.f32 %v1023_v25, %v956_v30  ;;  %v748_v19 = vmul.f32 %v5919_v62, %v6600_v9  ;;  %v816_v47 = vrot.slane %v770_v31, 1 }
 0x10d   : > { %v1411_v35 = vmul.f32 %v6163_v23, %v1391_v18  ;;  %v917_v17 = vrot.slane %v871_v59, 2  ;;  %v972_v12 = vmul.f32 %v5902_v55, %v6600_v9  ;;  %v6637_v11 = vadd.f32 %v6180_v1, %v1410_v50  ;;  %v8378_v18 = vld [vmem:[#allocation14_spill] sm:$0xff] }
 0x10e   : > { %v1158_v29 = vadd.f32 %v1124_v39, %v1057_v20  ;;  %v1073_v25 = vmul.f32 %v5904_v56, %v6600_v9  ;;  %v8379_v30 = vrot.slane %v8378_v18, 6  ;;  %v8380_v59 = vrot.slane %v6018_v48, 1 }
 0x10f   : > { %v6640_v42 = vadd.f32 %v6180_v1, %v1411_v35  ;;  %v819_v50 = vsel %vm8266_vm1, %v816_v47, %v818_v60  ;;  %v8381_v26 = vrot.slane %v6024_v2, 2  ;;  %v920_v43 = vsel %vm8265_vm2, %v917_v17, %v919_v33  ;;  %v5393_v33 = vld [vmem:[%s8383_s5 + $0xd8] sm:$0xff] }
 0x110   : > { %v1325_v31 = vsel %vm1296_vm5, %v8245_v63, %v8379_v30  ;;  %v817_v10 = vsel %vm8266_vm1, %v8380_v59, %v816_v47  ;;  %v1775_v48 = vsel %vm8264_vm6, %v6637_v11, -inf  ;;  %v1258_v59 = vadd.f32 %v1224_v15, %v1158_v29  ;;  %v8382_v63 = vld [vmem:[#allocation8_spill] sm:$0xff]  ;;  %2708 = vmatpush.bf16.msra.mxu3 %v5393_v33 }
 0x111   : > { %8377 = vst [vmem:[#allocation12_spill] sm:$0xff] %v6640_v42  ;;  %v918_v35 = vsel %vm8265_vm2, %v8381_v26, %v917_v17  ;;  %v1481_v20 = vrot.slane %v6640_v42, 2  ;;  %v1482_v28 = vrot.slane %v6640_v42, 4  ;;  %v1483_v30 = vrot.slane %v6640_v42, 6 }
 0x112   : > { %v853_v60 = vadd.f32 %v817_v10, %v8382_v63  ;;  %v1776_v47 = vrot.slane %v1775_v48, 4  ;;  %v854_v39 = vadd.f32 %v819_v50, %v748_v19  ;;  %v1359_v40 = vadd.f32 %v1325_v31, %v1258_v59 }
 0x113   : > { %v1810_v2 = vsel %vm8264_vm6, %v1481_v20, -inf  ;;  %v1817_v26 = vsel %vm8264_vm6, %v1482_v28, -inf  ;;  %v1824_v16 = vsel %vm8264_vm6, %v1483_v30, -inf  ;;  %v1018_v28 = vrot.slane %v972_v12, 3 }
 0x114   : > { %v1811_v41 = vrot.slane %v1810_v2, 4  ;;  %v1818_v22 = vrot.slane %v1817_v26, 4  ;;  %v6670_v17 = vmax.f32 %v1775_v48, %v1776_v47  ;;  %v1825_v15 = vrot.slane %v1824_v16, 4 }
 0x115   : > { %v954_v29 = vadd.f32 %v918_v35, %v853_v60  ;;  %v955_v10 = vadd.f32 %v920_v43, %v854_v39  ;;  %v1379_v20 = vadd.f32 %v6133_v6, %v1359_v40  ;;  %v1119_v31 = vrot.slane %v1073_v25, 4  ;;  %v5392_v40 = vld [vmem:[%s8383_s5 + $0xd0] sm:$0xff]  ;;  %v755_v39 = vpop.permute.xlu1 %754 }
 0x116   : > { %v1812_v63 = vmax.f32 %v1810_v2, %v1811_v41  ;;  %v1819_v42 = vmax.f32 %v1817_v26, %v1818_v22  ;;  %v6674_v50 = vmax.f32 %v1824_v16, %v1825_v15  ;;  %v1174_v30 = vmul.f32 %v5906_v57, %v6600_v9  ;;  %2709 = vmatpush.bf16.msra.mxu3 %v5392_v40 }
 0x117   : > { %v1395_v47 = vmax.f32 %v1379_v20, 0.0  ;;  %v8384_v35 = vrot.slane %v6028_v36, 3  ;;  %v8385_v43 = vrot.slane %v6582_v4, 3  ;;  %v8386_v26 = vrot.slane %v6031_v34, 4 }
 0x118   : > { %v1813_v59 = vrot.slane %v1812_v63, 2  ;;  %v1820_v48 = vrot.slane %v1819_v42, 2  ;;  %v8387_v15 = vrot.slane %v6585_v61, 4  ;;  %v1219_v4 = vrot.slane %v1174_v30, 5  ;;  %v5391_v61 = vld [vmem:[%s8383_s5 + $0xc8] sm:$0xff] }
 0x119   : > { %v1019_v41 = vsel %vm994_vm3, %v8384_v35, %v1018_v28  ;;  %v1021_v12 = vsel %vm994_vm3, %v1018_v28, %v8385_v43  ;;  %v1415_v36 = vmul.f32 %v6163_v23, %v1395_v47  ;;  %v1120_v33 = vsel %vm1095_vm4, %v8386_v26, %v1119_v31 }
 0x11a   : > { %v1055_v25 = vadd.f32 %v1019_v41, %v954_v29  ;;  %v6689_v60 = vmax.f32 %v1812_v63, %v1813_v59  ;;  %v1056_v2 = vadd.f32 %v1021_v12, %v955_v10  ;;  %v1122_v20 = vsel %vm1095_vm4, %v1119_v31, %v8387_v15  ;;  %2710 = vmatpush.bf16.msra.mxu3 %v5391_v61 }
 0x11b   : > { %v1274_v29 = vmul.f32 %v5908_v58, %v6600_v9  ;;  %v6700_v28 = vmax.f32 %v1819_v42, %v1820_v48  ;;  %v6703_v63 = vadd.f32 %v6180_v1, %v1415_v36  ;;  %v6706_v34 = vmul.f32 %v5898_v53, %v755_v39 }
 0x11c   : > { %v1156_v35 = vadd.f32 %v1120_v33, %v1055_v25  ;;  %v1157_v10 = vadd.f32 %v1122_v20, %v1056_v2  ;;  %v8388_v31 = vrot.slane %v8352_v45, 5  ;;  %v8389_v59 = vrot.slane %v6590_v38, 5 }
 0x11d   : > { %v1320_v9 = vrot.slane %v1274_v29, 6  ;;  %v6718_v48 = vmul.f32 %v5900_v54, %v755_v39  ;;  %v1493_v47 = vrot.slane %v6703_v63, 2  ;;  %v1494_v41 = vrot.slane %v6703_v63, 4 }
 0x11e   : > { %v1220_v30 = vsel %vm633_vm0, %v8388_v31, %v1219_v4  ;;  %v1222_v42 = vsel %vm633_vm0, %v1219_v4, %v8389_v59  ;;  %v1495_v40 = vrot.slane %v6703_v63, 6  ;;  %v8390_v45 = vrot.slane %v8355_v32, 6  ;;  %v5390_v32 = vld [vmem:[%s8383_s5 + $0xc0] sm:$0xff] }
 0x11f   : > { %v1256_v43 = vadd.f32 %v1220_v30, %v1156_v35  ;;  %v1257_v12 = vadd.f32 %v1222_v42, %v1157_v10  ;;  %v8391_v38 = vrot.slane %v6613_v27, 6  ;;  %v6730_v2 = vmul.f32 %v5902_v55, %v755_v39  ;;  %2711 = vmatpush.bf16.msra.mxu3 %v5390_v32 }
 0x120   : > { %v1321_v25 = vsel %vm1296_vm5, %v8390_v45, %v1320_v9  ;;  %v1922_v26 = vsel %vm8264_vm6, %v1493_v47, -inf  ;;  %v1929_v33 = vsel %vm8264_vm6, %v1494_v41, -inf  ;;  %v1936_v15 = vsel %vm8264_vm6, %v1495_v40, -inf }
 0x121   : > { %v1323_v36 = vsel %vm1296_vm5, %v1320_v9, %v8391_v38  ;;  %v1357_v20 = vadd.f32 %v1321_v25, %v1256_v43  ;;  %v1923_v35 = vrot.slane %v1922_v26, 4  ;;  %v1930_v4 = vrot.slane %v1929_v33, 4 }
 0x122   : > { %v1937_v29 = vrot.slane %v1936_v15, 4  ;;  %v1358_v27 = vadd.f32 %v1323_v36, %v1257_v12  ;;  %v824_v61 = vrot.slane %v6706_v34, 1  ;;  %v925_v31 = vrot.slane %v6718_v48, 2  ;;  %v733_v48 = vpop.permute.xlu0 %732  ;;  %v8418_v36 = vld [vmem:[#allocation20_spill] sm:$0xff] }
 0x123   : > { %v1377_v10 = vadd.f32 %v6133_v6, %v1357_v20  ;;  %v6742_v30 = vmul.f32 %v5904_v56, %v755_v39  ;;  %v1924_v59 = vmax.f32 %v1922_v26, %v1923_v35  ;;  %v1931_v42 = vmax.f32 %v1929_v33, %v1930_v4 }
 0x124   : > { %v6744_v9 = vmax.f32 %v1936_v15, %v1937_v29  ;;  %v1378_v47 = vadd.f32 %v6133_v6, %v1358_v27  ;;  %v1026_v40 = vrot.slane %v6730_v2, 3  ;;  %v6749_v43 = vmul.f32 %v5906_v57, %v755_v39 }
 0x125   : > { %v1393_v41 = vmax.f32 %v1377_v10, 0.0  ;;  %v6752_v34 = vmul.f32 %v5908_v58, %v755_v39  ;;  %v1925_v12 = vrot.slane %v1924_v59, 2  ;;  %v1932_v45 = vrot.slane %v1931_v42, 2 }
 0x126   : > { %8392 = vst [vmem:[#allocation13_spill] sm:$0xff] %v6744_v9  ;;  %v1394_v25 = vmax.f32 %v1378_v47, 0.0  ;;  %v1127_v38 = vrot.slane %v6742_v30, 4  ;;  %v1227_v6 = vrot.slane %v6749_v43, 5  ;;  %v751_v39 = vmul.f32 %v5919_v62, %v733_v48 }
 0x127   : > { %v1413_v26 = vmul.f32 %v6163_v23, %v1393_v41  ;;  %v1328_v2 = vrot.slane %v6752_v34, 6  ;;  %v6759_v33 = vmax.f32 %v1924_v59, %v1925_v12  ;;  %v773_v20 = vmul.f32 %v5898_v53, %v733_v48 }
 0x128   : > { %v1414_v15 = vmul.f32 %v6163_v23, %v1394_v25  ;;  %v6764_v32 = vmax.f32 %v1931_v42, %v1932_v45  ;;  %v874_v4 = vmul.f32 %v5900_v54, %v733_v48  ;;  %v975_v29 = vmul.f32 %v5902_v55, %v733_v48 }
 0x129   : > { %v6767_v35 = vadd.f32 %v6180_v1, %v1413_v26  ;;  %v822_v10 = vrot.slane %v773_v20, 1  ;;  %v1076_v30 = vmul.f32 %v5904_v56, %v733_v48  ;;  %v1177_v23 = vmul.f32 %v5906_v57, %v733_v48  ;;  %v8394_v20 = vld [vmem:[#allocation11_spill] sm:$0xff] }
 0x12a   : > { %v6772_v27 = vadd.f32 %v6180_v1, %v1414_v15  ;;  %v923_v42 = vrot.slane %v874_v4, 2  ;;  %v8393_v55 = vrot.slane %v6146_v0, 1  ;;  %v1277_v56 = vmul.f32 %v5908_v58, %v733_v48 }
 0x12b   : > { %v1487_v62 = vrot.slane %v6767_v35, 2  ;;  %v1488_v53 = vrot.slane %v6767_v35, 4  ;;  %v1489_v59 = vrot.slane %v6767_v35, 6  ;;  %v825_v26 = vsel %vm8266_vm1, %v822_v10, %v824_v61 }
 0x12c   : > { %v1887_v54 = vsel %vm8264_vm6, %v6772_v27, -inf  ;;  %v823_v1 = vsel %vm8266_vm1, %v8393_v55, %v822_v10  ;;  %v857_v4 = vadd.f32 %v825_v26, %v751_v39  ;;  %v8395_v55 = vrot.slane %v6152_v24, 2 }
 0x12d   : > { %v1866_v57 = vsel %vm8264_vm6, %v1487_v62, -inf  ;;  %v1873_v41 = vsel %vm8264_vm6, %v1488_v53, -inf  ;;  %v1880_v43 = vsel %vm8264_vm6, %v1489_v59, -inf  ;;  %v1888_v34 = vrot.slane %v1887_v54, 4 }
 0x12e   : > { %v1867_v12 = vrot.slane %v1866_v57, 4  ;;  %v1874_v45 = vrot.slane %v1873_v41, 4  ;;  %v1881_v25 = vrot.slane %v1880_v43, 4  ;;  %v856_v0 = vadd.f32 %v823_v1, %v8394_v20 }
 0x12f   : > { %v6790_v15 = vmax.f32 %v1887_v54, %v1888_v34  ;;  %v924_v58 = vsel %vm8265_vm2, %v8395_v55, %v923_v42  ;;  %v926_v59 = vsel %vm8265_vm2, %v923_v42, %v925_v31  ;;  %v1024_v61 = vrot.slane %v975_v29, 3 }
 0x130   : > { %v1868_v48 = vmax.f32 %v1866_v57, %v1867_v12  ;;  %v1875_v62 = vmax.f32 %v1873_v41, %v1874_v45  ;;  %v6796_v53 = vmax.f32 %v1880_v43, %v1881_v25  ;;  %v957_v47 = vadd.f32 %v924_v58, %v856_v0  ;;  %v8401_v58 = vld [vmem:[#allocation16_spill] sm:$0xff] }
 0x131   : > { %v958_v16 = vadd.f32 %v926_v59, %v857_v4  ;;  %v1125_v39 = vrot.slane %v1076_v30, 4  ;;  %v8396_v24 = vrot.slane %v6155_v5, 3  ;;  %v1027_v57 = vsel %vm994_vm3, %v1024_v61, %v1026_v40  ;;  %v8400_v4 = vld [vmem:[#allocation17_spill] sm:$0xff]  ;;  %v8403_v59 = vld [vmem:[#allocation15_spill] sm:$0xff] }
 0x132   : > { %v1869_v10 = vrot.slane %v1868_v48, 2  ;;  %v1876_v54 = vrot.slane %v1875_v62, 2  ;;  %v1225_v41 = vrot.slane %v1177_v23, 5  ;;  %v1326_v43 = vrot.slane %v1277_v56, 6 }
 0x133   : > { %v1025_v34 = vsel %vm994_vm3, %v8396_v24, %v1024_v61  ;;  %v1059_v45 = vadd.f32 %v1027_v57, %v958_v16  ;;  %v8397_v25 = vrot.slane %v8373_v7, 4  ;;  %v1128_v5 = vsel %vm1095_vm4, %v1125_v39, %v1127_v38 }
 0x134   : > { %v6805_v12 = vmax.f32 %v1868_v48, %v1869_v10  ;;  %v1058_v42 = vadd.f32 %v1025_v34, %v957_v47  ;;  %v6808_v29 = vmax.f32 %v1875_v62, %v1876_v54  ;;  %v8398_v26 = vrot.slane %v8375_v51, 5 }
 0x135   : > { %v1126_v30 = vsel %vm1095_vm4, %v8397_v25, %v1125_v39  ;;  %v1160_v56 = vadd.f32 %v1128_v5, %v1059_v45  ;;  %v1228_v20 = vsel %vm633_vm0, %v1225_v41, %v1227_v6  ;;  %v8399_v0 = vrot.slane %v8378_v18, 6 }
 0x136   : > { %v1226_v40 = vsel %vm633_vm0, %v8398_v26, %v1225_v41  ;;  %v1159_v23 = vadd.f32 %v1126_v30, %v1058_v42  ;;  %v1329_v47 = vsel %vm1296_vm5, %v1326_v43, %v1328_v2  ;;  %v1462_v7 = vrot.slane %v6355_v44, 6  ;;  %v8406_v41 = vld [vmem:[#allocation24_spill] sm:$0xff]  ;;  %v5635_v26 = vld [vmem:[%s8294_s24] ss:$0 sm:$0xff] }
 0x137   : > { %v1327_v16 = vsel %vm1296_vm5, %v8399_v0, %v1326_v43  ;;  %v1554_v55 = vrot.slane %v8400_v4, 2  ;;  %v8402_v38 = vrot.slane %v8401_v58, 4  ;;  %v1260_v62 = vadd.f32 %v1228_v20, %v1160_v56  ;;  %v8407_v56 = vld [vmem:[#allocation19_spill] sm:$0xff] }
 0x138   : > { %v1259_v48 = vadd.f32 %v1226_v40, %v1159_v23  ;;  %v8404_v61 = vrot.slane %v8403_v59, 4  ;;  %v8405_v18 = vrot.slane %v8403_v59, 6  ;;  %v1579_v43 = vsel %vm8264_vm6, %v8406_v41, -inf }
 0x139   : > { %v1560_v51 = vmax.f32 %v8401_v58, %v8402_v38  ;;  %v1555_v2 = vmax.f32 %v8400_v4, %v1554_v55  ;;  %v1361_v57 = vadd.f32 %v1329_v47, %v1260_v62  ;;  %v1591_v42 = vrot.slane %v6394_v52, 1 }
 0x13a   : > { %v1565_v6 = vsel %vm8264_vm6, %v8404_v61, -inf  ;;  %v1572_v10 = vsel %vm8264_vm6, %v8405_v18, -inf  ;;  %v1360_v34 = vadd.f32 %v1327_v16, %v1259_v48  ;;  %v1468_v20 = vrot.slane %v8407_v56, 6 }
 0x13b   : > { %v1561_v54 = vrot.slane %v1560_v51, 2  ;;  %v1566_v39 = vrot.slane %v1565_v6, 4  ;;  %v1573_v24 = vrot.slane %v1572_v10, 4  ;;  %v1556_v45 = vrot.slane %v1555_v2, 1 }
 0x13c   : > { %v1380_v40 = vadd.f32 %v5635_v26, %v1360_v34  ;;  %v1381_v23 = vadd.f32 %v5635_v26, %v1361_v57  ;;  %v1580_v0 = vrot.slane %v1579_v43, 4  ;;  %v6842_v55 = vmax.f32 %v6394_v52, %v1591_v42 }
 0x13d   : > { %v1562_v25 = vmax.f32 %v1560_v51, %v1561_v54  ;;  %v1567_v30 = vmax.f32 %v1565_v6, %v1566_v39  ;;  %v1574_v5 = vmax.f32 %v1572_v10, %v1573_v24  ;;  %v1598_v48 = vrot.slane %v6445_v3, 1  ;;  %v5636_v10 = vld [vmem:[%s8300_s29] ss:$0 sm:$0xff]  ;;  %s5705_s29 = smov 96  }
 0x13e   : > { %v1396_v58 = vmax.f32 %v1380_v40, 0.0  ;;  %v1397_v38 = vmax.f32 %v1381_v23, 0.0  ;;  %v1581_v51 = vmax.f32 %v1579_v43, %v1580_v0  ;;  %v6845_v62 = vmax.f32 %v1555_v2, %v1556_v45 }
 0x13f   : > { %v1563_v16 = vrot.slane %v1562_v25, 1  ;;  %v1568_v47 = vrot.slane %v1567_v30, 2  ;;  %v1575_v4 = vrot.slane %v1574_v5, 2  ;;  %v8408_v6 = vrot.slane %v6379_v49, 2 }
 0x140   : > { %v1416_v54 = vmul.f32 %v5636_v10, %v1396_v58  ;;  %v1417_v52 = vmul.f32 %v5636_v10, %v1397_v38  ;;  %v1582_v24 = vrot.slane %v1581_v51, 2  ;;  %v8409_v2 = vrot.slane %v6373_v46, 2  ;;  %v8412_v10 = vld [vmem:[#allocation18_spill] sm:$0xff] }
 0x141   : > { %v1569_v59 = vmax.f32 %v1567_v30, %v1568_v47  ;;  %v1576_v61 = vmax.f32 %v1574_v5, %v1575_v4  ;;  %v1604_v18 = vmax.f32 %v6379_v49, %v8408_v6  ;;  %v6853_v39 = vmax.f32 %v1562_v25, %v1563_v16  ;;  %v5637_v49 = vld [vmem:[%s8303_s4] ss:$0 sm:$0xff]  ;;  %s594_s4 = scalar_lea.vmem [#allocation2], %s593_s23 }
 0x142   : > { %v1611_v43 = vmax.f32 %v6373_v46, %v8409_v2  ;;  %v6861_v42 = vadd.f32 %v5637_v49, %v1416_v54  ;;  %v1583_v45 = vmax.f32 %v1581_v51, %v1582_v24  ;;  %v6864_v30 = vmax.f32 %v6445_v3, %v1598_v48  ;;  %s4776_s24 = sshll.u32 %s594_s4, 4  ;;  %s4777_s24 = int_to_ptr.vmem [resolvable:$true] %s4776_s24 }
 0x143   : > { %v1570_v34 = vrot.slane %v1569_v59, 1  ;;  %v1577_v57 = vrot.slane %v1576_v61, 1  ;;  %v1605_v41 = vrot.slane %v1604_v18, 1  ;;  %v8410_v25 = vrot.slane %v6355_v44, 2 }
 0x144   : > { %v6869_v26 = vadd.f32 %v5637_v49, %v1417_v52  ;;  %v1612_v46 = vrot.slane %v1611_v43, 1  ;;  %v1943_v47 = vsel %vm8264_vm6, %v6861_v42, -inf  ;;  %v1584_v58 = vrot.slane %v1583_v45, 1  ;;  %v8415_v49 = vld [vmem:[#allocation23_spill] sm:$0xff] }
 0x145   : > { %v1614_v5 = vsel %vm8264_vm6, %v8410_v25, -inf  ;;  %v6871_v40 = vmax.f32 %v1569_v59, %v1570_v34  ;;  %v6873_v23 = vmax.f32 %v1576_v61, %v1577_v57  ;;  %v6879_v3 = vmax.f32 %v1604_v18, %v1605_v41  ;;  %v8414_v41 = vld [vmem:[#allocation22_spill] sm:$0xff] }
 0x146   : > { %v1944_v4 = vrot.slane %v1943_v47, 4  ;;  %v1615_v38 = vrot.slane %v1614_v5, 4  ;;  %v8411_v51 = vrot.slane %v6355_v44, 4  ;;  %v6884_v59 = vmax.f32 %v1611_v43, %v1612_v46  ;;  %v8416_v43 = vld [vmem:[#allocation21_spill] sm:$0xff] }
 0x147   : > { %v1628_v6 = vsel %vm8264_vm6, %v1462_v7, -inf  ;;  %v1635_v54 = vsel %vm8264_vm6, %v8412_v10, -inf  ;;  %v1647_v2 = vrot.slane %v8414_v41, 1  ;;  %v1654_v25 = vrot.slane %v8415_v49, 1 }
 0x148   : > { %v1621_v48 = vsel %vm8264_vm6, %v8411_v51, -inf  ;;  %v6891_v52 = vmax.f32 %v1943_v47, %v1944_v4  ;;  %v1616_v18 = vmax.f32 %v1614_v5, %v1615_v38  ;;  %v1629_v24 = vrot.slane %v1628_v6, 4 }
 0x149   : > { %v1622_v61 = vrot.slane %v1621_v48, 4  ;;  %v1636_v34 = vrot.slane %v1635_v54, 4  ;;  %v8417_v46 = vrot.slane %v8416_v43, 2  ;;  %v6898_v44 = vmax.f32 %v1583_v45, %v1584_v58 }
 0x14a   : > { %8413 = vst [vmem:[#allocation14_spill] sm:$0xff] %v6891_v52  ;;  %v1617_v7 = vrot.slane %v1616_v18, 2  ;;  %v1630_v16 = vmax.f32 %v1628_v6, %v1629_v24  ;;  %v1648_v5 = vmax.f32 %v8414_v41, %v1647_v2  ;;  %v8419_v1 = vrot.slane %v8418_v36, 2 }
 0x14b   : > { %v1623_v57 = vmax.f32 %v1621_v48, %v1622_v61  ;;  %v1660_v51 = vmax.f32 %v8416_v43, %v8417_v46  ;;  %v1637_v0 = vmax.f32 %v1635_v54, %v1636_v34  ;;  %v1655_v45 = vmax.f32 %v8415_v49, %v1654_v25 }
 0x14c   : > { %v1618_v48 = vmax.f32 %v1616_v18, %v1617_v7  ;;  %v1631_v61 = vrot.slane %v1630_v16, 2  ;;  %v1667_v31 = vmax.f32 %v8418_v36, %v8419_v1  ;;  %v8420_v58 = vrot.slane %v8407_v56, 2 }
 0x14d   : > { %v1624_v4 = vrot.slane %v1623_v57, 2  ;;  %v1661_v38 = vrot.slane %v1660_v51, 1  ;;  %v1638_v10 = vrot.slane %v1637_v0, 2  ;;  %v8421_v54 = vrot.slane %v8407_v56, 4 }
 0x14e   : > { %v1670_v6 = vsel %vm8264_vm6, %v8420_v58, -inf  ;;  %v1619_v34 = vrot.slane %v1618_v48, 1  ;;  %v1632_v41 = vmax.f32 %v1630_v16, %v1631_v61  ;;  %v1668_v2 = vrot.slane %v1667_v31, 1 }
 0x14f   : > { %v1625_v19 = vmax.f32 %v1623_v57, %v1624_v4  ;;  %v1677_v24 = vsel %vm8264_vm6, %v8421_v54, -inf  ;;  %v1639_v18 = vmax.f32 %v1637_v0, %v1638_v10  ;;  %v1671_v46 = vrot.slane %v1670_v6, 4 }
 0x150   : > { %v1678_v7 = vrot.slane %v1677_v24, 4  ;;  %v1684_v36 = vsel %vm8264_vm6, %v1468_v20, -inf  ;;  %v1620_v1 = vmax.f32 %v1618_v48, %v1619_v34  ;;  %v1633_v57 = vrot.slane %v1632_v41, 1 }
 0x151   : > { %v1626_v43 = vrot.slane %v1625_v19, 1  ;;  %v1640_v49 = vrot.slane %v1639_v18, 1  ;;  %v1662_v25 = vmax.f32 %v1660_v51, %v1661_v38  ;;  %v1669_v4 = vmax.f32 %v1667_v31, %v1668_v2 }
 0x152   : > { %v1672_v58 = vmax.f32 %v1670_v6, %v1671_v46  ;;  %v1679_v47 = vmax.f32 %v1677_v24, %v1678_v7  ;;  %v1685_v22 = vrot.slane %v1684_v36, 4  ;;  %v1634_v52 = vmax.f32 %v1632_v41, %v1633_v57 }
 0x153   : > { %v1627_v54 = vmax.f32 %v1625_v19, %v1626_v43  ;;  %v1691_v0 = vsel %vm8264_vm6, %v6476_v21, -inf  ;;  %v1641_v9 = vmax.f32 %v1639_v18, %v1640_v49  ;;  %v2064_v20 = vsel %vm2063_vm7, %v6853_v39, %v6845_v62 }
 0x154   : > { %v1673_v16 = vrot.slane %v1672_v58, 2  ;;  %v1680_v61 = vrot.slane %v1679_v47, 2  ;;  %v1686_v10 = vmax.f32 %v1684_v36, %v1685_v22  ;;  %v1692_v56 = vrot.slane %v1691_v0, 4 }
 0x155   : > { %v2066_v48 = vsel %vm2065_vm8, %v6871_v40, %v2064_v20  ;;  %v2072_v62 = vsel %vm2071_vm11, %v6864_v30, %v6842_v55  ;;  %v2081_v39 = vsel %vm2071_vm11, %v1655_v45, %v1648_v5 }
 0x156   : > { %v1674_v31 = vmax.f32 %v1672_v58, %v1673_v16  ;;  %v1681_v51 = vmax.f32 %v1679_v47, %v1680_v61  ;;  %v1687_v38 = vrot.slane %v1686_v10, 2  ;;  %v1693_v19 = vmax.f32 %v1691_v0, %v1692_v56 }
 0x157   : > { %v2068_v34 = vsel %vm2067_vm9, %v6873_v23, %v2066_v48  ;;  %v2074_v43 = vsel %vm2073_vm12, %v6879_v3, %v2072_v62  ;;  %v2082_v46 = vsel %vm2073_vm12, %v1662_v25, %v2081_v39  ;;  %v1474_v23 = vrot.slane %v6480_v8, 6 }
 0x158   : > { %v1675_v21 = vrot.slane %v1674_v31, 1  ;;  %v1682_v22 = vrot.slane %v1681_v51, 1  ;;  %v1688_v6 = vmax.f32 %v1686_v10, %v1687_v38  ;;  %v1694_v24 = vrot.slane %v1693_v19, 2 }
 0x159   : > { %v2070_v2 = vsel %vm2069_vm10, %v6898_v44, %v2068_v34  ;;  %v2076_v30 = vsel %vm2075_vm13, %v6884_v59, %v2074_v43  ;;  %v2083_v5 = vsel %vm2075_vm13, %v1669_v4, %v2082_v46  ;;  %v1480_v3 = vrot.slane %v6637_v11, 6 }
 0x15a   : > { %v1676_v47 = vmax.f32 %v1674_v31, %v1675_v21  ;;  %v1683_v41 = vmax.f32 %v1681_v51, %v1682_v22  ;;  %v1689_v40 = vrot.slane %v1688_v6, 1  ;;  %v1695_v18 = vmax.f32 %v1693_v19, %v1694_v24 }
 0x15b   : > { %v2077_v45 = vsel %vm2063_vm7, %v1620_v1, %v2076_v30  ;;  %v6940_v44 = vsel %vm633_vm0, 0.0, %v2070_v2  ;;  %v1703_v10 = vrot.slane %v6530_v14, 1  ;;  %v1710_v43 = vrot.slane %v6552_v37, 1 }
 0x15c   : > { %v1690_v7 = vmax.f32 %v1688_v6, %v1689_v40  ;;  %v1696_v55 = vrot.slane %v1695_v18, 1  ;;  %v2084_v36 = vsel %vm2063_vm7, %v1676_v47, %v2083_v5  ;;  %v2078_v49 = vsel %vm2065_vm8, %v1627_v54, %v2077_v45 }
 0x15d   : > { %v2085_v25 = vsel %vm2065_vm8, %v1683_v41, %v2084_v36  ;;  %v2311_v58 = vrot.slane %v6940_v44, 6  ;;  %v2079_v59 = vsel %vm2067_vm9, %v1634_v52, %v2078_v49  ;;  %v2270_v1 = vrot.slane %v6940_v44, 5 }
 0x15e   : > { %v1697_v57 = vmax.f32 %v1695_v18, %v1696_v55  ;;  %v2086_v4 = vsel %vm2067_vm9, %v1690_v7, %v2085_v25  ;;  %v2204_v0 = vrot.slane %v6940_v44, 3  ;;  %v6951_v16 = vsel %vm2069_vm10, %v1641_v9, %v2079_v59  ;;  %v8423_v55 = vld [vmem:[#allocation9_spill] sm:$0xff] }
 0x15f   : > { %v2138_v54 = vrot.slane %v6940_v44, 1  ;;  %v2312_v56 = vrot.slane %v6951_v16, 6  ;;  %v2271_v20 = vrot.slane %v6951_v16, 5  ;;  %v2205_v51 = vrot.slane %v6951_v16, 3  ;;  %v8427_v25 = vld [vmem:[#allocation25_spill] sm:$0xff] }
 0x160   : > { %v6954_v61 = vsel %vm2069_vm10, %v1697_v57, %v2086_v4  ;;  %v2139_v38 = vrot.slane %v6951_v16, 1  ;;  %v6983_v18 = vmax.f32 %v6530_v14, %v1703_v10  ;;  %v8422_v46 = vrot.slane %v6514_v13, 2 }
 0x161   : > { %v2314_v52 = vrot.slane %v6954_v61, 6  ;;  %v2273_v31 = vrot.slane %v6954_v61, 5  ;;  %v2207_v9 = vrot.slane %v6954_v61, 3  ;;  %v2141_v19 = vrot.slane %v6954_v61, 1 }
 0x162   : > { %v2313_v48 = vsel %vm1296_vm5, %v2311_v58, %v2312_v56  ;;  %v2272_v22 = vsel %vm633_vm0, %v2270_v1, %v2271_v20  ;;  %v2206_v62 = vsel %vm994_vm3, %v2204_v0, %v2205_v51  ;;  %v2140_v41 = vsel %vm8266_vm1, %v2138_v54, %v2139_v38 }
 0x163   : > { %v2315_v21 = vsel %vm1296_vm5, %v2312_v56, %v2314_v52  ;;  %v2274_v6 = vsel %vm633_vm0, %v2271_v20, %v2273_v31  ;;  %v2208_v39 = vsel %vm994_vm3, %v2205_v51, %v2207_v9  ;;  %v2142_v40 = vsel %vm8266_vm1, %v2139_v38, %v2141_v19  ;;  %v8428_v56 = vld [vmem:[#allocation27_spill] sm:$0xff] }
 0x164   : > { %v2364_v24 = vpack.c.bf16 %v2315_v21, %v2313_v48  ;;  %v5539_v34 = vpack.i.bf16 %v2274_v6, %v2272_v22  ;;  %v5549_v47 = vpack.i.bf16 %v2208_v39, %v2206_v62  ;;  %v5544_v2 = vpack.i.bf16 %v2142_v40, %v2140_v41  ;;  %v8429_v48 = vld [vmem:[#allocation28_spill] sm:$0xff]  ;;  %v8430_v62 = vld [vmem:[#allocation26_spill] sm:$0xff] }
 0x165   : > { %v1716_v7 = vmax.f32 %v6514_v13, %v8422_v46  ;;  %v8424_v30 = vrot.slane %v8423_v55, 2  ;;  %v8425_v14 = vrot.slane %v6480_v8, 2  ;;  %v8426_v36 = vrot.slane %v6480_v8, 4 }
 0x166   : > { %4951 = vmatmul.msk.bf16.vlgmr.msra.gmra.mxu3 %vm8263_vm14, %v2364_v24  ;;  %5540 = vrot.lane.b32.xlu2 %v5539_v34, %s8258_s22  ;;  %v1740_v49 = vsel %vm8264_vm6, %v1474_v23, -inf  ;;  %v1747_v58 = vsel %vm8264_vm6, %v8427_v25, -inf  ;;  %v1711_v13 = vmax.f32 %v6552_v37, %v1710_v43  ;;  %v1759_v20 = vrot.slane %v8428_v56, 1 }
 0x167   : > { %v1723_v5 = vmax.f32 %v8423_v55, %v8424_v30  ;;  %5550 = vrot.lane.b32.xlu1 %v5549_v47, %s8258_s22  ;;  %v1726_v45 = vsel %vm8264_vm6, %v8425_v14, -inf  ;;  %v1733_v57 = vsel %vm8264_vm6, %v8426_v36, -inf  ;;  %5545 = vrot.lane.b32.xlu0 %v5544_v2, %s8258_s22  ;;  %v1717_v59 = vrot.slane %v1716_v7, 1 }
 0x168   : > { %v1727_v1 = vrot.slane %v1726_v45, 4  ;;  %v1734_v0 = vrot.slane %v1733_v57, 4  ;;  %v1741_v54 = vrot.slane %v1740_v49, 4  ;;  %v1748_v10 = vrot.slane %v1747_v58, 4 }
 0x169   : > { %v1724_v4 = vrot.slane %v1723_v5, 1  ;;  %v1718_v8 = vmax.f32 %v1716_v7, %v1717_v59  ;;  %v1766_v23 = vrot.slane %v8429_v48, 1  ;;  %v1760_v24 = vmax.f32 %v8428_v56, %v1759_v20 }
 0x16a   : > { %v1728_v38 = vmax.f32 %v1726_v45, %v1727_v1  ;;  %v1735_v21 = vmax.f32 %v1733_v57, %v1734_v0  ;;  %v1742_v22 = vmax.f32 %v1740_v49, %v1741_v54  ;;  %v1749_v6 = vmax.f32 %v1747_v58, %v1748_v10 }
 0x16b   : > { %v1725_v51 = vmax.f32 %v1723_v5, %v1724_v4  ;;  %v1767_v37 = vmax.f32 %v8429_v48, %v1766_v23  ;;  %v8431_v39 = vrot.slane %v8430_v62, 2  ;;  %v8432_v41 = vrot.slane %v6670_v17, 2  ;;  %v8435_v23 = vld [vmem:[#allocation12_spill] sm:$0xff] }
 0x16c   : > { %v1729_v34 = vrot.slane %v1728_v38, 2  ;;  %v1736_v2 = vrot.slane %v1735_v21, 2  ;;  %v1743_v43 = vrot.slane %v1742_v22, 2  ;;  %v1750_v46 = vrot.slane %v1749_v6, 2 }
 0x16d   : > { %v1772_v47 = vmax.f32 %v8430_v62, %v8431_v39  ;;  %v1779_v40 = vmax.f32 %v6670_v17, %v8432_v41  ;;  %v8433_v7 = vrot.slane %v6637_v11, 2  ;;  %v8434_v25 = vrot.slane %v6637_v11, 4 }
 0x16e   : > { %v1730_v30 = vmax.f32 %v1728_v38, %v1729_v34  ;;  %v1737_v36 = vmax.f32 %v1735_v21, %v1736_v2  ;;  %v1744_v57 = vmax.f32 %v1742_v22, %v1743_v43  ;;  %v1751_v49 = vmax.f32 %v1749_v6, %v1750_v46  ;;  %v8436_v46 = vld [vmem:[#allocation10_spill] sm:$0xff] }
 0x16f   : > { %v1782_v55 = vsel %vm8264_vm6, %v8433_v7, -inf  ;;  %v1773_v5 = vrot.slane %v1772_v47, 1  ;;  %v1780_v14 = vrot.slane %v1779_v40, 1  ;;  %v1789_v58 = vsel %vm8264_vm6, %v8434_v25, -inf }
 0x170   : > { %v1783_v45 = vrot.slane %v1782_v55, 4  ;;  %v1731_v59 = vrot.slane %v1730_v30, 1  ;;  %v1738_v0 = vrot.slane %v1737_v36, 1  ;;  %v1745_v54 = vrot.slane %v1744_v57, 1 }
 0x171   : > { %v1774_v17 = vmax.f32 %v1772_v47, %v1773_v5  ;;  %v1781_v4 = vmax.f32 %v1779_v40, %v1780_v14  ;;  %v1752_v10 = vrot.slane %v1751_v49, 1  ;;  %v1790_v56 = vrot.slane %v1789_v58, 4 }
 0x172   : > { %v1784_v1 = vmax.f32 %v1782_v55, %v1783_v45  ;;  %v1732_v20 = vmax.f32 %v1730_v30, %v1731_v59  ;;  %v1796_v48 = vsel %vm8264_vm6, %v1480_v3, -inf  ;;  %v1803_v21 = vsel %vm8264_vm6, %v8435_v23, -inf }
 0x173   : > { %v1739_v22 = vmax.f32 %v1737_v36, %v1738_v0  ;;  %v1746_v6 = vmax.f32 %v1744_v57, %v1745_v54  ;;  %v1753_v34 = vmax.f32 %v1751_v49, %v1752_v10  ;;  %v1791_v62 = vmax.f32 %v1789_v58, %v1790_v56 }
 0x174   : > { %v1785_v38 = vrot.slane %v1784_v1, 2  ;;  %v1797_v47 = vrot.slane %v1796_v48, 4  ;;  %v1804_v41 = vrot.slane %v1803_v21, 4  ;;  %v2088_v40 = vsel %vm2071_vm11, %v1711_v13, %v6983_v18 }
 0x175   : > { %v1792_v2 = vrot.slane %v1791_v62, 2  ;;  %v2089_v43 = vsel %vm2073_vm12, %v1718_v8, %v2088_v40  ;;  %v2095_v11 = vsel %vm2071_vm11, %v1767_v37, %v1760_v24  ;;  %v1486_v3 = vrot.slane %v8436_v46, 6 }
 0x176   : > { %v1786_v39 = vmax.f32 %v1784_v1, %v1785_v38  ;;  %v1798_v55 = vmax.f32 %v1796_v48, %v1797_v47  ;;  %v1805_v30 = vmax.f32 %v1803_v21, %v1804_v41  ;;  %v2090_v5 = vsel %vm2075_vm13, %v1725_v51, %v2089_v43  ;;  %v8438_v41 = vld [vmem:[#allocation7_spill] sm:$0xff] }
 0x177   : > { %v1793_v14 = vmax.f32 %v1791_v62, %v1792_v2  ;;  %v2091_v45 = vsel %vm2063_vm7, %v1732_v20, %v2090_v5  ;;  %v2096_v36 = vsel %vm2073_vm12, %v1774_v17, %v2095_v11  ;;  %v1492_v57 = vrot.slane %v6772_v27, 6 }
 0x178   : > { %v1787_v7 = vrot.slane %v1786_v39, 1  ;;  %v1799_v13 = vrot.slane %v1798_v55, 2  ;;  %v1806_v49 = vrot.slane %v1805_v30, 2  ;;  %v2092_v8 = vsel %vm2065_vm8, %v1739_v22, %v2091_v45 }
 0x179   : > { %v1794_v24 = vrot.slane %v1793_v14, 1  ;;  %v2093_v37 = vsel %vm2067_vm9, %v1746_v6, %v2092_v8  ;;  %v2097_v25 = vsel %vm2075_vm13, %v1781_v4, %v2096_v36  ;;  %v1815_v58 = vrot.slane %v6689_v60, 1 }
 0x17a   : > { %v1788_v18 = vmax.f32 %v1786_v39, %v1787_v7  ;;  %v1800_v51 = vmax.f32 %v1798_v55, %v1799_v13  ;;  %v1807_v59 = vmax.f32 %v1805_v30, %v1806_v49  ;;  %v7041_v1 = vsel %vm2069_vm10, %v1753_v34, %v2093_v37 }
 0x17b   : > { %v1795_v0 = vmax.f32 %v1793_v14, %v1794_v24  ;;  %v2275_v54 = vrot.slane %v7041_v1, 5  ;;  %v2209_v10 = vrot.slane %v7041_v1, 3  ;;  %v2143_v56 = vrot.slane %v7041_v1, 1 }
 0x17c   : > { %v2098_v17 = vsel %vm2063_vm7, %v1788_v18, %v2097_v25  ;;  %v1801_v20 = vrot.slane %v1800_v51, 1  ;;  %v1808_v38 = vrot.slane %v1807_v59, 1  ;;  %v2316_v4 = vrot.slane %v7041_v1, 6 }
 0x17d   : > { %v7049_v48 = vmax.f32 %v6689_v60, %v1815_v58  ;;  %v2099_v23 = vsel %vm2065_vm8, %v1795_v0, %v2098_v17  ;;  %v2276_v21 = vsel %vm633_vm0, %v2273_v31, %v2275_v54  ;;  %v2210_v22 = vsel %vm994_vm3, %v2207_v9, %v2209_v10 }
 0x17e   : > { %v2144_v6 = vsel %vm8266_vm1, %v2141_v19, %v2143_v56  ;;  %v1802_v34 = vmax.f32 %v1800_v51, %v1801_v20  ;;  %v1809_v62 = vmax.f32 %v1807_v59, %v1808_v38  ;;  %v2317_v60 = vsel %vm1296_vm5, %v2314_v52, %v2316_v4 }
 0x17f   : > { %v1822_v39 = vrot.slane %v6700_v28, 1  ;;  %v8437_v47 = vrot.slane %v6674_v50, 2  ;;  %v8439_v40 = vrot.slane %v8438_v41, 2  ;;  %v8440_v2 = vrot.slane %v8436_v46, 2 }
 0x180   : > { %v8441_v43 = vrot.slane %v8436_v46, 4  ;;  %v2100_v52 = vsel %vm2067_vm9, %v1802_v34, %v2099_v23  ;;  %v1852_v45 = vsel %vm8264_vm6, %v1486_v3, -inf  ;;  %v1878_v34 = vrot.slane %v6808_v29, 1 }
 0x181   : > { %v1828_v31 = vmax.f32 %v6674_v50, %v8437_v47  ;;  %v1835_v9 = vmax.f32 %v8438_v41, %v8439_v40  ;;  %v1838_v19 = vsel %vm8264_vm6, %v8440_v2, -inf  ;;  %v7079_v7 = vmax.f32 %v6700_v28, %v1822_v39 }
 0x182   : > { %v1845_v11 = vsel %vm8264_vm6, %v8441_v43, -inf  ;;  %v1839_v55 = vrot.slane %v1838_v19, 4  ;;  %v7082_v50 = vsel %vm2069_vm10, %v1809_v62, %v2100_v52  ;;  %v1853_v23 = vrot.slane %v1852_v45, 4 }
 0x183   : > { %v1846_v30 = vrot.slane %v1845_v11, 4  ;;  %v1829_v5 = vrot.slane %v1828_v31, 1  ;;  %v1836_v14 = vrot.slane %v1835_v9, 1  ;;  %v2277_v36 = vrot.slane %v7082_v50, 5 }
 0x184   : > { %v2211_v46 = vrot.slane %v7082_v50, 3  ;;  %v2145_v18 = vrot.slane %v7082_v50, 1  ;;  %v2318_v13 = vrot.slane %v7082_v50, 6  ;;  %v1840_v8 = vmax.f32 %v1838_v19, %v1839_v55 }
 0x185   : > { %v7089_v49 = vmax.f32 %v1828_v31, %v1829_v5  ;;  %v7091_v28 = vmax.f32 %v1835_v9, %v1836_v14  ;;  %v1847_v24 = vmax.f32 %v1845_v11, %v1846_v30  ;;  %v2278_v37 = vsel %vm633_vm0, %v2275_v54, %v2277_v36 }
 0x186   : > { %v2212_v3 = vsel %vm994_vm3, %v2209_v10, %v2211_v46  ;;  %v2146_v25 = vsel %vm8266_vm1, %v2143_v56, %v2145_v18  ;;  %v2319_v58 = vsel %vm1296_vm5, %v2316_v4, %v2318_v13  ;;  %v5554_v51 = vpack.i.bf16 %v2278_v37, %v2276_v21 }
 0x187   : > { %v5564_v59 = vpack.i.bf16 %v2212_v3, %v2210_v22  ;;  %v5559_v17 = vpack.i.bf16 %v2146_v25, %v2144_v6  ;;  %v2368_v0 = vpack.c.bf16 %v2319_v58, %v2317_v60  ;;  %v1841_v20 = vrot.slane %v1840_v8, 2 }
 0x188   : > { %v1848_v38 = vrot.slane %v1847_v24, 2  ;;  %v1859_v54 = vsel %vm8264_vm6, %v6767_v35, -inf  ;;  %5555 = vrot.lane.b32.xlu2 %v5554_v51, %s8258_s22  ;;  %v1871_v56 = vrot.slane %v6805_v12, 1  ;;  %v8442_v4 = vrot.slane %v6796_v53, 2 }
 0x189   : > { %5565 = vrot.lane.b32.xlu1 %v5564_v59, %s8258_s22  ;;  %v1860_v10 = vrot.slane %v1859_v54, 4  ;;  %5560 = vrot.lane.b32.xlu0 %v5559_v17, %s8258_s22  ;;  %v1842_v22 = vmax.f32 %v1840_v8, %v1841_v20  ;;  %v1854_v35 = vmax.f32 %v1852_v45, %v1853_v23  ;;  %v8443_v62 = vrot.slane %v6772_v27, 2  ;;  %s8452_s22 = smov 64  }
 0x18a   : > { %v1884_v21 = vmax.f32 %v6796_v53, %v8442_v4  ;;  %4952 = vmatmul.msk.bf16.gmra.mxu3 %vm8263_vm14, %v2368_v0  ;;  %v1849_v6 = vmax.f32 %v1847_v24, %v1848_v38  ;;  %v1872_v47 = vmax.f32 %v6805_v12, %v1871_v56  ;;  %v1879_v31 = vmax.f32 %v6808_v29, %v1878_v34 }
 0x18b   : > { %v1894_v60 = vsel %vm8264_vm6, %v8443_v62, -inf  ;;  %v1861_v39 = vmax.f32 %v1859_v54, %v1860_v10  ;;  %v1843_v40 = vrot.slane %v1842_v22, 1  ;;  %v1855_v53 = vrot.slane %v1854_v35, 2 }
 0x18c   : > { %v1885_v41 = vrot.slane %v1884_v21, 1  ;;  %v1850_v9 = vrot.slane %v1849_v6, 1  ;;  %v8444_v2 = vrot.slane %v6790_v15, 2  ;;  %v1895_v52 = vrot.slane %v1894_v60, 4 }
 0x18d   : > { %v1862_v43 = vrot.slane %v1861_v39, 2  ;;  %v8445_v55 = vrot.slane %v6772_v27, 4  ;;  %v1844_v5 = vmax.f32 %v1842_v22, %v1843_v40  ;;  %v1856_v12 = vmax.f32 %v1854_v35, %v1855_v53 }
 0x18e   : > { %v1891_v19 = vmax.f32 %v6790_v15, %v8444_v2  ;;  %v1886_v11 = vmax.f32 %v1884_v21, %v1885_v41  ;;  %v1851_v14 = vmax.f32 %v1849_v6, %v1850_v9  ;;  %v1896_v8 = vmax.f32 %v1894_v60, %v1895_v52 }
 0x18f   : > { %v1901_v30 = vsel %vm8264_vm6, %v8445_v55, -inf  ;;  %v1863_v29 = vmax.f32 %v1861_v39, %v1862_v43  ;;  %v1908_v37 = vsel %vm8264_vm6, %v1492_v57, -inf  ;;  %v1857_v3 = vrot.slane %v1856_v12, 1 }
 0x190   : > { %v1892_v45 = vrot.slane %v1891_v19, 1  ;;  %v1902_v24 = vrot.slane %v1901_v30, 4  ;;  %v1909_v25 = vrot.slane %v1908_v37, 4  ;;  %v1915_v58 = vsel %vm8264_vm6, %v6703_v63, -inf }
 0x191   : > { %v1864_v51 = vrot.slane %v1863_v29, 1  ;;  %v1897_v59 = vrot.slane %v1896_v8, 2  ;;  %v1916_v0 = vrot.slane %v1915_v58, 4  ;;  %v1858_v20 = vmax.f32 %v1856_v12, %v1857_v3 }
 0x192   : > { %v1893_v15 = vmax.f32 %v1891_v19, %v1892_v45  ;;  %v1903_v17 = vmax.f32 %v1901_v30, %v1902_v24  ;;  %v1910_v38 = vmax.f32 %v1908_v37, %v1909_v25  ;;  %v2102_v23 = vsel %vm2071_vm11, %v7079_v7, %v7049_v48 }
 0x193   : > { %v2109_v27 = vsel %vm2071_vm11, %v1879_v31, %v1872_v47  ;;  %v1865_v54 = vmax.f32 %v1863_v29, %v1864_v51  ;;  %v1898_v57 = vmax.f32 %v1896_v8, %v1897_v59  ;;  %v1917_v56 = vmax.f32 %v1915_v58, %v1916_v0  ;;  %v5389_v8 = vld [vmem:[%s8383_s5 + $0xb8] sm:$0xff] }
 0x194   : > { %v1904_v10 = vrot.slane %v1903_v17, 2  ;;  %v1911_v34 = vrot.slane %v1910_v38, 2  ;;  %v2103_v63 = vsel %vm2073_vm12, %v7089_v49, %v2102_v23  ;;  %v2110_v4 = vsel %vm2073_vm12, %v1886_v11, %v2109_v27  ;;  %2675 = vmatpush.bf16.msra.mxu2 %v5389_v8  ;;  %v5381_v59 = vld [vmem:[%s8383_s5 + $0x78] sm:$0xff] }
 0x195   : > { %v1498_v21 = vrot.slane %v6861_v42, 6  ;;  %v1899_v22 = vrot.slane %v1898_v57, 1  ;;  %v1918_v35 = vrot.slane %v1917_v56, 2  ;;  %v2104_v48 = vsel %vm2075_vm13, %v7091_v28, %v2103_v63  ;;  %2646 = vmatpush.bf16.msra.mxu1 %v5381_v59 }
 0x196   : > { %v1905_v6 = vmax.f32 %v1903_v17, %v1904_v10  ;;  %v1912_v7 = vmax.f32 %v1910_v38, %v1911_v34  ;;  %v2105_v62 = vsel %vm2063_vm7, %v1844_v5, %v2104_v48  ;;  %v2111_v60 = vsel %vm2075_vm13, %v1893_v15, %v2110_v4  ;;  %v8446_v38 = vld [vmem:[#allocation13_spill] sm:$0xff] }
 0x197   : > { %v1499_v39 = vrot.slane %v6869_v26, 2  ;;  %v1900_v47 = vmax.f32 %v1898_v57, %v1899_v22  ;;  %v1919_v49 = vmax.f32 %v1917_v56, %v1918_v35  ;;  %v2106_v41 = vsel %vm2065_vm8, %v1851_v14, %v2105_v62  ;;  %v5387_v62 = vld [vmem:[%s8383_s5 + $0xa8] sm:$0xff] }
 0x198   : > { %v1906_v31 = vrot.slane %v1905_v6, 1  ;;  %v1913_v40 = vrot.slane %v1912_v7, 1  ;;  %v2107_v9 = vsel %vm2067_vm9, %v1858_v20, %v2106_v41  ;;  %v1500_v53 = vrot.slane %v6869_v26, 4 }
 0x199   : > { %v1501_v2 = vrot.slane %v6869_v26, 6  ;;  %v1920_v19 = vrot.slane %v1919_v49, 1  ;;  %v7150_v43 = vsel %vm2069_vm10, %v1865_v54, %v2107_v9  ;;  %v2112_v11 = vsel %vm2063_vm7, %v1900_v47, %v2111_v60  ;;  %v8448_v54 = vld [vmem:[#allocation14_spill] sm:$0xff] }
 0x19a   : > { %v1907_v28 = vmax.f32 %v1905_v6, %v1906_v31  ;;  %v1914_v52 = vmax.f32 %v1912_v7, %v1913_v40  ;;  %v2279_v55 = vrot.slane %v7150_v43, 5  ;;  %v2213_v30 = vrot.slane %v7150_v43, 3 }
 0x19b   : > { %v2147_v5 = vrot.slane %v7150_v43, 1  ;;  %v1921_v14 = vmax.f32 %v1919_v49, %v1920_v19  ;;  %v2320_v45 = vrot.slane %v7150_v43, 6  ;;  %v1927_v29 = vrot.slane %v6759_v33, 1 }
 0x19c   : > { %v2113_v12 = vsel %vm2065_vm8, %v1907_v28, %v2112_v11  ;;  %v2280_v37 = vsel %vm633_vm0, %v2277_v36, %v2279_v55  ;;  %v2214_v3 = vsel %vm994_vm3, %v2211_v46, %v2213_v30  ;;  %v1934_v36 = vrot.slane %v6764_v32, 1  ;;  %v5388_v46 = vld [vmem:[%s8383_s5 + $0xb0] sm:$0xff] }
 0x19d   : > { %v2114_v24 = vsel %vm2067_vm9, %v1914_v52, %v2113_v12  ;;  %v2148_v15 = vsel %vm8266_vm1, %v2145_v18, %v2147_v5  ;;  %v2321_v58 = vsel %vm1296_vm5, %v2318_v13, %v2320_v45  ;;  %v7179_v51 = vmax.f32 %v6759_v33, %v1927_v29  ;;  %v5373_v18 = vld [vmem:[%s8383_s5 + $0x38] sm:$0xff]  ;;  %2676 = vmatpush.bf16.msra.mxu2 %v5388_v46  ;;  %v5372_v11 = vld [vmem:[%s8383_s5 + $0x30] sm:$0xff] }
 0x19e   : > { %v7173_v25 = vsel %vm2069_vm10, %v1921_v14, %v2114_v24  ;;  %v1935_v20 = vmax.f32 %v6764_v32, %v1934_v36  ;;  %v8447_v23 = vrot.slane %v8446_v38, 2  ;;  %v8449_v57 = vrot.slane %v8448_v54, 2  ;;  %2617 = vmatpush.bf16.msra.mxu0 %v5373_v18  ;;  %v5380_v52 = vld [vmem:[%s8383_s5 + $0x70] sm:$0xff] }
 0x19f   : > { %v2281_v13 = vrot.slane %v7173_v25, 5  ;;  %v2215_v33 = vrot.slane %v7173_v25, 3  ;;  %v2149_v17 = vrot.slane %v7173_v25, 1  ;;  %v2322_v0 = vrot.slane %v7173_v25, 6  ;;  %2647 = vmatpush.bf16.msra.mxu1 %v5380_v52 }
 0x1a0   : > { %v1940_v27 = vmax.f32 %v8446_v38, %v8447_v23  ;;  %v1947_v10 = vmax.f32 %v8448_v54, %v8449_v57  ;;  %v8450_v56 = vrot.slane %v6861_v42, 2  ;;  %v8451_v49 = vrot.slane %v6861_v42, 4  ;;  %v5371_v38 = vld [vmem:[%s8383_s5 + $0x28] sm:$0xff]  ;;  %v5385_v57 = vld [vmem:[%s8383_s5 + $0x98] sm:$0xff] }
 0x1a1   : > { %v2282_v63 = vsel %vm633_vm0, %v2279_v55, %v2281_v13  ;;  %v2216_v32 = vsel %vm994_vm3, %v2213_v30, %v2215_v33  ;;  %v2150_v4 = vsel %vm8266_vm1, %v2147_v5, %v2149_v17  ;;  %v2323_v22 = vsel %vm1296_vm5, %v2320_v45, %v2322_v0  ;;  %2677 = vmatpush.bf16.msra.mxu2 %v5387_v62  ;;  %v5386_v45 = vld [vmem:[%s8383_s5 + $0xa0] sm:$0xff] }
 0x1a2   : > { %v1950_v34 = vsel %vm8264_vm6, %v8450_v56, -inf  ;;  %v5569_v6 = vpack.i.bf16 %v2282_v63, %v2280_v37  ;;  %v5579_v35 = vpack.i.bf16 %v2216_v32, %v2214_v3  ;;  %v5574_v48 = vpack.i.bf16 %v2150_v4, %v2148_v15  ;;  %2618 = vmatpush.bf16.msra.mxu0 %v5372_v11  ;;  %v5378_v63 = vld [vmem:[%s8383_s5 + $0x60] sm:$0xff] }
 0x1a3   : > { %v2372_v7 = vpack.c.bf16 %v2323_v22, %v2321_v58  ;;  %v1941_v60 = vrot.slane %v1940_v27, 1  ;;  %v1948_v47 = vrot.slane %v1947_v10, 1  ;;  %v1951_v31 = vrot.slane %v1950_v34, 4 }
 0x1a4   : > { %v1957_v41 = vsel %vm8264_vm6, %v8451_v49, -inf  ;;  %5570 = vrot.lane.b32.xlu2 %v5569_v6, %s8452_s22  ;;  %5580 = vrot.lane.b32.xlu1 %v5579_v35, %s8452_s22  ;;  %v1964_v9 = vsel %vm8264_vm6, %v1498_v21, -inf  ;;  %v1971_v28 = vsel %vm8264_vm6, %v6869_v26, -inf  ;;  %v1978_v19 = vsel %vm8264_vm6, %v1499_v39, -inf  ;;  %v5379_v26 = vld [vmem:[%s8383_s5 + $0x68] sm:$0xff] }
 0x1a5   : > { %v1958_v40 = vrot.slane %v1957_v41, 4  ;;  %5575 = vrot.lane.b32.xlu0 %v5574_v48, %s8452_s22  ;;  %4953 = vmatmul.msk.bf16.gmra.mxu3 %vm8263_vm14, %v2372_v7  ;;  %v1942_v42 = vmax.f32 %v1940_v27, %v1941_v60  ;;  %v1949_v21 = vmax.f32 %v1947_v10, %v1948_v47  ;;  %v1952_v55 = vmax.f32 %v1950_v34, %v1951_v31  ;;  %v5370_v34 = vld [vmem:[%s8383_s5 + $0x20] sm:$0xff] }
 0x1a6   : > { %v1965_v30 = vrot.slane %v1964_v9, 4  ;;  %v1972_v14 = vrot.slane %v1971_v28, 4  ;;  %v1979_v12 = vrot.slane %v1978_v19, 4  ;;  %v1985_v39 = vsel %vm8264_vm6, %v1500_v53, -inf  ;;  %2678 = vmatpush.bf16.msra.mxu2 %v5386_v45  ;;  %2619 = vmatpush.bf16.msra.mxu0 %v5371_v38 }
 0x1a7   : > { %v1959_v5 = vmax.f32 %v1957_v41, %v1958_v40  ;;  %v1953_v29 = vrot.slane %v1952_v55, 2  ;;  %v1986_v24 = vrot.slane %v1985_v39, 4  ;;  %v1992_v37 = vsel %vm8264_vm6, %v1501_v2, -inf  ;;  %2648 = vmatpush.bf16.msra.mxu1 %v5379_v26  ;;  %v5384_v41 = vld [vmem:[%s8383_s5 + $0x90] sm:$0xff] }
 0x1a8   : > { %v1966_v8 = vmax.f32 %v1964_v9, %v1965_v30  ;;  %v1973_v15 = vmax.f32 %v1971_v28, %v1972_v14  ;;  %v1980_v58 = vmax.f32 %v1978_v19, %v1979_v12  ;;  %v1993_v36 = vrot.slane %v1992_v37, 4  ;;  %v5383_v14 = vld [vmem:[%s8383_s5 + $0x88] sm:$0xff] }
 0x1a9   : > { %v1960_v3 = vrot.slane %v1959_v5, 2  ;;  %v1954_v46 = vmax.f32 %v1952_v55, %v1953_v29  ;;  %v1987_v18 = vmax.f32 %v1985_v39, %v1986_v24  ;;  %v2116_v59 = vsel %vm2071_vm11, %v1935_v20, %v7179_v51 }
 0x1aa   : > { %v1967_v53 = vrot.slane %v1966_v8, 2  ;;  %v1974_v23 = vrot.slane %v1973_v15, 2  ;;  %v1981_v27 = vrot.slane %v1980_v58, 2  ;;  %v1994_v54 = vmax.f32 %v1992_v37, %v1993_v36  ;;  %2679 = vmatpush.bf16.msra.mxu2 %v5385_v57  ;;  %2620 = vmatpush.bf16.msra.mxu0 %v5370_v34 }
 0x1ab   : > { %v1961_v2 = vmax.f32 %v1959_v5, %v1960_v3  ;;  %v1955_v10 = vrot.slane %v1954_v46, 1  ;;  %v1988_v51 = vrot.slane %v1987_v18, 2  ;;  %v2117_v20 = vsel %vm2073_vm12, %v1942_v42, %v2116_v59  ;;  %2649 = vmatpush.bf16.msra.mxu1 %v5378_v63 }
 0x1ac   : > { %v1968_v56 = vmax.f32 %v1966_v8, %v1967_v53  ;;  %v1975_v4 = vmax.f32 %v1973_v15, %v1974_v23  ;;  %v1982_v22 = vmax.f32 %v1980_v58, %v1981_v27  ;;  %v1995_v6 = vrot.slane %v1994_v54, 2  ;;  %v5382_v53 = vld [vmem:[%s8383_s5 + $0x80] sm:$0xff] }
 0x1ad   : > { %v1962_v32 = vrot.slane %v1961_v2, 1  ;;  %v1956_v35 = vmax.f32 %v1954_v46, %v1955_v10  ;;  %v1989_v7 = vmax.f32 %v1987_v18, %v1988_v51  ;;  %v2118_v62 = vsel %vm2075_vm13, %v1949_v21, %v2117_v20 }
 0x1ae   : > { %v1969_v48 = vrot.slane %v1968_v56, 1  ;;  %v1976_v47 = vrot.slane %v1975_v4, 1  ;;  %v1983_v31 = vrot.slane %v1982_v22, 1  ;;  %v1996_v49 = vmax.f32 %v1994_v54, %v1995_v6  ;;  %2680 = vmatpush.bf16.msra.mxu2 %v5384_v41 }
 0x1af   : > { %v1963_v60 = vmax.f32 %v1961_v2, %v1962_v32  ;;  %v1990_v9 = vrot.slane %v1989_v7, 1  ;;  %v2119_v28 = vsel %vm2063_vm7, %v1956_v35, %v2118_v62  ;;  %v5369_v32 = vld [vmem:[%s8383_s5 + $0x18] sm:$0xff]  ;;  %v5367_v62 = vld [vmem:[%s8383_s5 + $0x8] sm:$0xff]  ;;  %v2179_v41 = vrot.slane %v6940_v44, 2 }
 0x1b0   : > { %v1970_v40 = vmax.f32 %v1968_v56, %v1969_v48  ;;  %v1977_v19 = vmax.f32 %v1975_v4, %v1976_v47  ;;  %v1984_v11 = vmax.f32 %v1982_v22, %v1983_v31  ;;  %v1997_v52 = vrot.slane %v1996_v49, 1  ;;  %v5377_v4 = vld [vmem:[%s8383_s5 + $0x58] sm:$0xff]  ;;  %2621 = vmatpush.bf16.msra.mxu0 %v5369_v32  ;;  %v5368_v48 = vld [vmem:[%s8383_s5 + $0x10] sm:$0xff] }
 0x1b1   : > { %v2120_v42 = vsel %vm2065_vm8, %v1963_v60, %v2119_v28  ;;  %v1991_v21 = vmax.f32 %v1989_v7, %v1990_v9  ;;  %v2245_v56 = vrot.slane %v6940_v44, 4  ;;  %2650 = vmatpush.bf16.msra.mxu1 %v5377_v4  ;;  %v5376_v7 = vld [vmem:[%s8383_s5 + $0x50] sm:$0xff]  ;;  %v5375_v60 = vld [vmem:[%s8383_s5 + $0x48] sm:$0xff]  ;;  %v2180_v47 = vrot.slane %v6951_v16, 2 }
 0x1b2   : > { %v2121_v55 = vsel %vm2067_vm9, %v1970_v40, %v2120_v42  ;;  %v1998_v30 = vmax.f32 %v1996_v49, %v1997_v52  ;;  %2681 = vmatpush.bf16.msra.mxu2 %v5383_v14  ;;  %v2182_v31 = vrot.slane %v6954_v61, 2  ;;  %v5366_v52 = vld [vmem:[%s8383_s5] sm:$0xff] }
 0x1b3   : > { %v7276_v5 = vsel %vm2069_vm10, %v1977_v19, %v2121_v55  ;;  %v2123_v12 = vsel %vm2071_vm11, %v1991_v21, %v1984_v11  ;;  %v2181_v28 = vsel %vm8265_vm2, %v2179_v41, %v2180_v47  ;;  %v5374_v42 = vld [vmem:[%s8383_s5 + $0x40] sm:$0xff]  ;;  %s5658_s5 = scalar_lea.hbm %s8197_s19, 2 }
 0x1b4   : > { %v2283_v39 = vrot.slane %v7276_v5, 5  ;;  %v2217_v45 = vrot.slane %v7276_v5, 3  ;;  %v2151_v29 = vrot.slane %v7276_v5, 1  ;;  %v2124_v8 = vsel %vm2073_vm12, %v1998_v30, %v2123_v12  ;;  %2622 = vmatpush.bf16.msra.mxu0 %v5368_v48 }
 0x1b5   : > { %v2324_v24 = vrot.slane %v7276_v5, 6  ;;  %v7288_v37 = vsel %vm633_vm0, %v2124_v8, 0.0  ;;  %2651 = vmatpush.bf16.msra.mxu1 %v5376_v7  ;;  %v2183_v19 = vsel %vm8265_vm2, %v2180_v47, %v2182_v31  ;;  %v2188_v47 = vrot.slane %v7150_v43, 2 }
 0x1b6   : > { %v2284_v3 = vsel %vm633_vm0, %v2281_v13, %v2283_v39  ;;  %v2285_v15 = vrot.slane %v7288_v37, 5  ;;  %v2218_v58 = vsel %vm994_vm3, %v2215_v33, %v2217_v45  ;;  %v2219_v36 = vrot.slane %v7288_v37, 3  ;;  %2682 = vmatpush.bf16.msra.mxu2 %v5382_v53 }
 0x1b7   : > { %v2153_v46 = vrot.slane %v7288_v37, 1  ;;  %v2152_v18 = vsel %vm8266_vm1, %v2149_v17, %v2151_v29  ;;  %v2325_v13 = vsel %vm1296_vm5, %v2322_v0, %v2324_v24  ;;  %v2326_v59 = vrot.slane %v7288_v37, 6 }
 0x1b8   : > { %v2286_v33 = vsel %vm633_vm0, %v2283_v39, %v2285_v15  ;;  %v2220_v38 = vsel %vm994_vm3, %v2217_v45, %v2219_v36  ;;  %v2246_v17 = vrot.slane %v6951_v16, 4  ;;  %v2248_v0 = vrot.slane %v6954_v61, 4  ;;  %2623 = vmatpush.bf16.msra.mxu0 %v5367_v62 }
 0x1b9   : > { %v2154_v26 = vsel %vm8266_vm1, %v2151_v29, %v2153_v46  ;;  %v5584_v2 = vpack.i.bf16 %v2286_v33, %v2284_v3  ;;  %v5594_v23 = vpack.i.bf16 %v2220_v38, %v2218_v58  ;;  %v2327_v27 = vsel %vm1296_vm5, %v2324_v24, %v2326_v59  ;;  %2652 = vmatpush.bf16.msra.mxu1 %v5375_v60 }
 0x1ba   : > { %v5589_v54 = vpack.i.bf16 %v2154_v26, %v2152_v18  ;;  %v2376_v57 = vpack.c.bf16 %v2327_v27, %v2325_v13  ;;  %v2247_v34 = vsel %vm1095_vm4, %v2245_v56, %v2246_v17  ;;  %v2249_v63 = vsel %vm1095_vm4, %v2246_v17, %v2248_v0 }
 0x1bb   : > { %5585 = vrot.lane.b32.xlu2 %v5584_v2, %s8452_s22  ;;  %5595 = vrot.lane.b32.xlu1 %v5594_v23, %s8452_s22  ;;  %v2250_v39 = vrot.slane %v7041_v1, 4  ;;  %v2252_v45 = vrot.slane %v7082_v50, 4  ;;  %v2186_v59 = vrot.slane %v7082_v50, 2  ;;  %v2256_v38 = vrot.slane %v7173_v25, 4 }
 0x1bc   : > { %5590 = vrot.lane.b32.xlu0 %v5589_v54, %s8452_s22  ;;  %4954 = vmatmul.msk.bf16.gmra.mxu3 %vm8263_vm14, %v2376_v57  ;;  %v2258_v62 = vrot.slane %v7276_v5, 4  ;;  %v2260_v60 = vrot.slane %v7288_v37, 4 }
 0x1bd   : > { %2624 = vmatpush.bf16.msra.mxu0 %v5366_v52  ;;  %2653 = vmatpush.bf16.msra.mxu1 %v5374_v42  ;;  %v2251_v36 = vsel %vm1095_vm4, %v2248_v0, %v2250_v39  ;;  %v2253_v46 = vsel %vm1095_vm4, %v2250_v39, %v2252_v45  ;;  %v2189_v52 = vsel %vm8265_vm2, %v2186_v59, %v2188_v47 }
 0x1c0   : > { %v5541_v10 = vpop.permute.xlu2 %5540 }
 0x1c1   : > { %v5543_v51 = vunpack.i.h.bf16 %v5541_v10  ;;  %v5542_v20 = vunpack.i.l.bf16 %v5541_v10 }
 0x1c3   : > { %v2353_v22 = vsel %vm8263_vm14, %v2247_v34, %v5542_v20  ;;  %v2354_v6 = vsel %vm8263_vm14, %v2249_v63, %v5543_v51 }
 0x1c4   : > { %v2363_v35 = vpack.c.bf16 %v2354_v6, %v2353_v22 }
 0x1c6   : > { %2683 = vmatmul.bf16.vlgmr.msra.gmra.mxu2 %v2363_v35 }
 0x1d9   : > { %v5551_v49 = vpop.permute.xlu1 %5550  ;;  %v5546_v11 = vpop.permute.xlu0 %5545 }
 0x1da   : > { %v5553_v40 = vunpack.i.h.bf16 %v5551_v49  ;;  %v5552_v9 = vunpack.i.l.bf16 %v5551_v49  ;;  %v5548_v30 = vunpack.i.h.bf16 %v5546_v11  ;;  %v5547_v14 = vunpack.i.l.bf16 %v5546_v11 }
 0x1dc   : > { %v2345_v21 = vsel %vm8263_vm14, %v2181_v28, %v5552_v9  ;;  %v2346_v55 = vsel %vm8263_vm14, %v2183_v19, %v5553_v40  ;;  %v2337_v29 = vsel %vm8263_vm14, %v6940_v44, %v5547_v14  ;;  %v2338_v8 = vsel %vm8263_vm14, %v6951_v16, %v5548_v30 }
 0x1dd   : > { %v2362_v12 = vpack.c.bf16 %v2346_v55, %v2345_v21  ;;  %v2361_v24 = vpack.c.bf16 %v2338_v8, %v2337_v29  ;;  %v2254_v44 = vrot.slane %v7150_v43, 4  ;;  %v2184_v16 = vrot.slane %v7041_v1, 2 }
 0x1de   : > { %v2259_v40 = vsel %vm1095_vm4, %v2256_v38, %v2258_v62  ;;  %v2261_v9 = vsel %vm1095_vm4, %v2258_v62, %v2260_v60  ;;  %v5417_v62 = vld [vmem:[%s8187_s9 + $0xb8] sm:$0xff]  ;;  %v5399_v60 = vld [vmem:[%s8187_s9 + $0x28] sm:$0xff] }
 0x1df   : > { %2654 = vmatmul.bf16.vlgmr.msra.gmra.mxu1 %v2362_v12  ;;  %2625 = vmatmul.bf16.vlgmr.msra.gmra.mxu0 %v2361_v24  ;;  %v2255_v27 = vsel %vm1095_vm4, %v2252_v45, %v2254_v44  ;;  %v2185_v0 = vsel %vm8265_vm2, %v2182_v31, %v2184_v16  ;;  %v2187_v10 = vsel %vm8265_vm2, %v2184_v16, %v2186_v59 }
 0x1e0   : > { %v2257_v63 = vsel %vm1095_vm4, %v2254_v44, %v2256_v38  ;;  %3695 = vmatpush.bf16.msrb.mxu1 %v5417_v62 }
 0x1e2   : > { %v5556_v3 = vpop.permute.xlu2 %5555 }
 0x1e3   : > { %v5558_v15 = vunpack.i.h.bf16 %v5556_v3  ;;  %v5557_v58 = vunpack.i.l.bf16 %v5556_v3 }
 0x1e5   : > { %v2355_v53 = vsel %vm8263_vm14, %v2251_v36, %v5557_v58  ;;  %v2356_v18 = vsel %vm8263_vm14, %v2253_v46, %v5558_v15  ;;  %v2192_v15 = vrot.slane %v7276_v5, 2  ;;  %v2194_v58 = vrot.slane %v7288_v37, 2 }
 0x1e6   : > { %v2367_v13 = vpack.c.bf16 %v2356_v18, %v2355_v53 }
 0x1e7   : > { %v2195_v16 = vsel %vm8265_vm2, %v2192_v15, %v2194_v58  ;;  %v5398_v58 = vld [vmem:[%s8187_s9 + $0x20] sm:$0xff] }
 0x1e8   : > { %2688 = vmatmul.bf16.gmra.mxu2 %v2367_v13 }
 0x1fb   : > { %v5566_v33 = vpop.permute.xlu1 %5565  ;;  %v5561_v23 = vpop.permute.xlu0 %5560 }
 0x1fc   : > { %v5568_v26 = vunpack.i.h.bf16 %v5566_v33  ;;  %v5567_v2 = vunpack.i.l.bf16 %v5566_v33  ;;  %v5563_v57 = vunpack.i.h.bf16 %v5561_v23  ;;  %v5562_v17 = vunpack.i.l.bf16 %v5561_v23 }
 0x1fe   : > { %v5571_v54 = vpop.permute.xlu2 %5570  ;;  %v2347_v20 = vsel %vm8263_vm14, %v2185_v0, %v5567_v2  ;;  %v2348_v34 = vsel %vm8263_vm14, %v2187_v10, %v5568_v26  ;;  %v2339_v32 = vsel %vm8263_vm14, %v6954_v61, %v5562_v17  ;;  %v2340_v4 = vsel %vm8263_vm14, %v7041_v1, %v5563_v57  ;;  %v5401_v2 = vld [vmem:[%s8187_s9 + $0x38] sm:$0xff]  ;;  %v7413_v57 = vld [vmem:[%s8453_s6] ss:$0 sm:$0xff]  ;;  %v5400_v0 = vld [vmem:[%s8187_s9 + $0x30] sm:$0xff] }
 0x1ff   : > { %v5573_v56 = vunpack.i.h.bf16 %v5571_v54  ;;  %v5572_v51 = vunpack.i.l.bf16 %v5571_v54  ;;  %v2366_v22 = vpack.c.bf16 %v2348_v34, %v2347_v20  ;;  %v2365_v48 = vpack.c.bf16 %v2340_v4, %v2339_v32  ;;  %3657 = vmatpush.bf16.msrb.mxu3 %v5401_v2  ;;  %v5409_v10 = vld [vmem:[%s8187_s9 + $0x78] sm:$0xff] }
 0x200   : > { %v2190_v61 = vrot.slane %v7173_v25, 2  ;;  %3676 = vmatpush.bf16.msrb.mxu0 %v5409_v10 }
 0x201   : > { %v2357_v6 = vsel %vm8263_vm14, %v2255_v27, %v5572_v51  ;;  %v2358_v35 = vsel %vm8263_vm14, %v2257_v63, %v5573_v56  ;;  %2659 = vmatmul.bf16.gmra.mxu1 %v2366_v22  ;;  %2630 = vmatmul.bf16.gmra.mxu0 %v2365_v48 }
 0x202   : > { %v2371_v7 = vpack.c.bf16 %v2358_v35, %v2357_v6  ;;  %v2191_v42 = vsel %vm8265_vm2, %v2188_v47, %v2190_v61  ;;  %v5408_v47 = vld [vmem:[%s8187_s9 + $0x70] sm:$0xff] }
 0x203   : > { %3658 = vmatpush.bf16.msrb.mxu3 %v5400_v0 }
 0x204   : > { %2693 = vmatmul.bf16.gmra.mxu2 %v2371_v7  ;;  %v7426_v7 = vld [vmem:[%s8185_s7] ss:$0 sm:$0xff]  ;;  %3677 = vmatpush.bf16.msrb.mxu0 %v5408_v47 }
 0x207   : > { %3659 = vmatpush.bf16.msrb.mxu3 %v5399_v60 }
 0x20b   : > { %3660 = vmatpush.bf16.msrb.mxu3 %v5398_v58  ;;  %v5397_v58 = vld [vmem:[%s8187_s9 + $0x18] sm:$0xff] }
 0x20f   : > { %3661 = vmatpush.bf16.msrb.mxu3 %v5397_v58 }
 0x215   : > { %v5586_v31 = vpop.permute.xlu2 %5585 }
 0x216   : > { %v5588_v1 = vunpack.i.h.bf16 %v5586_v31  ;;  %v5587_v49 = vunpack.i.l.bf16 %v5586_v31  ;;  %v5581_v41 = vpop.permute.xlu1 %5580 }
 0x217   : > { %v5583_v28 = vunpack.i.h.bf16 %v5581_v41  ;;  %v5582_v19 = vunpack.i.l.bf16 %v5581_v41  ;;  %v5576_v11 = vpop.permute.xlu0 %5575 }
 0x218   : > { %v5578_v21 = vunpack.i.h.bf16 %v5576_v11  ;;  %v5577_v55 = vunpack.i.l.bf16 %v5576_v11  ;;  %v2359_v30 = vsel %vm8263_vm14, %v2259_v40, %v5587_v49  ;;  %v2360_v14 = vsel %vm8263_vm14, %v2261_v9, %v5588_v1  ;;  %v7441_v1 = vld [vmem:[%s8186_s8] ss:$0 sm:$0xff] }
 0x219   : > { %v2375_v12 = vpack.c.bf16 %v2360_v14, %v2359_v30  ;;  %v2349_v39 = vsel %vm8263_vm14, %v2189_v52, %v5582_v19  ;;  %v2350_v45 = vsel %vm8263_vm14, %v2191_v42, %v5583_v28 }
 0x21a   : > { %v2341_v29 = vsel %vm8263_vm14, %v7082_v50, %v5577_v55  ;;  %v2342_v8 = vsel %vm8263_vm14, %v7150_v43, %v5578_v21  ;;  %v2370_v24 = vpack.c.bf16 %v2350_v45, %v2349_v39  ;;  %v2193_v50 = vsel %vm8265_vm2, %v2190_v61, %v2192_v15  ;;  %v5416_v15 = vld [vmem:[%s8187_s9 + $0xb0] sm:$0xff] }
 0x21b   : > { %2698 = vmatmul.bf16.gmra.mxu2 %v2375_v12  ;;  %v2369_v3 = vpack.c.bf16 %v2342_v8, %v2341_v29  ;;  %3696 = vmatpush.bf16.msrb.mxu1 %v5416_v15 }
 0x21c   : > { %2664 = vmatmul.bf16.gmra.mxu1 %v2370_v24 }
 0x21d   : > { %2635 = vmatmul.bf16.gmra.mxu0 %v2369_v3 }
 0x22d   : > { %v5596_v36 = vpop.permute.xlu1 %5595 }
 0x22e   : > { %v5598_v46 = vunpack.i.h.bf16 %v5596_v36  ;;  %v5597_v53 = vunpack.i.l.bf16 %v5596_v36  ;;  %v5591_v18 = vpop.permute.xlu0 %5590  ;;  %v5407_v36 = vld [vmem:[%s8187_s9 + $0x68] sm:$0xff] }
 0x22f   : > { %v5593_v13 = vunpack.i.h.bf16 %v5591_v18  ;;  %v5592_v44 = vunpack.i.l.bf16 %v5591_v18  ;;  %3678 = vmatpush.bf16.msrb.mxu0 %v5407_v36  ;;  %v5406_v36 = vld [vmem:[%s8187_s9 + $0x60] sm:$0xff] }
 0x230   : > { %v2351_v43 = vsel %vm8263_vm14, %v2193_v50, %v5597_v53  ;;  %v2352_v59 = vsel %vm8263_vm14, %v2195_v16, %v5598_v46 }
 0x231   : > { %v2343_v33 = vsel %vm8263_vm14, %v7173_v25, %v5592_v44  ;;  %v2344_v37 = vsel %vm8263_vm14, %v7276_v5, %v5593_v13  ;;  %v2374_v38 = vpack.c.bf16 %v2352_v59, %v2351_v43  ;;  %v2713_v25 = vpop.f32.mrf.mxu3  ;;  %vm5704_vm14 = vmmov 1  }
 0x232   : > { %v2373_v26 = vpack.c.bf16 %v2344_v37, %v2343_v33  ;;  %vm5180_vm6 = vmpackc.low %vm5704_vm14, %vm7676_vm15 }
 0x233   : > { %2669 = vmatmul.bf16.gmra.mxu1 %v2374_v38  ;;  %3679 = vmatpush.bf16.msrb.mxu0 %v5406_v36 }
 0x234   : > { %2640 = vmatmul.bf16.gmra.mxu0 %v2373_v26 }
 0x239   : > { %v2715_v4 = vpop.f32.mrf.mxu3 }
 0x241   : > { %v2718_v52 = vpop.f32.mrf.mxu3 }
 0x249   : > { %v2684_v54 = vpop.f32.mrf.mxu2  ;;  %v2720_v2 = vpop.f32.mrf.mxu3 }
 0x251   : > { %v2686_v34 = vpop.f32.mrf.mxu2 }
 0x25c   : > { %v2626_v23 = vpop.f32.mrf.mxu0  ;;  %v2655_v27 = vpop.f32.mrf.mxu1 }
 0x25d   : > { %v2627_v20 = vadd.f32 %v7413_v57, %v2626_v23 }
 0x25f   : > { %v2656_v32 = vadd.f32 %v2655_v27, %v2627_v20 }
 0x261   : > { %v2685_v6 = vadd.f32 %v2684_v54, %v2656_v32 }
 0x263   : > { %v2714_v48 = vadd.f32 %v2713_v25, %v2685_v6 }
 0x264   : > { %v2628_v17 = vpop.f32.mrf.mxu0  ;;  %v2657_v56 = vpop.f32.mrf.mxu1 }
 0x265   : > { %v2629_v5 = vadd.f32 %v7413_v57, %v2628_v17  ;;  %v2733_v31 = vmax.f32 %v2714_v48, 0.0 }
 0x267   : > { %v2658_v51 = vadd.f32 %v2657_v56, %v2629_v5  ;;  %v2745_v19 = vmul.f32 %v7426_v7, %v2733_v31 }
 0x269   : > { %v2687_v63 = vadd.f32 %v2686_v34, %v2658_v51  ;;  %v2757_v30 = vadd.f32 %v7441_v1, %v2745_v19 }
 0x26b   : > { %v2716_v22 = vadd.f32 %v2715_v4, %v2687_v63  ;;  %v2689_v28 = vpop.f32.mrf.mxu2  ;;  %v2821_v46 = vsel %vm1296_vm5, %v2757_v30, -inf  ;;  %v2773_v33 = vrot.slane %v2757_v30, 2  ;;  %v2774_v37 = vrot.slane %v2757_v30, 4 }
 0x26c   : > { %v2775_v38 = vrot.slane %v2757_v30, 6  ;;  %v2822_v26 = vrot.slane %v2821_v46, 4 }
 0x26d   : > { %v2734_v35 = vmax.f32 %v2716_v22, 0.0  ;;  %v2828_v56 = vsel %vm1296_vm5, %v2773_v33, -inf  ;;  %v7471_v51 = vsel %vm1296_vm5, %v2774_v37, -inf }
 0x26e   : > { %v7474_v20 = vsel %vm1296_vm5, %v2775_v38, -inf  ;;  %v7479_v6 = vmax.f32 %v2821_v46, %v2822_v26 }
 0x26f   : > { %v2746_v61 = vmul.f32 %v7426_v7, %v2734_v35 }
 0x271   : > { %v7444_v40 = vadd.f32 %v7441_v1, %v2746_v61 }
 0x273   : > { %v2776_v42 = vrot.slane %v7444_v40, 2  ;;  %v2777_v21 = vrot.slane %v7444_v40, 4  ;;  %v2778_v12 = vrot.slane %v7444_v40, 6  ;;  %v2691_v13 = vpop.f32.mrf.mxu2 }
 0x275   : > { %v2856_v45 = vsel %vm1296_vm5, %v2776_v42, -inf  ;;  %v2863_v29 = vsel %vm1296_vm5, %v2777_v21, -inf  ;;  %v2870_v16 = vsel %vm1296_vm5, %v2778_v12, -inf }
 0x276   : > { %v2857_v44 = vrot.slane %v2856_v45, 4  ;;  %v2864_v50 = vrot.slane %v2863_v29, 4  ;;  %v2871_v0 = vrot.slane %v2870_v16, 4 }
 0x278   : > { %v2858_v17 = vmax.f32 %v2856_v45, %v2857_v44  ;;  %v2865_v5 = vmax.f32 %v2863_v29, %v2864_v50  ;;  %v2872_v62 = vmax.f32 %v2870_v16, %v2871_v0  ;;  %v5425_v45 = vld [vmem:[%s8187_s9 + $0xf8] sm:$0xff] }
 0x279   : > { %3714 = vmatpush.bf16.msrb.mxu2 %v5425_v45 }
 0x27a   : > { %v2859_v35 = vrot.slane %v2858_v17, 2  ;;  %v2866_v48 = vrot.slane %v2865_v5, 2  ;;  %v2873_v21 = vrot.slane %v2872_v62, 2 }
 0x27c   : > { %v2867_v42 = vmax.f32 %v2865_v5, %v2866_v48 }
 0x27e   : > { %v2631_v49 = vpop.f32.mrf.mxu0  ;;  %v2660_v41 = vpop.f32.mrf.mxu1 }
 0x27f   : > { %v2632_v9 = vadd.f32 %v7413_v57, %v2631_v49 }
 0x281   : > { %v2661_v11 = vadd.f32 %v2660_v41, %v2632_v9  ;;  %v2829_v41 = vrot.slane %v2828_v56, 4  ;;  %v2836_v9 = vrot.slane %v7471_v51, 4 }
 0x283   : > { %v2690_v55 = vadd.f32 %v2689_v28, %v2661_v11  ;;  %v2843_v28 = vrot.slane %v7474_v20, 4  ;;  %v2824_v11 = vrot.slane %v7479_v6, 2  ;;  %v7502_v50 = vmax.f32 %v2828_v56, %v2829_v41  ;;  %v5414_v41 = vld [vmem:[%s8187_s9 + $0xa0] sm:$0xff] }
 0x285   : > { %v2719_v14 = vadd.f32 %v2718_v52, %v2690_v55  ;;  %v2860_v52 = vmax.f32 %v2858_v17, %v2859_v35  ;;  %v2723_v17 = vpop.f32.mrf.mxu3 }
 0x286   : > { %v2633_v39 = vpop.f32.mrf.mxu0  ;;  %v2662_v3 = vpop.f32.mrf.mxu1 }
 0x287   : > { %v2735_v8 = vmax.f32 %v2719_v14, 0.0  ;;  %v2634_v24 = vadd.f32 %v7413_v57, %v2633_v39  ;;  %v5415_v39 = vld [vmem:[%s8187_s9 + $0xa8] sm:$0xff]  ;;  %v2861_v16 = vrot.slane %v2860_v52, 1  ;;  %v2694_v33 = vpop.f32.mrf.mxu2 }
 0x288   : > { %3697 = vmatpush.bf16.msrb.mxu1 %v5415_v39  ;;  %v7524_v39 = vsel %vm1296_vm5, %v7444_v40, -inf }
 0x289   : > { %v2747_v53 = vmul.f32 %v7426_v7, %v2735_v8  ;;  %v2663_v18 = vadd.f32 %v2662_v3, %v2634_v24 }
 0x28b   : > { %v2759_v43 = vadd.f32 %v7441_v1, %v2747_v53  ;;  %v2692_v59 = vadd.f32 %v2691_v13, %v2663_v18 }
 0x28c   : > { %3698 = vmatpush.bf16.msrb.mxu1 %v5414_v41 }
 0x28d   : > { %v2779_v23 = vrot.slane %v2759_v43, 2  ;;  %v2780_v27 = vrot.slane %v2759_v43, 4  ;;  %v2781_v54 = vrot.slane %v2759_v43, 6  ;;  %v2877_v25 = vsel %vm1296_vm5, %v2759_v43, -inf }
 0x28e   : > { %v2721_v10 = vadd.f32 %v2720_v2, %v2692_v59  ;;  %v2878_v34 = vrot.slane %v2877_v25, 4  ;;  %v2868_v43 = vrot.slane %v2867_v42, 1  ;;  %v2874_v59 = vmax.f32 %v2872_v62, %v2873_v21 }
 0x28f   : > { %v2884_v63 = vsel %vm1296_vm5, %v2779_v23, -inf  ;;  %v2891_v32 = vsel %vm1296_vm5, %v2780_v27, -inf  ;;  %v2898_v4 = vsel %vm1296_vm5, %v2781_v54, -inf }
 0x290   : > { %v2736_v22 = vmax.f32 %v2721_v10, 0.0  ;;  %v2879_v47 = vmax.f32 %v2877_v25, %v2878_v34  ;;  %v2885_v61 = vrot.slane %v2884_v63, 4  ;;  %v2892_v31 = vrot.slane %v2891_v32, 4 }
 0x291   : > { %v2899_v49 = vrot.slane %v2898_v4, 4  ;;  %v2862_v34 = vmax.f32 %v2860_v52, %v2861_v16  ;;  %v5424_v52 = vld [vmem:[%s8187_s9 + $0xf0] sm:$0xff]  ;;  %v7531_v16 = vmax.f32 %v7479_v6, %v2824_v11 }
 0x292   : > { %v2748_v60 = vmul.f32 %v7426_v7, %v2736_v22  ;;  %v2880_v29 = vrot.slane %v2879_v47, 2  ;;  %v2886_v8 = vmax.f32 %v2884_v63, %v2885_v61  ;;  %v2893_v24 = vmax.f32 %v2891_v32, %v2892_v31  ;;  %3715 = vmatpush.bf16.msrb.mxu2 %v5424_v52 }
 0x293   : > { %v2900_v3 = vmax.f32 %v2898_v4, %v2899_v49  ;;  %v2869_v63 = vmax.f32 %v2867_v42, %v2868_v43  ;;  %v2875_v32 = vrot.slane %v2874_v59, 1  ;;  %v2831_v43 = vrot.slane %v7502_v50, 2 }
 0x294   : > { %v2760_v19 = vadd.f32 %v7441_v1, %v2748_v60  ;;  %v2881_v23 = vmax.f32 %v2879_v47, %v2880_v29  ;;  %v2887_v27 = vrot.slane %v2886_v8, 2  ;;  %v2894_v54 = vrot.slane %v2893_v24, 2 }
 0x295   : > { %v2901_v5 = vrot.slane %v2900_v3, 2  ;;  %v3081_v36 = vsel %vm2071_vm11, %v2869_v63, %v2862_v34 }
 0x296   : > { %v2782_v55 = vrot.slane %v2760_v19, 2  ;;  %v2783_v30 = vrot.slane %v2760_v19, 4  ;;  %v2784_v14 = vrot.slane %v2760_v19, 6  ;;  %v2905_v12 = vsel %vm1296_vm5, %v2760_v19, -inf  ;;  %v5396_v19 = vld [vmem:[%s8187_s9 + $0x10] sm:$0xff] }
 0x297   : > { %v2906_v46 = vrot.slane %v2905_v12, 4  ;;  %v2882_v60 = vrot.slane %v2881_v23, 1  ;;  %v2888_v61 = vmax.f32 %v2886_v8, %v2887_v27  ;;  %v2895_v47 = vmax.f32 %v2893_v24, %v2894_v54  ;;  %3662 = vmatpush.bf16.msrb.mxu3 %v5396_v19 }
 0x298   : > { %v2912_v53 = vsel %vm1296_vm5, %v2782_v55, -inf  ;;  %v2919_v18 = vsel %vm1296_vm5, %v2783_v30, -inf  ;;  %v2926_v13 = vsel %vm1296_vm5, %v2784_v14, -inf  ;;  %v2902_v42 = vmax.f32 %v2900_v3, %v2901_v5  ;;  %v5405_v14 = vld [vmem:[%s8187_s9 + $0x58] sm:$0xff] }
 0x299   : > { %v2665_v44 = vpop.f32.mrf.mxu1  ;;  %v2907_v37 = vmax.f32 %v2905_v12, %v2906_v46  ;;  %v2913_v38 = vrot.slane %v2912_v53, 4  ;;  %v2920_v26 = vrot.slane %v2919_v18, 4  ;;  %v2927_v2 = vrot.slane %v2926_v13, 4  ;;  %3680 = vmatpush.bf16.msrb.mxu0 %v5405_v14 }
 0x29a   : > { %v2636_v15 = vpop.f32.mrf.mxu0  ;;  %v7520_v12 = vmax.f32 %v7471_v51, %v2836_v9  ;;  %v2876_v8 = vmax.f32 %v2874_v59, %v2875_v32  ;;  %v2889_v51 = vrot.slane %v2888_v61, 1  ;;  %v2896_v40 = vrot.slane %v2895_v47, 1 }
 0x29b   : > { %v2637_v25 = vadd.f32 %v7413_v57, %v2636_v15  ;;  %v2914_v0 = vmax.f32 %v2912_v53, %v2913_v38  ;;  %v2921_v10 = vmax.f32 %v2919_v18, %v2920_v26  ;;  %v2928_v56 = vmax.f32 %v2926_v13, %v2927_v2  ;;  %v2696_v13 = vpop.f32.mrf.mxu2 }
 0x29c   : > { %v2908_v22 = vrot.slane %v2907_v37, 2  ;;  %v2883_v53 = vmax.f32 %v2881_v23, %v2882_v60  ;;  %v2903_v18 = vrot.slane %v2902_v42, 1  ;;  %v2850_v38 = vrot.slane %v7524_v39, 4 }
 0x29d   : > { %v2666_v4 = vadd.f32 %v2665_v44, %v2637_v25  ;;  %v2915_v35 = vrot.slane %v2914_v0, 2  ;;  %v2922_v48 = vrot.slane %v2921_v10, 2  ;;  %v2929_v62 = vrot.slane %v2928_v56, 2 }
 0x29e   : > { %v2909_v24 = vmax.f32 %v2907_v37, %v2908_v22  ;;  %v2725_v37 = vpop.f32.mrf.mxu3  ;;  %v3082_v27 = vsel %vm2073_vm12, %v2876_v8, %v3081_v36  ;;  %v7537_v54 = vmax.f32 %v2888_v61, %v2889_v51  ;;  %v7540_v6 = vmax.f32 %v2895_v47, %v2896_v40  ;;  %v5395_v40 = vld [vmem:[%s8187_s9 + $0x8] sm:$0xff] }
 0x29f   : > { %v2695_v31 = vadd.f32 %v2694_v33, %v2666_v4  ;;  %v2916_v21 = vmax.f32 %v2914_v0, %v2915_v35  ;;  %v2923_v55 = vmax.f32 %v2921_v10, %v2922_v48  ;;  %v2930_v30 = vmax.f32 %v2928_v56, %v2929_v62  ;;  %3663 = vmatpush.bf16.msrb.mxu3 %v5395_v40 }
 0x2a0   : > { %v2910_v26 = vrot.slane %v2909_v24, 1  ;;  %v7542_v11 = vmax.f32 %v2902_v42, %v2903_v18  ;;  %v7545_v5 = vsel %vm2075_vm13, %v2883_v53, %v3082_v27  ;;  %v2838_v61 = vrot.slane %v7520_v12, 2  ;;  %v5413_v18 = vld [vmem:[%s8187_s9 + $0x98] sm:$0xff] }
 0x2a1   : > { %v2724_v45 = vadd.f32 %v2723_v17, %v2695_v31  ;;  %v2917_v3 = vrot.slane %v2916_v21, 1  ;;  %v2924_v15 = vrot.slane %v2923_v55, 1  ;;  %v2667_v58 = vpop.f32.mrf.mxu1  ;;  %v2931_v44 = vrot.slane %v2930_v30, 1  ;;  %3699 = vmatpush.bf16.msrb.mxu1 %v5413_v18 }
 0x2a2   : > { %v2638_v49 = vpop.f32.mrf.mxu0  ;;  %v7548_v32 = vmax.f32 %v2909_v24, %v2910_v26  ;;  %v2826_v42 = vrot.slane %v7531_v16, 1 }
 0x2a3   : > { %v2639_v29 = vadd.f32 %v7413_v57, %v2638_v49  ;;  %v2737_v9 = vmax.f32 %v2724_v45, 0.0  ;;  %v2918_v2 = vmax.f32 %v2916_v21, %v2917_v3  ;;  %v2925_v23 = vmax.f32 %v2923_v55, %v2924_v15 }
 0x2a4   : > { %v2932_v0 = vmax.f32 %v2930_v30, %v2931_v44  ;;  %v7563_v21 = vmax.f32 %v7474_v20, %v2843_v28  ;;  %v2832_v3 = vmax.f32 %v7502_v50, %v2831_v43  ;;  %v2839_v15 = vmax.f32 %v7520_v12, %v2838_v61  ;;  %v5423_v43 = vld [vmem:[%s8187_s9 + $0xe8] sm:$0xff] }
 0x2a5   : > { %v2668_v46 = vadd.f32 %v2667_v58, %v2639_v29  ;;  %v2749_v59 = vmul.f32 %v7426_v7, %v2737_v9  ;;  %v3088_v4 = vsel %vm2071_vm11, %v2925_v23, %v2918_v2  ;;  %v5394_v23 = vld [vmem:[%s8187_s9] sm:$0xff]  ;;  %3716 = vmatpush.bf16.msrb.mxu2 %v5423_v43  ;;  %v5420_v43 = vld [vmem:[%s8187_s9 + $0xd0] sm:$0xff] }
 0x2a6   : > { %v7556_v19 = vsel %vm2073_vm12, %v2932_v0, %v3088_v4  ;;  %v2833_v0 = vrot.slane %v2832_v3, 1  ;;  %3664 = vmatpush.bf16.msrb.mxu3 %v5394_v23  ;;  %v5433_v23 = vld [vmem:[%s8187_s9 + $0x138] sm:$0xff] }
 0x2a7   : > { %v2697_v33 = vadd.f32 %v2696_v13, %v2668_v46  ;;  %v2761_v25 = vadd.f32 %v7441_v1, %v2749_v59  ;;  %v5404_v59 = vld [vmem:[%s8187_s9 + $0x50] sm:$0xff] }
 0x2a8   : > { %3681 = vmatpush.bf16.msrb.mxu0 %v5404_v59  ;;  %v5411_v59 = vld [vmem:[%s8187_s9 + $0x88] sm:$0xff] }
 0x2a9   : > { %v2726_v17 = vadd.f32 %v2725_v37, %v2697_v33  ;;  %v2785_v10 = vrot.slane %v2761_v25, 2  ;;  %v2786_v56 = vrot.slane %v2761_v25, 4  ;;  %v2787_v34 = vrot.slane %v2761_v25, 6 }
 0x2aa   : > { %v2933_v63 = vsel %vm1296_vm5, %v2761_v25, -inf  ;;  %3733 = vmatpush.bf16.msra.mxu3 %v5433_v23 }
 0x2ab   : > { %v2934_v22 = vrot.slane %v2933_v63, 4  ;;  %v2738_v35 = vmax.f32 %v2726_v17, 0.0  ;;  %v2940_v48 = vsel %vm1296_vm5, %v2785_v10, -inf  ;;  %v2947_v62 = vsel %vm1296_vm5, %v2786_v56, -inf  ;;  %v5422_v10 = vld [vmem:[%s8187_s9 + $0xe0] sm:$0xff] }
 0x2ac   : > { %v2954_v60 = vsel %vm1296_vm5, %v2787_v34, -inf  ;;  %v2941_v31 = vrot.slane %v2940_v48, 4  ;;  %v2948_v49 = vrot.slane %v2947_v62, 4  ;;  %v2827_v17 = vmax.f32 %v7531_v16, %v2826_v42  ;;  %3717 = vmatpush.bf16.msrb.mxu2 %v5422_v10  ;;  %v5441_v10 = vld [vmem:[%s8187_s9 + $0x178] sm:$0xff] }
 0x2ad   : > { %v2935_v47 = vmax.f32 %v2933_v63, %v2934_v22  ;;  %v2955_v41 = vrot.slane %v2954_v60, 4  ;;  %v2750_v52 = vmul.f32 %v7426_v7, %v2738_v35  ;;  %v2845_v42 = vrot.slane %v7563_v21, 2 }
 0x2ae   : > { %v2942_v30 = vmax.f32 %v2940_v48, %v2941_v31  ;;  %v2949_v14 = vmax.f32 %v2947_v62, %v2948_v49 }
 0x2af   : > { %v2936_v55 = vrot.slane %v2935_v47, 2  ;;  %v2956_v45 = vmax.f32 %v2954_v60, %v2955_v41  ;;  %v2762_v8 = vadd.f32 %v7441_v1, %v2750_v52  ;;  %v2834_v41 = vmax.f32 %v2832_v3, %v2833_v0 }
 0x2b0   : > { %v2943_v36 = vrot.slane %v2942_v30, 2  ;;  %v2950_v51 = vrot.slane %v2949_v14, 2  ;;  %v2670_v31 = vpop.f32.mrf.mxu1  ;;  %v2840_v52 = vrot.slane %v2839_v15, 1  ;;  %v3084_v0 = vsel %vm2063_vm7, %v7537_v54, %v7545_v5 }
 0x2b1   : > { %v2641_v29 = vpop.f32.mrf.mxu0  ;;  %v2937_v58 = vmax.f32 %v2935_v47, %v2936_v55  ;;  %v2957_v9 = vrot.slane %v2956_v45, 2  ;;  %v2788_v46 = vrot.slane %v2762_v8, 2  ;;  %v2789_v20 = vrot.slane %v2762_v8, 4  ;;  %v2699_v55 = vpop.f32.mrf.mxu2 }
 0x2b2   : > { %v2642_v24 = vadd.f32 %v7413_v57, %v2641_v29  ;;  %v2790_v28 = vrot.slane %v2762_v8, 6  ;;  %v2961_v53 = vsel %vm1296_vm5, %v2762_v8, -inf  ;;  %v2944_v13 = vmax.f32 %v2942_v30, %v2943_v36 }
 0x2b3   : > { %v2938_v50 = vrot.slane %v2937_v58, 1  ;;  %v2951_v12 = vmax.f32 %v2949_v14, %v2950_v51  ;;  %v2958_v44 = vmax.f32 %v2956_v45, %v2957_v9  ;;  %v2962_v33 = vrot.slane %v2961_v53, 4  ;;  %v2728_v9 = vpop.f32.mrf.mxu3 }
 0x2b4   : > { %v2968_v37 = vsel %vm1296_vm5, %v2788_v46, -inf  ;;  %v2975_v26 = vsel %vm1296_vm5, %v2789_v20, -inf  ;;  %v2982_v2 = vsel %vm1296_vm5, %v2790_v28, -inf  ;;  %v2945_v27 = vrot.slane %v2944_v13, 1  ;;  %v5412_v28 = vld [vmem:[%s8187_s9 + $0x90] sm:$0xff] }
 0x2b5   : > { %v2952_v25 = vrot.slane %v2951_v12, 1  ;;  %v2963_v56 = vmax.f32 %v2961_v53, %v2962_v33  ;;  %v2969_v34 = vrot.slane %v2968_v37, 4  ;;  %v2976_v63 = vrot.slane %v2975_v26, 4  ;;  %3700 = vmatpush.bf16.msrb.mxu1 %v5412_v28 }
 0x2b6   : > { %v2983_v4 = vrot.slane %v2982_v2, 4  ;;  %v2939_v22 = vmax.f32 %v2937_v58, %v2938_v50  ;;  %v7592_v35 = vmax.f32 %v2944_v13, %v2945_v27  ;;  %v2959_v62 = vrot.slane %v2958_v44, 1 }
 0x2b7   : > { %v7594_v48 = vmax.f32 %v2951_v12, %v2952_v25  ;;  %v2964_v60 = vrot.slane %v2963_v56, 2  ;;  %v2970_v61 = vmax.f32 %v2968_v37, %v2969_v34  ;;  %v2977_v47 = vmax.f32 %v2975_v26, %v2976_v63 }
 0x2b8   : > { %v2984_v16 = vmax.f32 %v2982_v2, %v2983_v4  ;;  %v2671_v49 = vadd.f32 %v2670_v31, %v2642_v24  ;;  %v2841_v58 = vmax.f32 %v2839_v15, %v2840_v52  ;;  %v2846_v36 = vmax.f32 %v7563_v21, %v2845_v42  ;;  %v5421_v15 = vld [vmem:[%s8187_s9 + $0xd8] sm:$0xff]  ;;  %v5403_v21 = vld [vmem:[%s8187_s9 + $0x48] sm:$0xff] }
 0x2b9   : > { %v2965_v30 = vmax.f32 %v2963_v56, %v2964_v60  ;;  %v2971_v14 = vrot.slane %v2970_v61, 2  ;;  %v2978_v45 = vrot.slane %v2977_v47, 2  ;;  %v2851_v51 = vmax.f32 %v7524_v39, %v2850_v38  ;;  %3718 = vmatpush.bf16.msrb.mxu2 %v5421_v15  ;;  %v2643_v2 = vpop.f32.mrf.mxu0  ;;  %3682 = vmatpush.bf16.msrb.mxu0 %v5403_v21  ;;  %v5449_v31 = vld [vmem:[%s8187_s9 + $0x1b8] sm:$0xff]  ;;  %v2701_v42 = vpop.f32.mrf.mxu2  ;;  %v5448_v21 = vld [vmem:[%s8187_s9 + $0x1b0] sm:$0xff] }
 0x2ba   : > { %v2985_v29 = vrot.slane %v2984_v16, 2  ;;  %v2700_v8 = vadd.f32 %v2699_v55, %v2671_v49  ;;  %v2847_v38 = vrot.slane %v2846_v36, 1  ;;  %v3077_v40 = vsel %vm2063_vm7, %v2834_v41, %v2827_v17  ;;  %3701 = vmatpush.bf16.msrb.mxu1 %v5411_v59 }
 0x2bb   : > { %v2966_v24 = vrot.slane %v2965_v30, 1  ;;  %v2972_v3 = vmax.f32 %v2970_v61, %v2971_v14  ;;  %v7601_v46 = vmax.f32 %v2977_v47, %v2978_v45  ;;  %v2852_v53 = vrot.slane %v2851_v51, 2 }
 0x2bc   : > { %v7603_v20 = vmax.f32 %v2984_v16, %v2985_v29  ;;  %v2729_v39 = vadd.f32 %v2728_v9, %v2700_v8  ;;  %v2960_v18 = vmax.f32 %v2958_v44, %v2959_v62  ;;  %v3090_v50 = vsel %vm2075_vm13, %v2939_v22, %v7556_v19  ;;  %v5402_v19 = vld [vmem:[%s8187_s9 + $0x40] sm:$0xff]  ;;  %v5432_v22 = vld [vmem:[%s8187_s9 + $0x130] sm:$0xff]  ;;  %v5419_v62 = vld [vmem:[%s8187_s9 + $0xc8] sm:$0xff] }
 0x2bd   : > { %v2967_v13 = vmax.f32 %v2965_v30, %v2966_v24  ;;  %v2973_v12 = vrot.slane %v2972_v3, 1  ;;  %v2848_v37 = vmax.f32 %v2846_v36, %v2847_v38  ;;  %v2853_v26 = vmax.f32 %v2851_v51, %v2852_v53  ;;  %3719 = vmatpush.bf16.msrb.mxu2 %v5420_v43  ;;  %3683 = vmatpush.bf16.msrb.mxu0 %v5402_v19  ;;  %v5431_v29 = vld [vmem:[%s8187_s9 + $0x128] sm:$0xff]  ;;  %v5418_v51 = vld [vmem:[%s8187_s9 + $0xc0] sm:$0xff] }
 0x2be   : > { %v2739_v33 = vmax.f32 %v2729_v39, 0.0  ;;  %v3078_v44 = vsel %vm2065_vm8, %v2841_v58, %v3077_v40  ;;  %v2980_v25 = vrot.slane %v7601_v46, 1  ;;  %v2987_v17 = vrot.slane %v7603_v20, 1  ;;  %3734 = vmatpush.bf16.msra.mxu3 %v5432_v22  ;;  %v2730_v39 = vpop.f32.mrf.mxu3 }
 0x2bf   : > { %v7630_v27 = vmax.f32 %v2972_v3, %v2973_v12  ;;  %v2854_v34 = vrot.slane %v2853_v26, 1  ;;  %v3079_v63 = vsel %vm2067_vm9, %v2848_v37, %v3078_v44  ;;  %v3085_v4 = vsel %vm2065_vm8, %v7540_v6, %v3084_v0  ;;  %v5410_v6 = vld [vmem:[%s8187_s9 + $0x80] sm:$0xff] }
 0x2c0   : > { %v2751_v56 = vmul.f32 %v7426_v7, %v2739_v33  ;;  %v3086_v54 = vsel %vm2067_vm9, %v7542_v11, %v3085_v4  ;;  %v2644_v5 = vadd.f32 %v7413_v57, %v2643_v2  ;;  %v3091_v60 = vsel %vm2063_vm7, %v7592_v35, %v3090_v50  ;;  %v2672_v57 = vpop.f32.mrf.mxu1  ;;  %3702 = vmatpush.bf16.msrb.mxu1 %v5410_v6  ;;  %v5439_v50 = vld [vmem:[%s8187_s9 + $0x168] sm:$0xff]  ;;  %v5430_v33 = vld [vmem:[%s8187_s9 + $0x120] sm:$0xff] }
 0x2c1   : > { %v2855_v47 = vmax.f32 %v2853_v26, %v2854_v34  ;;  %v7661_v11 = vsel %vm2069_vm10, %v7548_v32, %v3086_v54  ;;  %v3092_v16 = vsel %vm2065_vm8, %v7594_v48, %v3091_v60  ;;  %3752 = vmatpush.bf16.msra.mxu0 %v5441_v10  ;;  %v5440_v32 = vld [vmem:[%s8187_s9 + $0x170] sm:$0xff]  ;;  %3720 = vmatpush.bf16.msrb.mxu2 %v5419_v62  ;;  %v5438_v54 = vld [vmem:[%s8187_s9 + $0x160] sm:$0xff] }
 0x2c2   : > { %v2763_v61 = vadd.f32 %v7441_v1, %v2751_v56  ;;  %v2673_v49 = vadd.f32 %v2672_v57, %v2644_v5  ;;  %v3093_v41 = vsel %vm2067_vm9, %v2960_v18, %v3092_v16  ;;  %v3114_v35 = vrot.slane %v7661_v11, 1  ;;  %3735 = vmatpush.bf16.msra.mxu3 %v5431_v29  ;;  %v5447_v56 = vld [vmem:[%s8187_s9 + $0x1a8] sm:$0xff] }
 0x2c3   : > { %v3127_v52 = vrot.slane %v7661_v11, 2  ;;  %v3080_v58 = vsel %vm2069_vm10, %v2855_v47, %v3079_v63  ;;  %v7688_v9 = vsel %vm2069_vm10, %v2967_v13, %v3093_v41  ;;  %v2981_v5 = vmax.f32 %v7601_v46, %v2980_v25 }
 0x2c4   : > { %v2791_v55 = vrot.slane %v2763_v61, 2  ;;  %v2792_v30 = vrot.slane %v2763_v61, 4  ;;  %v2793_v48 = vrot.slane %v2763_v61, 6  ;;  %v2989_v14 = vsel %vm1296_vm5, %v2763_v61, -inf  ;;  %3771 = vmatpush.bf16.msra.mxu1 %v5449_v31  ;;  %v5429_v61 = vld [vmem:[%s8187_s9 + $0x118] sm:$0xff] }
 0x2c5   : > { %v2990_v8 = vrot.slane %v2989_v14, 4  ;;  %v2702_v36 = vadd.f32 %v2701_v42, %v2673_v49  ;;  %v7694_v15 = vsel %vm633_vm0, 0.0, %v3080_v58  ;;  %3753 = vmatpush.bf16.msra.mxu0 %v5440_v32  ;;  %v5181_v13 = vpack.c.bf16 %v7661_v11, %v3080_v58  ;;  %3721 = vmatpush.bf16.msrb.mxu2 %v5418_v51 }
 0x2c6   : > { %v2996_v24 = vsel %vm1296_vm5, %v2791_v55, -inf  ;;  %v3003_v3 = vsel %vm1296_vm5, %v2792_v30, -inf  ;;  %v3010_v28 = vsel %vm1296_vm5, %v2793_v48, -inf  ;;  %v3113_v43 = vrot.slane %v7694_v15, 1  ;;  %3736 = vmatpush.bf16.msra.mxu3 %v5430_v33  ;;  %v5428_v30 = vld [vmem:[%s8187_s9 + $0x110] sm:$0xff] }
 0x2c7   : > { %v2991_v38 = vmax.f32 %v2989_v14, %v2990_v8  ;;  %v2997_v53 = vrot.slane %v2996_v24, 4  ;;  %v3004_v40 = vrot.slane %v3003_v3, 4  ;;  %v3011_v18 = vrot.slane %v3010_v28, 4  ;;  %5182 = vmatmul.msk.bf16.vlgmr.msrb.gmra.mxu3 %vm5180_vm6, %v5181_v13  ;;  %v5427_v13 = vld [vmem:[%s8187_s9 + $0x108] sm:$0xff] }
 0x2c8   : > { %v2731_v12 = vadd.f32 %v2730_v39, %v2702_v36  ;;  %v3116_v59 = vrot.slane %v7688_v9, 1  ;;  %v3115_v23 = vsel %vm8266_vm1, %v3113_v43, %v3114_v35  ;;  %v3126_v10 = vrot.slane %v7694_v15, 2  ;;  %3772 = vmatpush.bf16.msra.mxu1 %v5448_v21 }
 0x2c9   : > { %v2992_v37 = vrot.slane %v2991_v38, 2  ;;  %v2998_v26 = vmax.f32 %v2996_v24, %v2997_v53  ;;  %v3005_v44 = vmax.f32 %v3003_v3, %v3004_v40  ;;  %v3012_v2 = vmax.f32 %v3010_v28, %v3011_v18  ;;  %3754 = vmatpush.bf16.msra.mxu0 %v5439_v50  ;;  %v5445_v24 = vld [vmem:[%s8187_s9 + $0x198] sm:$0xff] }
 0x2ca   : > { %v2740_v19 = vmax.f32 %v2731_v12, 0.0  ;;  %v3117_v0 = vsel %vm8266_vm1, %v3114_v35, %v3116_v59  ;;  %v3129_v60 = vrot.slane %v7688_v9, 2  ;;  %v2988_v47 = vmax.f32 %v7603_v20, %v2987_v17  ;;  %v5446_v20 = vld [vmem:[%s8187_s9 + $0x1a0] sm:$0xff]  ;;  %3737 = vmatpush.bf16.msra.mxu3 %v5429_v61 }
 0x2cb   : > { %v2993_v34 = vmax.f32 %v2991_v38, %v2992_v37  ;;  %v2999_v63 = vrot.slane %v2998_v26, 2  ;;  %v3006_v4 = vrot.slane %v3005_v44, 2  ;;  %v3013_v22 = vrot.slane %v3012_v2, 2  ;;  %v5436_v38 = vld [vmem:[%s8187_s9 + $0x150] sm:$0xff] }
 0x2cc   : > { %v2752_v62 = vmul.f32 %v7426_v7, %v2740_v19  ;;  %v3192_v6 = vpack.c.bf16 %v3117_v0, %v3115_v23  ;;  %v3128_v46 = vsel %vm8265_vm2, %v3126_v10, %v3127_v52  ;;  %v3130_v31 = vsel %vm8265_vm2, %v3127_v52, %v3129_v60  ;;  %3773 = vmatpush.bf16.msra.mxu1 %v5447_v56  ;;  %v5444_v23 = vld [vmem:[%s8187_s9 + $0x190] sm:$0xff] }
 0x2cd   : > { %v2994_v57 = vrot.slane %v2993_v34, 1  ;;  %v3000_v16 = vmax.f32 %v2998_v26, %v2999_v63  ;;  %v3007_v25 = vmax.f32 %v3005_v44, %v3006_v4  ;;  %v3014_v49 = vmax.f32 %v3012_v2, %v3013_v22  ;;  %3755 = vmatpush.bf16.msra.mxu0 %v5438_v54  ;;  %v5426_v4 = vld [vmem:[%s8187_s9 + $0x100] sm:$0xff] }
 0x2ce   : > { %v2764_v7 = vadd.f32 %v7441_v1, %v2752_v62  ;;  %3684 = vmatmul.bf16.vlgmr.msrb.gmra.mxu0 %v3192_v6  ;;  %v3193_v41 = vpack.c.bf16 %v3130_v31, %v3128_v46  ;;  %v3140_v35 = vrot.slane %v7661_v11, 3  ;;  %v5437_v1 = vld [vmem:[%s8187_s9 + $0x158] sm:$0xff]  ;;  %v3139_v45 = vrot.slane %v7694_v15, 3  ;;  %3738 = vmatpush.bf16.msra.mxu3 %v5428_v30 }
 0x2cf   : > { %v3001_v17 = vrot.slane %v3000_v16, 1  ;;  %v2995_v48 = vmax.f32 %v2993_v34, %v2994_v57  ;;  %v3142_v29 = vrot.slane %v7688_v9, 3  ;;  %v3008_v8 = vrot.slane %v3007_v25, 1  ;;  %v5435_v34 = vld [vmem:[%s8187_s9 + $0x148] sm:$0xff] }
 0x2d0   : > { %v2794_v32 = vrot.slane %v2764_v7, 2  ;;  %v2795_v42 = vrot.slane %v2764_v7, 4  ;;  %v2796_v55 = vrot.slane %v2764_v7, 6  ;;  %v3017_v52 = vsel %vm1296_vm5, %v2764_v7, -inf  ;;  %3703 = vmatmul.bf16.vlgmr.msrb.gmra.mxu1 %v3193_v41  ;;  %v5434_v7 = vld [vmem:[%s8187_s9 + $0x140] sm:$0xff] }
 0x2d1   : > { %v3018_v14 = vrot.slane %v3017_v52, 4  ;;  %3774 = vmatpush.bf16.msra.mxu1 %v5446_v20  ;;  %3756 = vmatpush.bf16.msra.mxu0 %v5437_v1  ;;  %v3002_v53 = vmax.f32 %v3000_v16, %v3001_v17  ;;  %v3141_v40 = vsel %vm994_vm3, %v3139_v45, %v3140_v35  ;;  %v3143_v18 = vsel %vm994_vm3, %v3140_v35, %v3142_v29 }
 0x2d2   : > { %v3024_v58 = vsel %vm1296_vm5, %v2794_v32, -inf  ;;  %v3031_v36 = vsel %vm1296_vm5, %v2795_v42, -inf  ;;  %v3038_v51 = vsel %vm1296_vm5, %v2796_v55, -inf  ;;  %v3095_v50 = vsel %vm2071_vm11, %v2981_v5, %v7630_v27  ;;  %3739 = vmatpush.bf16.msra.mxu3 %v5427_v13  ;;  %v5442_v32 = vld [vmem:[%s8187_s9 + $0x180] sm:$0xff] }
 0x2d3   : > { %v3019_v3 = vmax.f32 %v3017_v52, %v3018_v14  ;;  %v3025_v28 = vrot.slane %v3024_v58, 4  ;;  %v3032_v21 = vrot.slane %v3031_v36, 4  ;;  %v3039_v39 = vrot.slane %v3038_v51, 4 }
 0x2d4   : > { %v3194_v26 = vpack.c.bf16 %v3143_v18, %v3141_v40  ;;  %v3009_v44 = vmax.f32 %v3007_v25, %v3008_v8  ;;  %v3015_v2 = vrot.slane %v3014_v49, 1  ;;  %v3096_v19 = vsel %vm2073_vm12, %v2988_v47, %v3095_v50  ;;  %v5443_v47 = vld [vmem:[%s8187_s9 + $0x188] sm:$0xff] }
 0x2d5   : > { %v3020_v12 = vrot.slane %v3019_v3, 2  ;;  %v3026_v43 = vmax.f32 %v3024_v58, %v3025_v28  ;;  %v3033_v33 = vmax.f32 %v3031_v36, %v3032_v21  ;;  %v3040_v37 = vmax.f32 %v3038_v51, %v3039_v39  ;;  %3775 = vmatpush.bf16.msra.mxu1 %v5445_v24  ;;  %3757 = vmatpush.bf16.msra.mxu0 %v5436_v38 }
 0x2d6   : > { %3722 = vmatmul.bf16.vlgmr.msrb.gmra.mxu2 %v3194_v26  ;;  %v3097_v63 = vsel %vm2075_vm13, %v2995_v48, %v3096_v19  ;;  %v3016_v6 = vmax.f32 %v3014_v49, %v3015_v2  ;;  %3740 = vmatpush.bf16.msra.mxu3 %v5426_v4  ;;  %v3152_v40 = vrot.slane %v7694_v15, 4  ;;  %vm8456_vm6 = vcmask 517120  }
 0x2d7   : > { %v3021_v27 = vmax.f32 %v3019_v3, %v3020_v12  ;;  %v3027_v0 = vrot.slane %v3026_v43, 2  ;;  %v3034_v10 = vrot.slane %v3033_v33, 2  ;;  %v3041_v56 = vrot.slane %v3040_v37, 2  ;;  %vm8457_vm14 = vmmov %vm8456_vm6 }
 0x2d8   : > { %v3098_v61 = vsel %vm2063_vm7, %v3002_v53, %v3097_v63  ;;  %v3181_v12 = vrot.slane %v7688_v9, 6  ;;  %vm8458_vm15 = vmmov %vm8456_vm6 }
 0x2d9   : > { %v3028_v22 = vmax.f32 %v3026_v43, %v3027_v0  ;;  %v3035_v54 = vmax.f32 %v3033_v33, %v3034_v10  ;;  %v3042_v5 = vmax.f32 %v3040_v37, %v3041_v56  ;;  %v3022_v62 = vrot.slane %v3021_v27, 1  ;;  %3776 = vmatpush.bf16.msra.mxu1 %v5444_v23  ;;  %3758 = vmatpush.bf16.msra.mxu0 %v5435_v34 }
 0x2da   : > { %v3099_v25 = vsel %vm2065_vm8, %v3009_v44, %v3098_v61  ;;  %v3166_v43 = vrot.slane %v7661_v11, 5  ;;  %v3179_v33 = vrot.slane %v7661_v11, 6  ;;  %v3165_v37 = vrot.slane %v7694_v15, 5 }
 0x2db   : > { %v3029_v57 = vrot.slane %v3028_v22, 1  ;;  %v3036_v16 = vrot.slane %v3035_v54, 1  ;;  %v3023_v46 = vmax.f32 %v3021_v27, %v3022_v62  ;;  %v3100_v31 = vsel %vm2067_vm9, %v3016_v6, %v3099_v25 }
 0x2dc   : > { %v3043_v20 = vrot.slane %v3042_v5, 1  ;;  %v3178_v44 = vrot.slane %v7694_v15, 6  ;;  %v3182_v2 = vsel %vm1296_vm5, %v3179_v33, %v3181_v12  ;;  %v3167_v19 = vsel %vm633_vm0, %v3165_v37, %v3166_v43 }
 0x2dd   : > { %v7793_v17 = vsel %vm2069_vm10, %v3023_v46, %v3100_v31  ;;  %v3030_v49 = vmax.f32 %v3028_v22, %v3029_v57  ;;  %v3037_v41 = vmax.f32 %v3035_v54, %v3036_v16  ;;  %3777 = vmatpush.bf16.msra.mxu1 %v5443_v47  ;;  %3759 = vmatpush.bf16.msra.mxu0 %v5434_v7 }
 0x2de   : > { %v3198_v35 = vpack.c.bf16 %v7793_v17, %v7688_v9  ;;  %v3044_v1 = vmax.f32 %v3042_v5, %v3043_v20  ;;  %v3118_v55 = vrot.slane %v7793_v17, 1  ;;  %v3131_v52 = vrot.slane %v7793_v17, 2 }
 0x2df   : > { %v3102_v42 = vsel %vm2071_vm11, %v3037_v41, %v3030_v49  ;;  %v3144_v48 = vrot.slane %v7793_v17, 3  ;;  %v3180_v23 = vsel %vm1296_vm5, %v3178_v44, %v3179_v33  ;;  %v3157_v10 = vrot.slane %v7793_v17, 4  ;;  %v5630_v41 = vld [vmem:[%s8188_s10] ss:$0 sm:$0xff] }
 0x2e0   : > { %3670 = vmatmul.bf16.gmra.mxu3 %v3198_v35  ;;  %v3103_v30 = vsel %vm2073_vm12, %v3044_v1, %v3102_v42  ;;  %v3119_v36 = vsel %vm8266_vm1, %v3116_v59, %v3118_v55  ;;  %v3132_v51 = vsel %vm8265_vm2, %v3129_v60, %v3131_v52  ;;  %v3155_v59 = vrot.slane %v7688_v9, 4 }
 0x2e1   : > { %v3110_v14 = vsel %vm633_vm0, %v3103_v30, 0.0  ;;  %3778 = vmatpush.bf16.msra.mxu1 %v5442_v32  ;;  %v3145_v28 = vsel %vm994_vm3, %v3142_v29, %v3144_v48  ;;  %v3153_v60 = vrot.slane %v7661_v11, 4  ;;  %v3168_v29 = vrot.slane %v7688_v9, 5 }
 0x2e2   : > { %v3120_v45 = vrot.slane %v3110_v14, 1  ;;  %v3133_v8 = vrot.slane %v3110_v14, 2  ;;  %v3146_v58 = vrot.slane %v3110_v14, 3  ;;  %v3197_v0 = vpack.c.bf16 %v3182_v2, %v3180_v23 }
 0x2e3   : > { %v3156_v18 = vsel %vm1095_vm4, %v3153_v60, %v3155_v59  ;;  %v3154_v50 = vsel %vm1095_vm4, %v3152_v40, %v3153_v60  ;;  %v3169_v26 = vsel %vm633_vm0, %v3166_v43, %v3168_v29  ;;  %v3159_v9 = vrot.slane %v3110_v14, 4  ;;  %v7853_v40 = vld [vmem:[%s8190_s12] ss:$0 sm:$0xff] }
 0x2e4   : > { %v3121_v24 = vsel %vm8266_vm1, %v3118_v55, %v3120_v45  ;;  %v3134_v3 = vsel %vm8265_vm2, %v3131_v52, %v3133_v8  ;;  %v3147_v21 = vsel %vm994_vm3, %v3144_v48, %v3146_v58  ;;  %v3195_v13 = vpack.c.bf16 %v3156_v18, %v3154_v50  ;;  %vm8459_vm2 = vmmov %vm8456_vm6 }
 0x2e5   : > { %v3199_v39 = vpack.c.bf16 %v3121_v24, %v3119_v36  ;;  %v3200_v38 = vpack.c.bf16 %v3134_v3, %v3132_v51  ;;  %v3201_v53 = vpack.c.bf16 %v3147_v21, %v3145_v28  ;;  %v3196_v27 = vpack.c.bf16 %v3169_v26, %v3167_v19 }
 0x2e6   : > { %v3160_v11 = vsel %vm1095_vm4, %v3157_v10, %v3159_v9  ;;  %v3158_v56 = vsel %vm1095_vm4, %v3155_v59, %v3157_v10  ;;  %v3172_v63 = vrot.slane %v3110_v14, 5  ;;  %v3185_v15 = vrot.slane %v3110_v14, 6 }
 0x2e7   : > { %3689 = vmatmul.bf16.gmra.mxu0 %v3199_v39  ;;  %3708 = vmatmul.bf16.gmra.mxu1 %v3200_v38  ;;  %v3202_v34 = vpack.c.bf16 %v3160_v11, %v3158_v56  ;;  %v3170_v4 = vrot.slane %v7793_v17, 5  ;;  %v3183_v22 = vrot.slane %v7793_v17, 6  ;;  %v7848_v38 = vld [vmem:[%s8189_s11] ss:$0 sm:$0xff] }
 0x2e8   : > { %3727 = vmatmul.bf16.gmra.mxu2 %v3201_v53 }
 0x2e9   : > { %v3173_v54 = vsel %vm633_vm0, %v3170_v4, %v3172_v63  ;;  %v3186_v5 = vsel %vm1296_vm5, %v3183_v22, %v3185_v15  ;;  %v3171_v62 = vsel %vm633_vm0, %v3168_v29, %v3170_v4  ;;  %v3184_v6 = vsel %vm1296_vm5, %v3181_v12, %v3183_v22 }
 0x2ea   : > { %v3203_v61 = vpack.c.bf16 %v3173_v54, %v3171_v62  ;;  %v3204_v47 = vpack.c.bf16 %v3186_v5, %v3184_v6 }
 0x2f0   : > { %3741 = vmatmul.bf16.vlgmr.msra.gmra.mxu3 %v3195_v13 }
 0x2f7   : > { %3760 = vmatmul.bf16.vlgmr.msra.gmra.mxu0 %v3196_v27  ;;  %3779 = vmatmul.bf16.vlgmr.msra.gmra.mxu1 %v3197_v0 }
 0x300   : > { %3746 = vmatmul.bf16.gmra.mxu3 %v3202_v34 }
 0x307   : > { %3765 = vmatmul.bf16.gmra.mxu0 %v3203_v61  ;;  %3784 = vmatmul.bf16.gmra.mxu1 %v3204_v47 }
 0x34a   : > { %v3666_v57 = vpop.f32.mrf.mxu3 }
 0x34b   : > { %v3685_v16 = vpop.f32.mrf.mxu0  ;;  %v3667_v35 = vadd.f32 %v5630_v41, %v3666_v57 }
 0x34d   : > { %v3704_v46 = vpop.f32.mrf.mxu1  ;;  %v3686_v32 = vadd.f32 %v3685_v16, %v3667_v35 }
 0x34f   : > { %v3705_v30 = vadd.f32 %v3704_v46, %v3686_v32 }
 0x352   : > { %v3668_v25 = vpop.f32.mrf.mxu3 }
 0x353   : > { %v3687_v7 = vpop.f32.mrf.mxu0  ;;  %v3669_v48 = vadd.f32 %v5630_v41, %v3668_v25 }
 0x355   : > { %v3706_v31 = vpop.f32.mrf.mxu1  ;;  %v3688_v8 = vadd.f32 %v3687_v7, %v3669_v48 }
 0x357   : > { %v3707_v21 = vadd.f32 %v3706_v31, %v3688_v8 }
 0x359   : > { %v3723_v52 = vpop.f32.mrf.mxu2 }
 0x35a   : > { %v3724_v14 = vadd.f32 %v3723_v52, %v3705_v30 }
 0x361   : > { %v3725_v28 = vpop.f32.mrf.mxu2 }
 0x362   : > { %v3726_v53 = vadd.f32 %v3725_v28, %v3707_v21 }
 0x363   : > { %v3671_v20 = vpop.f32.mrf.mxu3 }
 0x364   : > { %v3690_v17 = vpop.f32.mrf.mxu0  ;;  %v3709_v49 = vpop.f32.mrf.mxu1  ;;  %v3672_v24 = vadd.f32 %v5630_v41, %v3671_v20 }
 0x366   : > { %v3691_v59 = vadd.f32 %v3690_v17, %v3672_v24 }
 0x368   : > { %v3710_v12 = vadd.f32 %v3709_v49, %v3691_v59 }
 0x36b   : > { %v3673_v1 = vpop.f32.mrf.mxu3  ;;  %v3728_v37 = vpop.f32.mrf.mxu2 }
 0x36c   : > { %v3692_v42 = vpop.f32.mrf.mxu0  ;;  %v3711_v55 = vpop.f32.mrf.mxu1  ;;  %v3674_v19 = vadd.f32 %v5630_v41, %v3673_v1  ;;  %v3729_v9 = vadd.f32 %v3728_v37, %v3710_v12 }
 0x36e   : > { %v3693_v4 = vadd.f32 %v3692_v42, %v3674_v19 }
 0x370   : > { %v3712_v16 = vadd.f32 %v3711_v55, %v3693_v4 }
 0x373   : > { %v3742_v45 = vpop.f32.mrf.mxu3  ;;  %v3730_v31 = vpop.f32.mrf.mxu2 }
 0x374   : > { %v3743_v58 = vadd.f32 %v3742_v45, %v3724_v14  ;;  %v3761_v36 = vpop.f32.mrf.mxu0  ;;  %v3780_v51 = vpop.f32.mrf.mxu1  ;;  %v3731_v48 = vadd.f32 %v3730_v31, %v3712_v16  ;;  %v5457_v31 = vld [vmem:[%s8191_s13 + $0x38] sm:$0xff] }
 0x375   : > { %4281 = vmatpush.bf16.msra.mxu2 %v5457_v31 }
 0x376   : > { %v3762_v3 = vadd.f32 %v3761_v36, %v3743_v58 }
 0x378   : > { %v3781_v39 = vadd.f32 %v3780_v51, %v3762_v3 }
 0x37a   : > { %v3790_v60 = vmax.f32 %v3781_v39, 0.0 }
 0x37b   : > { %v3744_v18 = vpop.f32.mrf.mxu3 }
 0x37c   : > { %v3798_v50 = vmul.f32 %v7848_v38, %v3790_v60  ;;  %v3745_v13 = vadd.f32 %v3744_v18, %v3726_v53  ;;  %v3763_v29 = vpop.f32.mrf.mxu0  ;;  %v3782_v26 = vpop.f32.mrf.mxu1 }
 0x37e   : > { %v3806_v43 = vadd.f32 %v7853_v40, %v3798_v50  ;;  %v3764_v33 = vadd.f32 %v3763_v29, %v3745_v13 }
 0x380   : > { %v3814_v44 = vrot.slane %v3806_v43, 2  ;;  %v3838_v2 = vsel %vm8456_vm6, %v3806_v43, -inf  ;;  %v3815_v23 = vrot.slane %v3806_v43, 4  ;;  %v3783_v0 = vadd.f32 %v3782_v26, %v3764_v33  ;;  %vm8460_vm6 = vmmov %vm8459_vm2 }
 0x381   : > { %v3839_v27 = vrot.slane %v3838_v2, 4  ;;  %v3816_v10 = vrot.slane %v3806_v43, 6 }
 0x382   : > { %v3845_v56 = vsel %vm8457_vm14, %v3814_v44, -inf  ;;  %v3791_v34 = vmax.f32 %v3783_v0, 0.0  ;;  %v3852_v54 = vsel %vm8458_vm15, %v3815_v23, -inf  ;;  %vm8461_vm14 = vmmov %vm8459_vm2 }
 0x383   : > { %v3747_v11 = vpop.f32.mrf.mxu3  ;;  %v3840_v22 = vmax.f32 %v3838_v2, %v3839_v27  ;;  %v3859_v5 = vsel %vm8459_vm2, %v3816_v10, -inf  ;;  %v3846_v61 = vrot.slane %v3845_v56, 4  ;;  %v3853_v47 = vrot.slane %v3852_v54, 4  ;;  %vm8462_vm15 = vmmov %vm8459_vm2 }
 0x384   : > { %v3748_v63 = vadd.f32 %v3747_v11, %v3729_v9  ;;  %v3766_v15 = vpop.f32.mrf.mxu0  ;;  %v3799_v62 = vmul.f32 %v7848_v38, %v3791_v34  ;;  %v3860_v25 = vrot.slane %v3859_v5, 4  ;;  %v3785_v7 = vpop.f32.mrf.mxu1 }
 0x385   : > { %v3841_v46 = vrot.slane %v3840_v22, 2  ;;  %v3847_v35 = vmax.f32 %v3845_v56, %v3846_v61  ;;  %v3854_v1 = vmax.f32 %v3852_v54, %v3853_v47 }
 0x386   : > { %v3767_v6 = vadd.f32 %v3766_v15, %v3748_v63  ;;  %v3807_v57 = vadd.f32 %v7853_v40, %v3799_v62  ;;  %v3861_v14 = vmax.f32 %v3859_v5, %v3860_v25 }
 0x387   : > { %v3842_v45 = vmax.f32 %v3840_v22, %v3841_v46  ;;  %v3848_v24 = vrot.slane %v3847_v35, 2  ;;  %v3855_v39 = vrot.slane %v3854_v1, 2 }
 0x388   : > { %v3817_v20 = vrot.slane %v3807_v57, 2  ;;  %v3818_v17 = vrot.slane %v3807_v57, 4  ;;  %v3819_v49 = vrot.slane %v3807_v57, 6  ;;  %v3786_v41 = vadd.f32 %v3785_v7, %v3767_v6 }
 0x389   : > { %v3866_v3 = vsel %vm8462_vm15, %v3807_v57, -inf  ;;  %v3862_v13 = vrot.slane %v3861_v14, 2  ;;  %v3843_v33 = vrot.slane %v3842_v45, 1  ;;  %v3849_v37 = vmax.f32 %v3847_v35, %v3848_v24  ;;  %vm8465_vm15 = vmmov %vm8459_vm2 }
 0x38a   : > { %v3873_v32 = vsel %vm8460_vm6, %v3817_v20, -inf  ;;  %v3880_v42 = vsel %vm8459_vm2, %v3818_v17, -inf  ;;  %v3887_v52 = vsel %vm8461_vm14, %v3819_v49, -inf  ;;  %v3792_v36 = vmax.f32 %v3786_v41, 0.0  ;;  %vm8463_vm6 = vmmov %vm8459_vm2 }
 0x38b   : > { %v3749_v30 = vpop.f32.mrf.mxu3  ;;  %v3874_v55 = vrot.slane %v3873_v32, 4  ;;  %v3881_v8 = vrot.slane %v3880_v42, 4  ;;  %v3888_v58 = vrot.slane %v3887_v52, 4  ;;  %v3867_v29 = vrot.slane %v3866_v3, 4  ;;  %vm8464_vm14 = vmmov %vm8459_vm2 }
 0x38c   : > { %v3768_v51 = vpop.f32.mrf.mxu0  ;;  %v3750_v21 = vadd.f32 %v3749_v30, %v3731_v48  ;;  %v3800_v18 = vmul.f32 %v7848_v38, %v3792_v36  ;;  %v3787_v2 = vpop.f32.mrf.mxu1  ;;  %v7869_v19 = vmax.f32 %v3854_v1, %v3855_v39  ;;  %v7871_v34 = vmax.f32 %v3861_v14, %v3862_v13  ;;  %v5465_v30 = vld [vmem:[%s8191_s13 + $0x78] sm:$0xff] }
 0x38d   : > { %v3875_v28 = vmax.f32 %v3873_v32, %v3874_v55  ;;  %v3882_v53 = vmax.f32 %v3880_v42, %v3881_v8  ;;  %v3889_v59 = vmax.f32 %v3887_v52, %v3888_v58  ;;  %v3868_v63 = vmax.f32 %v3866_v3, %v3867_v29  ;;  %v5456_v52 = vld [vmem:[%s8191_s13 + $0x30] sm:$0xff]  ;;  %v5473_v48 = vld [vmem:[%s8191_s13 + $0xb8] sm:$0xff]  ;;  %4295 = vmatpush.bf16.msrb.mxu3 %v5465_v30 }
 0x38e   : > { %v3769_v50 = vadd.f32 %v3768_v51, %v3750_v21  ;;  %v3808_v44 = vadd.f32 %v7853_v40, %v3800_v18  ;;  %v7874_v22 = vmax.f32 %v3842_v45, %v3843_v33  ;;  %v3850_v20 = vrot.slane %v3849_v37, 1  ;;  %4309 = vmatpush.bf16.msrb.mxu0 %v5473_v48  ;;  %4282 = vmatpush.bf16.msra.mxu2 %v5456_v52  ;;  %v5455_v18 = vld [vmem:[%s8191_s13 + $0x28] sm:$0xff] }
 0x38f   : > { %v3876_v60 = vrot.slane %v3875_v28, 2  ;;  %v3883_v12 = vrot.slane %v3882_v53, 2  ;;  %v3890_v43 = vrot.slane %v3889_v59, 2  ;;  %v3869_v17 = vrot.slane %v3868_v63, 2 }
 0x390   : > { %v3788_v0 = vadd.f32 %v3787_v2, %v3769_v50  ;;  %v3820_v10 = vrot.slane %v3808_v44, 2  ;;  %v3821_v11 = vrot.slane %v3808_v44, 4  ;;  %v3822_v56 = vrot.slane %v3808_v44, 6 }
 0x391   : > { %v3877_v26 = vmax.f32 %v3875_v28, %v3876_v60  ;;  %v3884_v23 = vmax.f32 %v3882_v53, %v3883_v12  ;;  %v3891_v27 = vmax.f32 %v3889_v59, %v3890_v43  ;;  %v3894_v4 = vsel %vm8463_vm6, %v3808_v44, -inf  ;;  %vm8466_vm6 = vmmov %vm8459_vm2 }
 0x392   : > { %v3895_v54 = vrot.slane %v3894_v4, 4  ;;  %v3901_v5 = vsel %vm8459_vm2, %v3820_v10, -inf  ;;  %v3908_v62 = vsel %vm8464_vm14, %v3821_v11, -inf  ;;  %v3915_v25 = vsel %vm8465_vm15, %v3822_v56, -inf  ;;  %vm8467_vm14 = vmmov %vm8459_vm2  ;;  %4283 = vmatpush.bf16.msra.mxu2 %v5455_v18  ;;  %v5454_v11 = vld [vmem:[%s8191_s13 + $0x20] sm:$0xff] }
 0x393   : > { %v3878_v9 = vrot.slane %v3877_v26, 1  ;;  %v3885_v15 = vrot.slane %v3884_v23, 1  ;;  %v3892_v47 = vrot.slane %v3891_v27, 1  ;;  %v3902_v57 = vrot.slane %v3901_v5, 4  ;;  %vm8468_vm15 = vmmov %vm8459_vm2 }
 0x394   : > { %v3896_v16 = vmax.f32 %v3894_v4, %v3895_v54  ;;  %v3909_v46 = vrot.slane %v3908_v62, 4  ;;  %v3793_v7 = vmax.f32 %v3788_v0, 0.0  ;;  %v3916_v41 = vrot.slane %v3915_v25, 4 }
 0x395   : > { %v3879_v6 = vmax.f32 %v3877_v26, %v3878_v9  ;;  %v3886_v61 = vmax.f32 %v3884_v23, %v3885_v15  ;;  %v3903_v49 = vmax.f32 %v3901_v5, %v3902_v57  ;;  %v3857_v35 = vrot.slane %v7869_v19, 1 }
 0x396   : > { %v3897_v1 = vrot.slane %v3896_v16, 2  ;;  %v3910_v32 = vmax.f32 %v3908_v62, %v3909_v46  ;;  %v3801_v42 = vmul.f32 %v7848_v38, %v3793_v7  ;;  %v3864_v14 = vrot.slane %v7871_v34, 1  ;;  %4284 = vmatpush.bf16.msra.mxu2 %v5454_v11  ;;  %v5463_v11 = vld [vmem:[%s8191_s13 + $0x68] sm:$0xff] }
 0x397   : > { %v3893_v55 = vmax.f32 %v3891_v27, %v3892_v47  ;;  %v3904_v45 = vrot.slane %v3903_v49, 2  ;;  %v3917_v8 = vmax.f32 %v3915_v25, %v3916_v41  ;;  %v3970_v38 = vsel %vm2071_vm11, %v3886_v61, %v3879_v6 }
 0x398   : > { %v3898_v58 = vmax.f32 %v3896_v16, %v3897_v1  ;;  %v3911_v36 = vrot.slane %v3910_v32, 2  ;;  %v3809_v51 = vadd.f32 %v7853_v40, %v3801_v42  ;;  %v3851_v24 = vmax.f32 %v3849_v37, %v3850_v20 }
 0x399   : > { %v3870_v3 = vmax.f32 %v3868_v63, %v3869_v17  ;;  %v3905_v28 = vmax.f32 %v3903_v49, %v3904_v45  ;;  %v3918_v21 = vrot.slane %v3917_v8, 2  ;;  %v3971_v50 = vsel %vm2073_vm12, %v3893_v55, %v3970_v38 }
 0x39a   : > { %v3899_v39 = vrot.slane %v3898_v58, 1  ;;  %v3912_v53 = vmax.f32 %v3910_v32, %v3911_v36  ;;  %v3823_v59 = vrot.slane %v3809_v51, 2  ;;  %v3824_v60 = vrot.slane %v3809_v51, 4 }
 0x39b   : > { %v3906_v13 = vrot.slane %v3905_v28, 1  ;;  %v3825_v29 = vrot.slane %v3809_v51, 6  ;;  %v3922_v40 = vsel %vm8466_vm6, %v3809_v51, -inf  ;;  %v3919_v44 = vmax.f32 %v3917_v8, %v3918_v21 }
 0x39c   : > { %v3900_v12 = vmax.f32 %v3898_v58, %v3899_v39  ;;  %v3913_v43 = vrot.slane %v3912_v53, 1  ;;  %v3923_v33 = vrot.slane %v3922_v40, 4  ;;  %v3929_v37 = vsel %vm8459_vm2, %v3823_v59, -inf }
 0x39d   : > { %v3907_v26 = vmax.f32 %v3905_v28, %v3906_v13  ;;  %v3930_v2 = vrot.slane %v3929_v37, 4  ;;  %v3936_v23 = vsel %vm8467_vm14, %v3824_v60, -inf  ;;  %v3858_v27 = vmax.f32 %v7869_v19, %v3857_v35 }
 0x39e   : > { %v3972_v0 = vsel %vm2075_vm13, %v3900_v12, %v3971_v50  ;;  %v3924_v9 = vmax.f32 %v3922_v40, %v3923_v33  ;;  %v3937_v10 = vrot.slane %v3936_v23, 4  ;;  %v3966_v56 = vsel %vm2063_vm7, %v3851_v24, %v7874_v22  ;;  %v5453_v22 = vld [vmem:[%s8191_s13 + $0x18] sm:$0xff] }
 0x39f   : > { %v3871_v63 = vrot.slane %v3870_v3, 1  ;;  %v3931_v15 = vmax.f32 %v3929_v37, %v3930_v2  ;;  %v3943_v4 = vsel %vm8468_vm15, %v3825_v29, -inf  ;;  %v3914_v54 = vmax.f32 %v3912_v53, %v3913_v43  ;;  %4285 = vmatpush.bf16.msra.mxu2 %v5453_v22  ;;  %v5466_v22 = vld [vmem:[%s8191_s13 + $0x80] sm:$0xff] }
 0x3a0   : > { %v3925_v5 = vrot.slane %v3924_v9, 2  ;;  %v3938_v62 = vmax.f32 %v3936_v23, %v3937_v10  ;;  %v3944_v19 = vrot.slane %v3943_v4, 4  ;;  %v3920_v6 = vrot.slane %v3919_v44, 1  ;;  %v5472_v10 = vld [vmem:[%s8191_s13 + $0xb0] sm:$0xff] }
 0x3a1   : > { %v3973_v61 = vsel %vm2063_vm7, %v3907_v26, %v3972_v0  ;;  %v3932_v47 = vrot.slane %v3931_v15, 2  ;;  %v3865_v25 = vmax.f32 %v7871_v34, %v3864_v14  ;;  %v3967_v7 = vsel %vm2065_vm8, %v3858_v27, %v3966_v56  ;;  %v5452_v34 = vld [vmem:[%s8191_s13 + $0x10] sm:$0xff]  ;;  %v5477_v56 = vld [vmem:[%s8191_s13 + $0xd8] sm:$0xff]  ;;  %4310 = vmatpush.bf16.msrb.mxu0 %v5472_v10 }
 0x3a2   : > { %v3926_v57 = vmax.f32 %v3924_v9, %v3925_v5  ;;  %v3939_v16 = vrot.slane %v3938_v62, 2  ;;  %v3945_v46 = vmax.f32 %v3943_v4, %v3944_v19  ;;  %v3872_v31 = vmax.f32 %v3870_v3, %v3871_v63  ;;  %v5451_v3 = vld [vmem:[%s8191_s13 + $0x8] sm:$0xff]  ;;  %v5464_v0 = vld [vmem:[%s8191_s13 + $0x70] sm:$0xff]  ;;  %v5450_v9 = vld [vmem:[%s8191_s13] sm:$0xff] }
 0x3a3   : > { %v3933_v20 = vmax.f32 %v3931_v15, %v3932_v47  ;;  %v3974_v17 = vsel %vm2065_vm8, %v3914_v54, %v3973_v61  ;;  %v3921_v1 = vmax.f32 %v3919_v44, %v3920_v6  ;;  %v3968_v42 = vsel %vm2067_vm9, %v3865_v25, %v3967_v7  ;;  %4286 = vmatpush.bf16.msra.mxu2 %v5452_v34  ;;  %v5471_v63 = vld [vmem:[%s8191_s13 + $0xa8] sm:$0xff]  ;;  %v5476_v15 = vld [vmem:[%s8191_s13 + $0xd0] sm:$0xff]  ;;  %v5462_v4 = vld [vmem:[%s8191_s13 + $0x60] sm:$0xff] }
 0x3a4   : > { %v3927_v49 = vrot.slane %v3926_v57, 1  ;;  %v3940_v41 = vmax.f32 %v3938_v62, %v3939_v16  ;;  %v3946_v35 = vrot.slane %v3945_v46, 2  ;;  %v3969_v14 = vsel %vm2069_vm10, %v3872_v31, %v3968_v42  ;;  %4296 = vmatpush.bf16.msrb.mxu3 %v5464_v0  ;;  %v5470_v54 = vld [vmem:[%s8191_s13 + $0xa0] sm:$0xff]  ;;  %v5475_v5 = vld [vmem:[%s8191_s13 + $0xc8] sm:$0xff]  ;;  %v5461_v62 = vld [vmem:[%s8191_s13 + $0x58] sm:$0xff] }
 0x3a5   : > { %v3934_v32 = vrot.slane %v3933_v20, 1  ;;  %v3975_v45 = vsel %vm2067_vm9, %v3921_v1, %v3974_v17  ;;  %v7929_v24 = vsel %vm633_vm0, 0.0, %v3969_v14  ;;  %4311 = vmatpush.bf16.msrb.mxu0 %v5471_v63  ;;  %v5469_v19 = vld [vmem:[%s8191_s13 + $0x98] sm:$0xff]  ;;  %v5474_v6 = vld [vmem:[%s8191_s13 + $0xc0] sm:$0xff]  ;;  %v5460_v61 = vld [vmem:[%s8191_s13 + $0x50] sm:$0xff]  ;;  %vm8469_vm13 = vcmask 523264  }
 0x3a6   : > { %v3928_v52 = vmax.f32 %v3926_v57, %v3927_v49  ;;  %v3941_v30 = vrot.slane %v3940_v41, 1  ;;  %v3947_v48 = vmax.f32 %v3945_v46, %v3946_v35  ;;  %v4022_v60 = vrot.slane %v7929_v24, 5  ;;  %v5468_v47 = vld [vmem:[%s8191_s13 + $0x90] sm:$0xff]  ;;  %v5459_v57 = vld [vmem:[%s8191_s13 + $0x48] sm:$0xff]  ;;  %v5458_v46 = vld [vmem:[%s8191_s13 + $0x40] sm:$0xff] }
 0x3a7   : > { %v3935_v55 = vmax.f32 %v3933_v20, %v3934_v32  ;;  %v4004_v18 = vrot.slane %v7929_v24, 3  ;;  %v3986_v29 = vrot.slane %v7929_v24, 1  ;;  %4287 = vmatpush.bf16.msra.mxu2 %v5451_v3  ;;  %v5467_v16 = vld [vmem:[%s8191_s13 + $0x88] sm:$0xff]  ;;  %vm8470_vm6 = vmmov %vm8469_vm13  ;;  %v4033_v1 = vrot.slane %v7929_v24, 6 }
 0x3a8   : > { %v3942_v8 = vmax.f32 %v3940_v41, %v3941_v30  ;;  %v3948_v38 = vrot.slane %v3947_v48, 1  ;;  %v7925_v58 = vsel %vm2069_vm10, %v3928_v52, %v3975_v45  ;;  %4297 = vmatpush.bf16.msrb.mxu3 %v5463_v11  ;;  %vm8471_vm2 = vmmov %vm8470_vm6  ;;  %v4015_v45 = vrot.slane %v7929_v24, 4 }
 0x3a9   : > { %v4023_v28 = vrot.slane %v7925_v58, 5  ;;  %v4005_v21 = vrot.slane %v7925_v58, 3  ;;  %v3987_v53 = vrot.slane %v7925_v58, 1  ;;  %4312 = vmatpush.bf16.msrb.mxu0 %v5470_v54  ;;  %v4034_v35 = vrot.slane %v7925_v58, 6 }
 0x3aa   : > { %v3949_v36 = vmax.f32 %v3947_v48, %v3948_v38  ;;  %v3977_v51 = vsel %vm2071_vm11, %v3942_v8, %v3935_v55  ;;  %v4016_v30 = vrot.slane %v7925_v58, 4  ;;  %v3998_v34 = vrot.slane %v7925_v58, 2 }
 0x3ab   : > { %v4024_v12 = vsel %vm633_vm0, %v4022_v60, %v4023_v28  ;;  %v4006_v43 = vsel %vm994_vm3, %v4004_v18, %v4005_v21  ;;  %v3988_v26 = vsel %vm8266_vm1, %v3986_v29, %v3987_v53  ;;  %4288 = vmatpush.bf16.msra.mxu2 %v5450_v9  ;;  %v4035_v42 = vsel %vm1296_vm5, %v4033_v1, %v4034_v35 }
 0x3ac   : > { %v3978_v39 = vsel %vm2073_vm12, %v3949_v36, %v3977_v51  ;;  %4298 = vmatpush.bf16.msrb.mxu3 %v5462_v4  ;;  %v3997_v38 = vrot.slane %v7929_v24, 2  ;;  %vm8472_vm14 = vcmask 1045504  }
 0x3ad   : > { %v7939_v59 = vsel %vm633_vm0, %v3978_v39, 0.0  ;;  %4313 = vmatpush.bf16.msrb.mxu0 %v5469_v19  ;;  %v4017_v39 = vsel %vm1095_vm4, %v4015_v45, %v4016_v30  ;;  %vm8473_vm15 = vmmov %vm8472_vm14 }
 0x3ae   : > { %v4025_v50 = vrot.slane %v7939_v59, 5  ;;  %v4007_v13 = vrot.slane %v7939_v59, 3  ;;  %v3989_v40 = vrot.slane %v7939_v59, 1  ;;  %v4036_v41 = vrot.slane %v7939_v59, 6 }
 0x3af   : > { %4327 = vmatpush.bf16.msrb.mxu2 %v5477_v56  ;;  %v4018_v48 = vrot.slane %v7939_v59, 4  ;;  %v4000_v14 = vrot.slane %v7939_v59, 2 }
 0x3b0   : > { %v4026_v33 = vsel %vm633_vm0, %v4023_v28, %v4025_v50  ;;  %v4008_v37 = vsel %vm994_vm3, %v4005_v21, %v4007_v13  ;;  %v3990_v44 = vsel %vm8266_vm1, %v3987_v53, %v3989_v40  ;;  %4299 = vmatpush.bf16.msrb.mxu3 %v5461_v62  ;;  %v4037_v32 = vsel %vm1296_vm5, %v4034_v35, %v4036_v41  ;;  %vm8476_vm1 = vmmov %vm8471_vm2 }
 0x3b1   : > { %v5609_v2 = vpack.i.bf16 %v4026_v33, %v4024_v12  ;;  %v5604_v23 = vpack.i.bf16 %v4008_v37, %v4006_v43  ;;  %v5599_v27 = vpack.i.bf16 %v3990_v44, %v3988_v26  ;;  %4314 = vmatpush.bf16.msrb.mxu0 %v5468_v47  ;;  %v4049_v52 = vpack.c.bf16 %v4037_v32, %v4035_v42  ;;  %v5633_v12 = vld [vmem:[%s8192_s14] ss:$0 sm:$0xff] }
 0x3b2   : > { %v4019_v21 = vsel %vm1095_vm4, %v4016_v30, %v4018_v48  ;;  %v3999_v53 = vsel %vm8473_vm15, %v3997_v38, %v3998_v34 }
 0x3b3   : > { %5610 = vrot.lane.b32.xlu1 %v5609_v2, %s8452_s22  ;;  %5605 = vrot.lane.b32.xlu0 %v5604_v23, %s8452_s22 }
 0x3b4   : > { %5600 = vrot.lane.b32.xlu2 %v5599_v27, %s8452_s22  ;;  %4328 = vmatpush.bf16.msrb.mxu2 %v5476_v15 }
 0x3b5   : > { %4300 = vmatpush.bf16.msrb.mxu3 %v5460_v61  ;;  %4315 = vmatpush.bf16.msrb.mxu0 %v5467_v16  ;;  %v5485_v16 = vld [vmem:[%s8193_s15 + $0x38] sm:$0xff] }
 0x3b6   : > { %4592 = vmatpush.bf16.msrb.mxu1 %v5485_v16 }
 0x3b8   : > { %4329 = vmatpush.bf16.msrb.mxu2 %v5475_v5 }
 0x3b9   : > { %4301 = vmatpush.bf16.msrb.mxu3 %v5459_v57  ;;  %4316 = vmatpush.bf16.msrb.mxu0 %v5466_v22 }
 0x3bc   : > { %4330 = vmatpush.bf16.msrb.mxu2 %v5474_v6 }
 0x3bd   : > { %4302 = vmatpush.bf16.msrb.mxu3 %v5458_v46 }
 0x40e   : > { %v5601_v25 = vpop.permute.xlu2 %5600 }
 0x40f   : > { %v5603_v7 = vunpack.i.h.bf16 %v5601_v25  ;;  %v5602_v31 = vunpack.i.l.bf16 %v5601_v25 }
 0x411   : > { %v4041_v20 = vsel %vm8469_vm13, %v7925_v58, %v5603_v7  ;;  %v4040_v17 = vsel %vm8470_vm6, %v7929_v24, %v5602_v31  ;;  %v4001_v58 = vsel %vm8472_vm14, %v3998_v34, %v4000_v14  ;;  %vm8474_vm13 = vmmov %vm8471_vm2  ;;  %vm4353_vm14 = vcmask 254976  }
 0x412   : > { %v4046_v49 = vpack.c.bf16 %v4041_v20, %v4040_v17  ;;  %vm8475_vm6 = vmmov %vm8471_vm2 }
 0x414   : > { %4289 = vmatmul.bf16.vlgmr.msra.gmra.mxu2 %v4046_v49 }
 0x424   : > { %5295 = vmatmul.msk.bf16.vlgmr.msrb.gmra.mxu2 %vm8471_vm2, %v4049_v52 }
 0x425   : > { %v5611_v55 = vpop.permute.xlu1 %5610  ;;  %v5606_v8 = vpop.permute.xlu0 %5605 }
 0x426   : > { %v5613_v36 = vunpack.i.h.bf16 %v5611_v55  ;;  %v5612_v51 = vunpack.i.l.bf16 %v5611_v55  ;;  %v5608_v3 = vunpack.i.h.bf16 %v5606_v8  ;;  %v5607_v28 = vunpack.i.l.bf16 %v5606_v8 }
 0x428   : > { %v4045_v59 = vsel %vm8474_vm13, %v4019_v21, %v5613_v36  ;;  %v4044_v60 = vsel %vm8475_vm6, %v4017_v39, %v5612_v51  ;;  %v4043_v18 = vsel %vm8471_vm2, %v4001_v58, %v5608_v3  ;;  %v4042_v24 = vsel %vm8476_vm1, %v3999_v53, %v5607_v28  ;;  %vm8477_vm1 = vmmov %vm8473_vm15 }
 0x429   : > { %v4048_v50 = vpack.c.bf16 %v4045_v59, %v4044_v60  ;;  %v4047_v13 = vpack.c.bf16 %v4043_v18, %v4042_v24 }
 0x42b   : > { %4303 = vmatmul.bf16.vlgmr.msrb.gmra.mxu3 %v4047_v13  ;;  %4317 = vmatmul.bf16.vlgmr.msrb.gmra.mxu0 %v4048_v50 }
 0x497   : > { %v4290_v29 = vpop.f32.mrf.mxu2 }
 0x498   : > { %v4291_v43 = vadd.f32 %v5633_v12, %v4290_v29 }
 0x49f   : > { %v4292_v40 = vpop.f32.mrf.mxu2 }
 0x4a0   : > { %v4293_v0 = vadd.f32 %v5633_v12, %v4292_v40 }
 0x4a7   : > { %v4332_v2 = vpop.f32.mrf.mxu2 }
 0x4a8   : > { %v4318_v26 = vpop.f32.mrf.mxu0 }
 0x4ae   : > { %v4304_v33 = vpop.f32.mrf.mxu3 }
 0x4af   : > { %v4305_v37 = vadd.f32 %v4304_v33, %v4291_v43  ;;  %v4334_v20 = vpop.f32.mrf.mxu2 }
 0x4b0   : > { %v4320_v57 = vpop.f32.mrf.mxu0 }
 0x4b1   : > { %v4319_v44 = vadd.f32 %v4318_v26, %v4305_v37 }
 0x4b3   : > { %v4333_v23 = vadd.f32 %v4332_v2, %v4319_v44 }
 0x4b5   : > { %v4337_v27 = vmax.f32 %v4333_v23, 0.0 }
 0x4b6   : > { %v4306_v9 = vpop.f32.mrf.mxu3 }
 0x4b7   : > { %v4341_v10 = vrot.slane %v4337_v27, 2  ;;  %v4342_v11 = vrot.slane %v4337_v27, 4  ;;  %v4343_v56 = vrot.slane %v4337_v27, 6  ;;  %v4354_v63 = vsel %vm4353_vm14, %v4337_v27, -inf }
 0x4b8   : > { %v4355_v15 = vrot.slane %v4354_v63, 4  ;;  %v4307_v4 = vadd.f32 %v4306_v9, %v4293_v0 }
 0x4b9   : > { %v4361_v54 = vsel %vm4353_vm14, %v4341_v10, -inf  ;;  %v4368_v5 = vsel %vm4353_vm14, %v4342_v11, -inf  ;;  %v4375_v62 = vsel %vm4353_vm14, %v4343_v56, -inf }
 0x4ba   : > { %v4356_v19 = vmax.f32 %v4354_v63, %v4355_v15  ;;  %v4362_v6 = vrot.slane %v4361_v54, 4  ;;  %v4369_v61 = vrot.slane %v4368_v5, 4  ;;  %v4376_v47 = vrot.slane %v4375_v62, 4 }
 0x4bb   : > { %v4321_v46 = vadd.f32 %v4320_v57, %v4307_v4 }
 0x4bc   : > { %v4357_v22 = vrot.slane %v4356_v19, 2  ;;  %v4363_v25 = vmax.f32 %v4361_v54, %v4362_v6  ;;  %v4370_v7 = vmax.f32 %v4368_v5, %v4369_v61  ;;  %v4377_v31 = vmax.f32 %v4375_v62, %v4376_v47 }
 0x4bd   : > { %v4335_v17 = vadd.f32 %v4334_v20, %v4321_v46 }
 0x4be   : > { %v4358_v49 = vmax.f32 %v4356_v19, %v4357_v22  ;;  %v4364_v41 = vrot.slane %v4363_v25, 2  ;;  %v4371_v35 = vrot.slane %v4370_v7, 2  ;;  %v4378_v52 = vrot.slane %v4377_v31, 2 }
 0x4bf   : > { %v4338_v1 = vmax.f32 %v4335_v17, 0.0 }
 0x4c0   : > { %v4365_v32 = vmax.f32 %v4363_v25, %v4364_v41  ;;  %v4372_v42 = vmax.f32 %v4370_v7, %v4371_v35  ;;  %v4359_v55 = vrot.slane %v4358_v49, 1  ;;  %v4379_v21 = vmax.f32 %v4377_v31, %v4378_v52 }
 0x4c1   : > { %v4344_v30 = vrot.slane %v4338_v1, 2  ;;  %v4345_v48 = vrot.slane %v4338_v1, 4  ;;  %v4346_v34 = vrot.slane %v4338_v1, 6  ;;  %v4382_v14 = vsel %vm4353_vm14, %v4338_v1, -inf }
 0x4c2   : > { %v4366_v45 = vrot.slane %v4365_v32, 1  ;;  %v4373_v8 = vrot.slane %v4372_v42, 1  ;;  %v4383_v38 = vrot.slane %v4382_v14, 4  ;;  %v4360_v60 = vmax.f32 %v4358_v49, %v4359_v55  ;;  %v5490_v55 = vld [vmem:[%s8193_s15 + $0x60] sm:$0xff] }
 0x4c3   : > { %v4389_v36 = vsel %vm4353_vm14, %v4344_v30, -inf  ;;  %v4396_v51 = vsel %vm4353_vm14, %v4345_v48, -inf  ;;  %v4403_v3 = vsel %vm4353_vm14, %v4346_v34, -inf  ;;  %v4380_v40 = vrot.slane %v4379_v21, 1  ;;  %v5484_v48 = vld [vmem:[%s8193_s15 + $0x30] sm:$0xff]  ;;  %v5491_v34 = vld [vmem:[%s8193_s15 + $0x68] sm:$0xff] }
 0x4c4   : > { %v4367_v28 = vmax.f32 %v4365_v32, %v4366_v45  ;;  %v4390_v39 = vrot.slane %v4389_v36, 4  ;;  %v4384_v58 = vmax.f32 %v4382_v14, %v4383_v38  ;;  %v4397_v53 = vrot.slane %v4396_v51, 4  ;;  %4593 = vmatpush.bf16.msrb.mxu1 %v5484_v48  ;;  %4607 = vmatpush.bf16.msra.mxu2 %v5491_v34  ;;  %v5483_v14 = vld [vmem:[%s8193_s15 + $0x28] sm:$0xff]  ;;  %v5482_v45 = vld [vmem:[%s8193_s15 + $0x20] sm:$0xff]  ;;  %v5481_v38 = vld [vmem:[%s8193_s15 + $0x18] sm:$0xff] }
 0x4c5   : > { %v4404_v59 = vrot.slane %v4403_v3, 4  ;;  %v4374_v24 = vmax.f32 %v4372_v42, %v4373_v8  ;;  %v4381_v9 = vmax.f32 %v4379_v21, %v4380_v40  ;;  %v5489_v8 = vld [vmem:[%s8193_s15 + $0x58] sm:$0xff]  ;;  %v5486_v21 = vld [vmem:[%s8193_s15 + $0x40] sm:$0xff] }
 0x4c6   : > { %v4391_v18 = vmax.f32 %v4389_v36, %v4390_v39  ;;  %v4385_v50 = vrot.slane %v4384_v58, 2  ;;  %v4398_v13 = vmax.f32 %v4396_v51, %v4397_v53  ;;  %v4418_v12 = vsel %vm2063_vm7, %v4367_v28, %v4360_v60  ;;  %v5488_v36 = vld [vmem:[%s8193_s15 + $0x50] sm:$0xff]  ;;  %v5479_v28 = vld [vmem:[%s8193_s15 + $0x8] sm:$0xff]  ;;  %v5478_v39 = vld [vmem:[%s8193_s15] sm:$0xff] }
 0x4c7   : > { %v4405_v29 = vmax.f32 %v4403_v3, %v4404_v59  ;;  %v4419_v0 = vsel %vm2065_vm8, %v4374_v24, %v4418_v12  ;;  %vm8478_vm7 = vcmask 1046528   ;;  %v5480_v51 = vld [vmem:[%s8193_s15 + $0x10] sm:$0xff]  ;;  %v5487_v3 = vld [vmem:[%s8193_s15 + $0x48] sm:$0xff]  ;;  %vm8480_vm8 = vmmov %vm8471_vm2 }
 0x4c8   : > { %v4392_v43 = vrot.slane %v4391_v18, 2  ;;  %v4386_v33 = vmax.f32 %v4384_v58, %v4385_v50  ;;  %v4399_v37 = vrot.slane %v4398_v13, 2  ;;  %v4420_v4 = vsel %vm2067_vm9, %v4381_v9, %v4419_v0  ;;  %4594 = vmatpush.bf16.msrb.mxu1 %v5483_v14  ;;  %4608 = vmatpush.bf16.msra.mxu2 %v5490_v55  ;;  %v5358_v0 = vld [vmem:[%s8195_s17 + $0x28] sm:$0xff]  ;;  %v5361_v9 = vld [vmem:[%s8195_s17 + $0x38] sm:$0xff] }
 0x4c9   : > { %v4406_v26 = vrot.slane %v4405_v29, 2  ;;  %4727 = vmatpush.msra.mxu0 %v5358_v0  ;;  %vm4660_vm9 = vcmask 130048  }
 0x4ca   : > { %v4393_v44 = vmax.f32 %v4391_v18, %v4392_v43  ;;  %v4387_v2 = vrot.slane %v4386_v33, 1  ;;  %v4400_v23 = vmax.f32 %v4398_v13, %v4399_v37 }
 0x4cb   : > { %v4407_v27 = vmax.f32 %v4405_v29, %v4406_v26 }
 0x4cc   : > { %v4394_v10 = vrot.slane %v4393_v44, 1  ;;  %v4388_v11 = vmax.f32 %v4386_v33, %v4387_v2  ;;  %v4401_v56 = vrot.slane %v4400_v23, 1  ;;  %4595 = vmatpush.bf16.msrb.mxu1 %v5482_v45  ;;  %4609 = vmatpush.bf16.msra.mxu2 %v5489_v8 }
 0x4cd   : > { %v4408_v63 = vrot.slane %v4407_v27, 1 }
 0x4ce   : > { %v4395_v15 = vmax.f32 %v4393_v44, %v4394_v10  ;;  %v4402_v54 = vmax.f32 %v4400_v23, %v4401_v56  ;;  %v4421_v62 = vsel %vm2069_vm10, %v4388_v11, %v4420_v4  ;;  %v5354_v23 = vld [vmem:[%s8195_s17 + $0x18] sm:$0xff]  ;;  %v5357_v10 = vld [vmem:[%s8195_s17 + $0x20] sm:$0xff]  ;;  %v5360_v11 = vld [vmem:[%s8195_s17 + $0x30] sm:$0xff]  ;;  %vm4763_vm10 = vcmask 32768  }
 0x4cf   : > { %v4409_v5 = vmax.f32 %v4407_v27, %v4408_v63  ;;  %v8056_v19 = vsel %vm633_vm0, 0.0, %v4421_v62  ;;  %v5353_v27 = vld [vmem:[%s8195_s17 + $0x10] sm:$0xff]  ;;  %4678 = vmatpush.msra.mxu3 %v5354_v23  ;;  %4728 = vmatpush.msra.mxu0 %v5357_v10  ;;  %v4656_v56 = vld [vmem:[%s8195_s17 + $0x8] sm:$0xff]  ;;  %v4655_v63 = vld [vmem:[%s8195_s17] sm:$0xff] }
 0x4d0   : > { %v4422_v6 = vsel %vm2071_vm11, %v4402_v54, %v4395_v15  ;;  %v4442_v47 = vrot.slane %v8056_v19, 3  ;;  %v4436_v16 = vrot.slane %v8056_v19, 2  ;;  %v4458_v46 = vrot.slane %v8056_v19, 6  ;;  %4596 = vmatpush.bf16.msrb.mxu1 %v5481_v38  ;;  %4610 = vmatpush.bf16.msra.mxu2 %v5488_v36  ;;  %v5634_v15 = vld [vmem:[%s8194_s16] ss:$0 sm:$0xff] }
 0x4d1   : > { %v4423_v61 = vsel %vm2073_vm12, %v4409_v5, %v4422_v6  ;;  %v4430_v22 = vrot.slane %v8056_v19, 1  ;;  %v4452_v17 = vrot.slane %v8056_v19, 5  ;;  %v4448_v18 = vrot.slane %v8056_v19, 4  ;;  %4679 = vmatpush.msra.mxu3 %v5353_v27 }
 0x4d2   : > { %v4427_v57 = vsel %vm633_vm0, %v4423_v61, 0.0 }
 0x4d3   : > { %v4443_v25 = vrot.slane %v4427_v57, 3  ;;  %v4437_v7 = vrot.slane %v4427_v57, 2  ;;  %v4459_v31 = vrot.slane %v4427_v57, 6  ;;  %v4431_v20 = vrot.slane %v4427_v57, 1  ;;  %4701 = vmatpush.msrb.mxu3 %v4656_v56 }
 0x4d4   : > { %v4453_v49 = vrot.slane %v4427_v57, 5  ;;  %4597 = vmatpush.bf16.msrb.mxu1 %v5480_v51  ;;  %4611 = vmatpush.bf16.msra.mxu2 %v5487_v3  ;;  %v4449_v53 = vrot.slane %v4427_v57, 4 }
 0x4d5   : > { %v4444_v41 = vsel %vm994_vm3, %v4442_v47, %v4443_v25  ;;  %v4438_v35 = vsel %vm8477_vm1, %v4436_v16, %v4437_v7  ;;  %v4460_v1 = vsel %vm1296_vm5, %v4458_v46, %v4459_v31  ;;  %v4432_v32 = vsel %vm8478_vm7, %v4430_v22, %v4431_v20  ;;  %vm8479_vm5 = vmmov %vm8471_vm2  ;;  %4702 = vmatpush.msrb.mxu3 %v4655_v63 }
 0x4d6   : > { %4445 = vrot.lane.b32.xlu1 %v4444_v41, %s5705_s29  ;;  %v5619_v42 = vpack.i.bf16 %v4438_v35, %v4460_v1  ;;  %v4454_v52 = vsel %vm633_vm0, %v4452_v17, %v4453_v49  ;;  %vm4464_vm0 = vcmask 261120   ;;  %v4450_v50 = vsel %vm1095_vm4, %v4448_v18, %v4449_v53  ;;  %s4766_s29 = scalar_lea.sflag [#allocation3], %s593_s23 }
 0x4d7   : > { %v5614_v30 = vpack.i.bf16 %v4432_v32, %v4454_v52  ;;  %vm4467_vm3 = vcmask 785408   ;;  %vm4626_vm4 = vcmask 123904  }
 0x4d8   : > { %5620 = vrot.lane.b32.xlu0 %v5619_v42, %s8452_s22  ;;  %4598 = vmatpush.bf16.msrb.mxu1 %v5479_v28  ;;  %s4778_s22 = sshll.u32 %s4774_s25, 4  ;;  %s4779_s22 = int_to_ptr.hbm [resolvable:$true] %s4778_s22 }
 0x4d9   : > { %5615 = vrot.lane.b32.xlu2 %v5614_v30, %s5706_s28  ;;  %4612 = vmatpush.bf16.msra.mxu2 %v5486_v21  ;;  %s5652_s28 = sshra.s32 %s4779_s22, 4  ;;  %s5653_s28 = int_to_ptr.hbm [resolvable:$true] %s5652_s28 }
 0x4da   : > { %s5654_s1 = scalar_lea.hbm %s5653_s28, 1  ;;  %p5659_p0 = scmp.lt.s32.totalorder %s5653_s28, %s8197_s19 }
 0x4db   : > { %p5655_p11 = scmp.ne.s32.totalorder %s5653_s28, %s5654_s1  ;;  %p5660_p1 = scmp.lt.s32.totalorder %s5658_s5, %s5654_s1 }
 0x4dc   : > { %4599 = vmatpush.bf16.msrb.mxu1 %v5478_v39 }
 0x4dd   : > { %p5656_p12 = pnand %p5655_p11, %p5845_p5  ;;  %p5661_p2 = por %p5660_p1, %p5659_p0 }
 0x4df   : > { %p5657_p13 = pneg %p5656_p12 }
 0x4e0   : > { %4754 = vmatpush.msra.mxu1 %v5361_v9 }
 0x4e1   : > { %p5662_p3 = pnand %p5661_p2, %p5657_p13 }
 0x4e2   : > { %4755 = vmatpush.msra.mxu1 %v5360_v11 }
 0x533   : > { %v5616_v58 = vpop.permute.xlu2 %5615 }
 0x534   : > { %v5618_v59 = vunpack.i.h.bf16 %v5616_v58  ;;  %v5617_v60 = vunpack.i.l.bf16 %v5616_v58 }
 0x536   : > { %v4465_v40 = vsel %vm4464_vm0, %v8056_v19, %v5618_v59  ;;  %v4469_v12 = vsel %vm4464_vm0, %v4450_v50, %v5617_v60  ;;  %v4761_v50 = vld [vmem:[%s8196_s18] sm:$0x1] }
 0x548   : > { %v4446_v43 = vpop.permute.xlu1 %4445 }
 0x54a   : > { %v5621_v24 = vpop.permute.xlu0 %5620 }
 0x54b   : > { %v5623_v13 = vunpack.i.h.bf16 %v5621_v24  ;;  %v5622_v29 = vunpack.i.l.bf16 %v5621_v24 }
 0x54d   : > { %v4466_v33 = vsel %vm8479_vm5, %v4465_v40, %v5623_v13  ;;  %v4470_v37 = vsel %vm8480_vm8, %v4469_v12, %v5622_v29 }
 0x54e   : > { %v4472_v26 = vpack.c.bf16 %v4470_v37, %v4470_v37  ;;  %v4468_v44 = vsel %vm4467_vm3, %v4466_v33, %v4446_v43 }
 0x54f   : > { %v4471_v2 = vpack.c.bf16 %v4468_v44, %v4468_v44 }
 0x550   : > { %5352 = vmatmul.msk.bf16.vlgmr.msra.gmra.mxu2 %vm4467_vm3, %v4472_v26 }
 0x551   : > { %4600 = vmatmul.bf16.vlgmr.msrb.gmra.mxu1 %v4471_v2 }
 0x5ce   : > { %v4601_v4 = vpop.f32.mrf.mxu1 }
 0x5cf   : > { %v4602_v54 = vadd.f32 %v5634_v15, %v4601_v4 }
 0x5d3   : > { %v4614_v5 = vpop.f32.mrf.mxu2 }
 0x5d4   : > { %v4615_v62 = vadd.f32 %v4614_v5, %v4602_v54 }
 0x5d6   : > { %v4618_v19 = vmax.f32 %v4615_v62, 0.0  ;;  %v4603_v6 = vpop.f32.mrf.mxu1 }
 0x5d8   : > { %v4620_v61 = vrot.slane %v4618_v19, 2  ;;  %v4621_v47 = vrot.slane %v4618_v19, 4  ;;  %v4622_v57 = vrot.slane %v4618_v19, 6  ;;  %v4627_v16 = vsel %vm4626_vm4, %v4618_v19, -inf }
 0x5d9   : > { %v4628_v46 = vrot.slane %v4627_v16, 4 }
 0x5da   : > { %v4634_v22 = vsel %vm4626_vm4, %v4620_v61, -inf  ;;  %v4641_v25 = vsel %vm4626_vm4, %v4621_v47, -inf  ;;  %v4648_v7 = vsel %vm4626_vm4, %v4622_v57, -inf }
 0x5db   : > { %v4635_v31 = vrot.slane %v4634_v22, 4  ;;  %v4642_v20 = vrot.slane %v4641_v25, 4  ;;  %v4649_v17 = vrot.slane %v4648_v7, 4  ;;  %v4616_v49 = vpop.f32.mrf.mxu2  ;;  %v4629_v41 = vmax.f32 %v4627_v16, %v4628_v46 }
 0x5dd   : > { %v4636_v35 = vmax.f32 %v4634_v22, %v4635_v31  ;;  %v4643_v1 = vmax.f32 %v4641_v25, %v4642_v20  ;;  %v4650_v32 = vmax.f32 %v4648_v7, %v4649_v17  ;;  %v4630_v48 = vrot.slane %v4629_v41, 2 }
 0x5df   : > { %v4637_v42 = vrot.slane %v4636_v35, 2  ;;  %v4644_v52 = vrot.slane %v4643_v1, 2  ;;  %v4651_v30 = vrot.slane %v4650_v32, 2  ;;  %v4631_v36 = vmax.f32 %v4629_v41, %v4630_v48 }
 0x5e1   : > { %v4638_v34 = vmax.f32 %v4636_v35, %v4637_v42  ;;  %v4645_v14 = vmax.f32 %v4643_v1, %v4644_v52  ;;  %v4652_v55 = vmax.f32 %v4650_v32, %v4651_v30  ;;  %v4632_v21 = vrot.slane %v4631_v36, 1 }
 0x5e3   : > { %v4639_v45 = vrot.slane %v4638_v34, 1  ;;  %v4646_v8 = vrot.slane %v4645_v14, 1  ;;  %v4653_v38 = vrot.slane %v4652_v55, 1  ;;  %v4633_v39 = vmax.f32 %v4631_v36, %v4632_v21 }
 0x5e5   : > { %v4640_v51 = vmax.f32 %v4638_v34, %v4639_v45  ;;  %v4647_v3 = vmax.f32 %v4645_v14, %v4646_v8  ;;  %v4654_v28 = vmax.f32 %v4652_v55, %v4653_v38 }
 0x5e7   : > { %5355 = vmatmul.msk.f32.vlgmr.msra.gmra.mxu3 %vm4660_vm9, %v4640_v51  ;;  %5359 = vmatmul.msk.f32.vlgmr.msra.gmra.mxu0 %vm4660_vm9, %v4647_v3 }
 0x5e8   : > { %5362 = vmatmul.msk.f32.vlgmr.msra.gmra.mxu1 %vm4660_vm9, %v4654_v28 }
 0x5ef   : > { %5356 = vmatmul.msk.f32.vlgmr.msrb.gmra.mxu3 %vm4660_vm9, %v4633_v39 }
 0x664   : > { %v4730_v60 = vpop.f32.mrf.mxu0 }
 0x665   : > { %v4757_v24 = vpop.f32.mrf.mxu1 }
 0x66a   : > { %v4681_v58 = vpop.f32.mrf.mxu3 }
 0x672   : > { %v4704_v53 = vpop.f32.mrf.mxu3 }
 0x673   : > { %v4705_v59 = vadd.f32 %v4704_v53, %v4681_v58 }
 0x675   : > { %v4733_v18 = vadd.f32 %v4730_v60, %v4705_v59 }
 0x677   : > { %v4760_v13 = vadd.f32 %v4757_v24, %v4733_v18 }
 0x679   : > { %v4762_v29 = vadd.f32 %v4761_v50, %v4760_v13 }
 0x67b   : > { %4764 = vst.msk [vmem:[%s594_s4] sm:$0x1] %vm4763_vm10, %v4762_v29 }
 0x67c   : > { %5665 = shalt.err (!%p5662_p3)
}
 0x67d   : > { %5492 = dma.vmem_to_hbm [thread:$0]  (%p5845_p5), %s4777_s24, 16, %s4779_s22, %s4766_s29  }
 0x67e PF: > { %p5498_p4 = scmp.ge.s32.totalorder %s5700_s21, 2  ;;  %s4790_s23 = sand.u32 1, %s5688_s0  }
 0x67f   : > { %s4791_s4 = scalar_lea.sflag [#allocation3], %s4790_s23 }
 0x680   : > { %p5495_p7 = pnand %p5498_p4, %p5849_p6 }
 0x682   : > { %p5496_p8 = pneg %p5495_p7 }
 0x684   : > { %5683 = dma.done.wait (%p5496_p8), %s4791_s4, 16  }
 0x685   : > { %5685 = vsyncadd (%p5496_p8), %s4791_s4, 4294967280  ;;  %s8481_s28 = sld [smem:[#allocation5_spill]]  ;;  %p29_p9 = scmp.ge.s32.totalorder %s5832_s2, 4  }
 0x686   : > { %s8482_s20 = sld [smem:[#allocation6_spill]]  ;;  %s8483_s0 = smov %s5692_s30 }
 0x687   : > { %s8485_s21 = smov %s5832_s2  ;;  %31 = sbr.rel (!%p29_p9) target bundleno = 11 (0xb), region = 134 }
 0x68b   : > { %s8484_s30 = smov %s8481_s28 }
 0x68c   :  { %4796 = vsyncpa [#allocation3], 1 }
 0x68d   :  { %4798 = vsyncpa [#allocation3 + $0x1], 1 }

</bundles_post_ra>
